<compile_context>
chip_gen: v7x
topology: tpu7x:2x2x1
jax: 0.10.0
libtpu: 0.0.40
codegen_flags: <defaults>
</compile_context>

<pallas_src>
import functools

import jax
import jax.numpy as jnp
from jax.experimental import pallas as pl
from jax.experimental.pallas import tpu as pltpu


def _ssa_kernel(x_ref, hid_ref, oprm_ref, o_ref, *, identity):
    B, H, W, cin = x_ref.shape
    chid = hid_ref.shape[1]
    cout = o_ref.shape[3]
    tok = H - 1                      # token grid is tok x tok (W == tok)

    x = x_ref[...].astype(jnp.float32)       # (B, H, W, cin)
    hp = hid_ref[...]                        # (cin + 14, chid) packed hidden-dim params
    op = oprm_ref[...]                       # (chid + 2, cout) packed output-dim params

    # Packed-row layout of hp (see wrapper):
    #   [0, cin)              conv_exp weight rows (per input channel)
    #   [cin, cin + 9)        depthwise 3x3 taps, row di*3 + dj
    #   cin + 9 / cin + 10    BN1 scale / shift
    #   cin + 11              BN2 scale
    #   cin + 12              BN2 shift for spatial rows (depthwise bias folded in)
    #   cin + 13              BN2 shift for the cls row
    bn1s = hp[cin + 9:cin + 10, :]
    bn1b = hp[cin + 10:cin + 11, :]
    bn2s = hp[cin + 11:cin + 12, :]
    bn2b_sp = hp[cin + 12:cin + 13, :]
    bn2b_cls = hp[cin + 13:cin + 14, :]
    bn3s = op[chid:chid + 1, :]
    bn3b = op[chid + 1:chid + 2, :]

    # ---- conv_exp (1x1, no bias) + BN1 + ReLU6 as unrolled VPU broadcast-FMAs ----
    def expand(v):                           # (..., cin) -> (..., chid)
        acc = v[..., 0:1] * hp[0:1, :]
        for c in range(1, cin):
            acc = acc + v[..., c:c + 1] * hp[c:c + 1, :]
        return jnp.clip(acc * bn1s + bn1b, 0.0, 6.0)

    h_sp = expand(x[:, 1:, :, :])            # (B, tok, tok, chid) spatial rows
    h_cls = expand(x[:, 0:1, :, :])          # (B, 1,   tok, chid) cls row

    # ---- SpatialConv2d(reshape_dim=0): depthwise 3x3 'same' conv on token grid ----
    # Zero-padded halo built as a value; the 9 taps are register-resident slices.
    zc = jnp.zeros((B, tok, 1, chid), jnp.float32)
    hpad = jnp.concatenate([zc, h_sp, zc], axis=2)           # (B, tok,   tok+2, chid)
    zr = jnp.zeros((B, 1, tok + 2, chid), jnp.float32)
    hpad = jnp.concatenate([zr, hpad, zr], axis=1)           # (B, tok+2, tok+2, chid)

    acc = jnp.zeros((B, tok, tok, chid), jnp.float32)
    for di in range(3):
        for dj in range(3):
            tap = hp[cin + di * 3 + dj:cin + di * 3 + dj + 1, :]
            acc = acc + tap * hpad[:, di:di + tok, dj:dj + tok, :]

    # ---- BN2 + ReLU6 (depthwise bias already folded into bn2b_sp) ----
    g_sp = jnp.clip(acc * bn2s + bn2b_sp, 0.0, 6.0)
    g_cls = jnp.clip(h_cls * bn2s + bn2b_cls, 0.0, 6.0)

    # ---- conv_pro (1x1, no bias) + BN3 as unrolled VPU broadcast-FMAs ----
    def project(g):                          # (..., chid) -> (..., cout)
        y = g[..., 0:1] * op[0:1, :]
        for k in range(1, chid):
            y = y + g[..., k:k + 1] * op[k:k + 1, :]
        return y * bn3s + bn3b

    y_sp = project(g_sp)                     # (B, tok, tok, cout)
    y_cls = project(g_cls)                   # (B, 1,   tok, cout)

    if identity:                             # residual add, positional alignment
        y_sp = y_sp + x[:, 0:tok, :, :]
        y_cls = y_cls + x[:, tok:tok + 1, :, :]

    # conv rows land at output rows [0, tok); the cls row lands at the last output
    # row (matching the module's torch.cat order). Two disjoint region stores.
    o_ref[:, 0:tok, :, :] = y_sp.astype(o_ref.dtype)
    o_ref[:, tok:tok + 1, :, :] = y_cls.astype(o_ref.dtype)


def spatial_self_attention(x_nhwc, params, *, identity):
    (w_exp, bn1s, bn1b, w_dw, dw_b, bn2s, bn2b, w_pro, bn3s, bn3b) = params
    B, H, W, cin = x_nhwc.shape
    chid = w_exp.shape[1]
    cout = w_pro.shape[1]
    tok = H - 1
    assert W == tok, "token grid must be (H-1) x W with W == H-1"
    if identity:
        assert cin == cout, "identity residual requires inp == oup"

    f32 = jnp.float32
    # Pack per-channel params: hidden-dim vectors into one (cin+14, chid) array and
    # output-dim vectors into one (chid+2, cout) array (3 DMAs instead of 11).
    # Depthwise-conv bias is folded into the BN2 shift of the spatial rows only.
    hid = jnp.concatenate(
        [w_exp, w_dw.reshape(9, chid), bn1s, bn1b, bn2s, bn2b + dw_b * bn2s, bn2b],
        axis=0).astype(f32)                                   # (cin + 14, chid)
    opr = jnp.concatenate([w_pro, bn3s, bn3b], axis=0).astype(f32)   # (chid + 2, cout)

    kernel = functools.partial(_ssa_kernel, identity=identity)

    return pl.pallas_call(
        kernel,
        out_shape=jax.ShapeDtypeStruct((B, H, W, cout), f32),
        grid_spec=pltpu.PrefetchScalarGridSpec(
            num_scalar_prefetch=0,
            grid=(1,),   # whole batch in one step: nothing to pipeline at this size
            in_specs=[
                pl.BlockSpec((B, H, W, cin), lambda i: (0, 0, 0, 0)),
                pl.BlockSpec((cin + 14, chid), lambda i: (0, 0)),
                pl.BlockSpec((chid + 2, cout), lambda i: (0, 0)),
            ],
            out_specs=pl.BlockSpec((B, H, W, cout), lambda i: (0, 0, 0, 0)),
        ),
        compiler_params=pltpu.CompilerParams(dimension_semantics=("arbitrary",)),
    )(x_nhwc.astype(f32), hid, opr)


# ---------------- pure-JAX reference (for correctness check) ----------------
def reference(x_nhwc, params, *, identity):
    (w_exp, bn1s, bn1b, w_dw, dw_b, bn2s, bn2b, w_pro, bn3s, bn3b) = params
    chid = w_exp.shape[1]
    h = jnp.einsum('bhwc,cd->bhwd', x_nhwc, w_exp)
    h = jnp.clip(h * bn1s + bn1b, 0.0, 6.0)
    spatial = h[:, 1:, :, :]
    conv = jax.lax.conv_general_dilated(
        spatial, w_dw[:, :, None, :], (1, 1), 'SAME',
        dimension_numbers=('NHWC', 'HWIO', 'NHWC'),
        feature_group_count=chid) + dw_b
    rows = jnp.concatenate([conv, h[:, 0:1, :, :]], axis=1)
    g = jnp.clip(rows * bn2s + bn2b, 0.0, 6.0)
    y = jnp.einsum('bhwc,cd->bhwd', g, w_pro)
    y = y * bn3s + bn3b
    if identity:
        y = y + x_nhwc
    return y


def _bn_fold(gamma, beta, mean, var, eps=1e-5):
    scale = gamma / jnp.sqrt(var + eps)
    shift = beta - mean * scale
    return scale.reshape(1, -1), shift.reshape(1, -1)


if __name__ == "__main__":
    # Module config: SpatialSelfAttention(inp=4, oup=4, kernel_size=3, stride=1,
    # expand_ratio=6, transform_mode='conv2d'), token_num=4 for the inner
    # SpatialConv2d (so H = token_num + 1 = 5, W = token_num = 4).
    inp = oup = 4
    expand_ratio = 6
    chid = round(inp * expand_ratio)          # 24
    token_num = 4
    H, W = token_num + 1, token_num
    B = 2
    identity = True                           # stride == 1 and inp == oup

    key = jax.random.PRNGKey(0)
    ks = jax.random.split(key, 8)

    # PyTorch-convention NCHW input, transposed to NHWC for the kernel.
    x_nchw = jax.random.normal(ks[0], (B, inp, H, W), jnp.float32)
    x_nhwc = jnp.transpose(x_nchw, (0, 2, 3, 1))

    # Deterministic synthetic parameters (shapes from the module __init__).
    w_exp = 0.2 * jax.random.normal(ks[1], (inp, chid), jnp.float32)    # conv_exp 1x1
    w_dw = 0.2 * jax.random.normal(ks[2], (3, 3, chid), jnp.float32)    # depthwise 3x3
    dw_b = 0.1 * jax.random.normal(ks[3], (1, chid), jnp.float32)       # depthwise bias
    w_pro = 0.2 * jax.random.normal(ks[4], (chid, oup), jnp.float32)    # conv_pro 1x1

    def bn_params(k, c):
        k1, k2, k3, k4 = jax.random.split(k, 4)
        gamma = 1.0 + 0.1 * jax.random.normal(k1, (c,), jnp.float32)
        beta = 0.1 * jax.random.normal(k2, (c,), jnp.float32)
        mean = 0.1 * jax.random.normal(k3, (c,), jnp.float32)
        var = 1.0 + 0.1 * jax.random.uniform(k4, (c,), jnp.float32)
        return _bn_fold(gamma, beta, mean, var)

    bn1s, bn1b = bn_params(ks[5], chid)
    bn2s, bn2b = bn_params(ks[6], chid)
    bn3s, bn3b = bn_params(ks[7], oup)

    params = (w_exp, bn1s, bn1b, w_dw, dw_b, bn2s, bn2b, w_pro, bn3s, bn3b)

    out = spatial_self_attention(x_nhwc, params, identity=identity)
    out = jax.block_until_ready(out)

    ref = reference(x_nhwc, params, identity=identity)
    assert out.shape == (B, H, W, oup)
    max_err = float(jnp.max(jnp.abs(out - ref)))
    assert jnp.allclose(out, ref, rtol=1e-2, atol=1e-2), max_err

    print("KERNEL_OK")
</pallas_src>

<mosaic_0001>
module attributes {stable_mosaic.version = 11 : i64} {
  func.func @_ssa_kernel(%arg0: i32, %arg1: memref<2x5x4x4xf32, #tpu.memory_space<vmem>>, %arg2: memref<18x24xf32, #tpu.memory_space<vmem>>, %arg3: memref<26x4xf32, #tpu.memory_space<vmem>>, %arg4: memref<2x5x4x4xf32, #tpu.memory_space<vmem>>) attributes {dimension_semantics = [#tpu.dimension_semantics<arbitrary>], iteration_bounds = array<i64: 1>, scalar_prefetch = 0 : i64, scratch_operands = 0 : i64, tpu.core_type = #tpu.core_type<tc>, window_params = [{pipeline_mode = #tpu.pipeline_mode<synchronous>, transform_indices = @transform_0, window_bounds = array<i64: 2, 5, 4, 4>}, {pipeline_mode = #tpu.pipeline_mode<synchronous>, transform_indices = @transform_1, window_bounds = array<i64: 18, 24>}, {pipeline_mode = #tpu.pipeline_mode<synchronous>, transform_indices = @transform_2, window_bounds = array<i64: 26, 4>}, {pipeline_mode = #tpu.pipeline_mode<synchronous>, transform_indices = @transform_3, window_bounds = array<i64: 2, 5, 4, 4>}]} {
    %c0 = arith.constant 0 : index
    %c0_0 = arith.constant 0 : index
    %c0_1 = arith.constant 0 : index
    %c0_2 = arith.constant 0 : index
    %0 = vector.load %arg1[%c0, %c0_0, %c0_1, %c0_2] : memref<2x5x4x4xf32, #tpu.memory_space<vmem>>, vector<2x5x4x4xf32>
    %c0_3 = arith.constant 0 : index
    %c0_4 = arith.constant 0 : index
    %1 = vector.load %arg2[%c0_3, %c0_4] : memref<18x24xf32, #tpu.memory_space<vmem>>, vector<18x24xf32>
    %c0_5 = arith.constant 0 : index
    %c0_6 = arith.constant 0 : index
    %2 = vector.load %arg3[%c0_5, %c0_6] : memref<26x4xf32, #tpu.memory_space<vmem>>, vector<26x4xf32>
    %3 = vector.extract_strided_slice %1 {offsets = [13, 0], sizes = [1, 24], strides = [1, 1]} : vector<18x24xf32> to vector<1x24xf32>
    %4 = vector.extract_strided_slice %1 {offsets = [14, 0], sizes = [1, 24], strides = [1, 1]} : vector<18x24xf32> to vector<1x24xf32>
    %5 = vector.extract_strided_slice %1 {offsets = [15, 0], sizes = [1, 24], strides = [1, 1]} : vector<18x24xf32> to vector<1x24xf32>
    %6 = vector.extract_strided_slice %1 {offsets = [16, 0], sizes = [1, 24], strides = [1, 1]} : vector<18x24xf32> to vector<1x24xf32>
    %7 = vector.extract_strided_slice %1 {offsets = [17, 0], sizes = [1, 24], strides = [1, 1]} : vector<18x24xf32> to vector<1x24xf32>
    %8 = vector.extract_strided_slice %2 {offsets = [24, 0], sizes = [1, 4], strides = [1, 1]} : vector<26x4xf32> to vector<1x4xf32>
    %9 = vector.extract_strided_slice %2 {offsets = [25, 0], sizes = [1, 4], strides = [1, 1]} : vector<26x4xf32> to vector<1x4xf32>
    %10 = vector.extract_strided_slice %0 {offsets = [0, 1, 0, 0], sizes = [2, 4, 4, 4], strides = [1, 1, 1, 1]} : vector<2x5x4x4xf32> to vector<2x4x4x4xf32>
    %11 = vector.extract_strided_slice %10 {offsets = [0, 0, 0, 0], sizes = [2, 4, 4, 1], strides = [1, 1, 1, 1]} : vector<2x4x4x4xf32> to vector<2x4x4x1xf32>
    %12 = vector.extract_strided_slice %1 {offsets = [0, 0], sizes = [1, 24], strides = [1, 1]} : vector<18x24xf32> to vector<1x24xf32>
    %13 = vector.shape_cast %12 : vector<1x24xf32> to vector<1x1x1x24xf32>
    %14 = vector.broadcast %11 : vector<2x4x4x1xf32> to vector<2x4x4x24xf32>
    %15 = vector.broadcast %13 : vector<1x1x1x24xf32> to vector<2x4x4x24xf32>
    %16 = arith.mulf %14, %15 : vector<2x4x4x24xf32>
    %17 = vector.extract_strided_slice %10 {offsets = [0, 0, 0, 1], sizes = [2, 4, 4, 1], strides = [1, 1, 1, 1]} : vector<2x4x4x4xf32> to vector<2x4x4x1xf32>
    %18 = vector.extract_strided_slice %1 {offsets = [1, 0], sizes = [1, 24], strides = [1, 1]} : vector<18x24xf32> to vector<1x24xf32>
    %19 = vector.shape_cast %18 : vector<1x24xf32> to vector<1x1x1x24xf32>
    %20 = vector.broadcast %17 : vector<2x4x4x1xf32> to vector<2x4x4x24xf32>
    %21 = vector.broadcast %19 : vector<1x1x1x24xf32> to vector<2x4x4x24xf32>
    %22 = arith.mulf %20, %21 : vector<2x4x4x24xf32>
    %23 = arith.addf %16, %22 : vector<2x4x4x24xf32>
    %24 = vector.extract_strided_slice %10 {offsets = [0, 0, 0, 2], sizes = [2, 4, 4, 1], strides = [1, 1, 1, 1]} : vector<2x4x4x4xf32> to vector<2x4x4x1xf32>
    %25 = vector.extract_strided_slice %1 {offsets = [2, 0], sizes = [1, 24], strides = [1, 1]} : vector<18x24xf32> to vector<1x24xf32>
    %26 = vector.shape_cast %25 : vector<1x24xf32> to vector<1x1x1x24xf32>
    %27 = vector.broadcast %24 : vector<2x4x4x1xf32> to vector<2x4x4x24xf32>
    %28 = vector.broadcast %26 : vector<1x1x1x24xf32> to vector<2x4x4x24xf32>
    %29 = arith.mulf %27, %28 : vector<2x4x4x24xf32>
    %30 = arith.addf %23, %29 : vector<2x4x4x24xf32>
    %31 = vector.extract_strided_slice %10 {offsets = [0, 0, 0, 3], sizes = [2, 4, 4, 1], strides = [1, 1, 1, 1]} : vector<2x4x4x4xf32> to vector<2x4x4x1xf32>
    %32 = vector.extract_strided_slice %1 {offsets = [3, 0], sizes = [1, 24], strides = [1, 1]} : vector<18x24xf32> to vector<1x24xf32>
    %33 = vector.shape_cast %32 : vector<1x24xf32> to vector<1x1x1x24xf32>
    %34 = vector.broadcast %31 : vector<2x4x4x1xf32> to vector<2x4x4x24xf32>
    %35 = vector.broadcast %33 : vector<1x1x1x24xf32> to vector<2x4x4x24xf32>
    %36 = arith.mulf %34, %35 : vector<2x4x4x24xf32>
    %37 = arith.addf %30, %36 : vector<2x4x4x24xf32>
    %38 = vector.shape_cast %3 : vector<1x24xf32> to vector<1x1x1x24xf32>
    %39 = vector.broadcast %38 : vector<1x1x1x24xf32> to vector<2x4x4x24xf32>
    %40 = arith.mulf %37, %39 : vector<2x4x4x24xf32>
    %41 = vector.shape_cast %4 : vector<1x24xf32> to vector<1x1x1x24xf32>
    %42 = vector.broadcast %41 : vector<1x1x1x24xf32> to vector<2x4x4x24xf32>
    %43 = arith.addf %40, %42 : vector<2x4x4x24xf32>
    %cst = arith.constant 0.000000e+00 : f32
    %cst_7 = arith.constant 6.000000e+00 : f32
    %44 = vector.broadcast %cst : f32 to vector<2x4x4x24xf32>
    %45 = arith.maximumf %44, %43 : vector<2x4x4x24xf32>
    %46 = vector.broadcast %cst_7 : f32 to vector<2x4x4x24xf32>
    %47 = arith.minimumf %46, %45 : vector<2x4x4x24xf32>
    %48 = vector.extract_strided_slice %0 {offsets = [0, 0, 0, 0], sizes = [2, 1, 4, 4], strides = [1, 1, 1, 1]} : vector<2x5x4x4xf32> to vector<2x1x4x4xf32>
    %49 = vector.extract_strided_slice %48 {offsets = [0, 0, 0, 0], sizes = [2, 1, 4, 1], strides = [1, 1, 1, 1]} : vector<2x1x4x4xf32> to vector<2x1x4x1xf32>
    %50 = vector.extract_strided_slice %1 {offsets = [0, 0], sizes = [1, 24], strides = [1, 1]} : vector<18x24xf32> to vector<1x24xf32>
    %51 = vector.shape_cast %50 : vector<1x24xf32> to vector<1x1x1x24xf32>
    %52 = vector.broadcast %49 : vector<2x1x4x1xf32> to vector<2x1x4x24xf32>
    %53 = vector.broadcast %51 : vector<1x1x1x24xf32> to vector<2x1x4x24xf32>
    %54 = arith.mulf %52, %53 : vector<2x1x4x24xf32>
    %55 = vector.extract_strided_slice %48 {offsets = [0, 0, 0, 1], sizes = [2, 1, 4, 1], strides = [1, 1, 1, 1]} : vector<2x1x4x4xf32> to vector<2x1x4x1xf32>
    %56 = vector.extract_strided_slice %1 {offsets = [1, 0], sizes = [1, 24], strides = [1, 1]} : vector<18x24xf32> to vector<1x24xf32>
    %57 = vector.shape_cast %56 : vector<1x24xf32> to vector<1x1x1x24xf32>
    %58 = vector.broadcast %55 : vector<2x1x4x1xf32> to vector<2x1x4x24xf32>
    %59 = vector.broadcast %57 : vector<1x1x1x24xf32> to vector<2x1x4x24xf32>
    %60 = arith.mulf %58, %59 : vector<2x1x4x24xf32>
    %61 = arith.addf %54, %60 : vector<2x1x4x24xf32>
    %62 = vector.extract_strided_slice %48 {offsets = [0, 0, 0, 2], sizes = [2, 1, 4, 1], strides = [1, 1, 1, 1]} : vector<2x1x4x4xf32> to vector<2x1x4x1xf32>
    %63 = vector.extract_strided_slice %1 {offsets = [2, 0], sizes = [1, 24], strides = [1, 1]} : vector<18x24xf32> to vector<1x24xf32>
    %64 = vector.shape_cast %63 : vector<1x24xf32> to vector<1x1x1x24xf32>
    %65 = vector.broadcast %62 : vector<2x1x4x1xf32> to vector<2x1x4x24xf32>
    %66 = vector.broadcast %64 : vector<1x1x1x24xf32> to vector<2x1x4x24xf32>
    %67 = arith.mulf %65, %66 : vector<2x1x4x24xf32>
    %68 = arith.addf %61, %67 : vector<2x1x4x24xf32>
    %69 = vector.extract_strided_slice %48 {offsets = [0, 0, 0, 3], sizes = [2, 1, 4, 1], strides = [1, 1, 1, 1]} : vector<2x1x4x4xf32> to vector<2x1x4x1xf32>
    %70 = vector.extract_strided_slice %1 {offsets = [3, 0], sizes = [1, 24], strides = [1, 1]} : vector<18x24xf32> to vector<1x24xf32>
    %71 = vector.shape_cast %70 : vector<1x24xf32> to vector<1x1x1x24xf32>
    %72 = vector.broadcast %69 : vector<2x1x4x1xf32> to vector<2x1x4x24xf32>
    %73 = vector.broadcast %71 : vector<1x1x1x24xf32> to vector<2x1x4x24xf32>
    %74 = arith.mulf %72, %73 : vector<2x1x4x24xf32>
    %75 = arith.addf %68, %74 : vector<2x1x4x24xf32>
    %76 = vector.shape_cast %3 : vector<1x24xf32> to vector<1x1x1x24xf32>
    %77 = vector.broadcast %76 : vector<1x1x1x24xf32> to vector<2x1x4x24xf32>
    %78 = arith.mulf %75, %77 : vector<2x1x4x24xf32>
    %79 = vector.shape_cast %4 : vector<1x24xf32> to vector<1x1x1x24xf32>
    %80 = vector.broadcast %79 : vector<1x1x1x24xf32> to vector<2x1x4x24xf32>
    %81 = arith.addf %78, %80 : vector<2x1x4x24xf32>
    %cst_8 = arith.constant 0.000000e+00 : f32
    %cst_9 = arith.constant 6.000000e+00 : f32
    %82 = vector.broadcast %cst_8 : f32 to vector<2x1x4x24xf32>
    %83 = arith.maximumf %82, %81 : vector<2x1x4x24xf32>
    %84 = vector.broadcast %cst_9 : f32 to vector<2x1x4x24xf32>
    %85 = arith.minimumf %84, %83 : vector<2x1x4x24xf32>
    %cst_10 = arith.constant 0.000000e+00 : f32
    %86 = vector.broadcast %cst_10 : f32 to vector<2x4x1x24xf32>
    %87 = tpu.concatenate %86, %47, %86 in 2 : vector<2x4x1x24xf32>, vector<2x4x4x24xf32>, vector<2x4x1x24xf32> -> vector<2x4x6x24xf32>
    %cst_11 = arith.constant 0.000000e+00 : f32
    %88 = vector.broadcast %cst_11 : f32 to vector<2x1x6x24xf32>
    %89 = tpu.concatenate %88, %87, %88 in 1 : vector<2x1x6x24xf32>, vector<2x4x6x24xf32>, vector<2x1x6x24xf32> -> vector<2x6x6x24xf32>
    %cst_12 = arith.constant 0.000000e+00 : f32
    %90 = vector.broadcast %cst_12 : f32 to vector<2x4x4x24xf32>
    %91 = vector.extract_strided_slice %1 {offsets = [4, 0], sizes = [1, 24], strides = [1, 1]} : vector<18x24xf32> to vector<1x24xf32>
    %92 = vector.extract_strided_slice %89 {offsets = [0, 0, 0, 0], sizes = [2, 4, 4, 24], strides = [1, 1, 1, 1]} : vector<2x6x6x24xf32> to vector<2x4x4x24xf32>
    %93 = vector.shape_cast %91 : vector<1x24xf32> to vector<1x1x1x24xf32>
    %94 = vector.broadcast %93 : vector<1x1x1x24xf32> to vector<2x4x4x24xf32>
    %95 = arith.mulf %94, %92 : vector<2x4x4x24xf32>
    %96 = arith.addf %90, %95 : vector<2x4x4x24xf32>
    %97 = vector.extract_strided_slice %1 {offsets = [5, 0], sizes = [1, 24], strides = [1, 1]} : vector<18x24xf32> to vector<1x24xf32>
    %98 = vector.extract_strided_slice %89 {offsets = [0, 0, 1, 0], sizes = [2, 4, 4, 24], strides = [1, 1, 1, 1]} : vector<2x6x6x24xf32> to vector<2x4x4x24xf32>
    %99 = vector.shape_cast %97 : vector<1x24xf32> to vector<1x1x1x24xf32>
    %100 = vector.broadcast %99 : vector<1x1x1x24xf32> to vector<2x4x4x24xf32>
    %101 = arith.mulf %100, %98 : vector<2x4x4x24xf32>
    %102 = arith.addf %96, %101 : vector<2x4x4x24xf32>
    %103 = vector.extract_strided_slice %1 {offsets = [6, 0], sizes = [1, 24], strides = [1, 1]} : vector<18x24xf32> to vector<1x24xf32>
    %104 = vector.extract_strided_slice %89 {offsets = [0, 0, 2, 0], sizes = [2, 4, 4, 24], strides = [1, 1, 1, 1]} : vector<2x6x6x24xf32> to vector<2x4x4x24xf32>
    %105 = vector.shape_cast %103 : vector<1x24xf32> to vector<1x1x1x24xf32>
    %106 = vector.broadcast %105 : vector<1x1x1x24xf32> to vector<2x4x4x24xf32>
    %107 = arith.mulf %106, %104 : vector<2x4x4x24xf32>
    %108 = arith.addf %102, %107 : vector<2x4x4x24xf32>
    %109 = vector.extract_strided_slice %1 {offsets = [7, 0], sizes = [1, 24], strides = [1, 1]} : vector<18x24xf32> to vector<1x24xf32>
    %110 = vector.extract_strided_slice %89 {offsets = [0, 1, 0, 0], sizes = [2, 4, 4, 24], strides = [1, 1, 1, 1]} : vector<2x6x6x24xf32> to vector<2x4x4x24xf32>
    %111 = vector.shape_cast %109 : vector<1x24xf32> to vector<1x1x1x24xf32>
    %112 = vector.broadcast %111 : vector<1x1x1x24xf32> to vector<2x4x4x24xf32>
    %113 = arith.mulf %112, %110 : vector<2x4x4x24xf32>
    %114 = arith.addf %108, %113 : vector<2x4x4x24xf32>
    %115 = vector.extract_strided_slice %1 {offsets = [8, 0], sizes = [1, 24], strides = [1, 1]} : vector<18x24xf32> to vector<1x24xf32>
    %116 = vector.extract_strided_slice %89 {offsets = [0, 1, 1, 0], sizes = [2, 4, 4, 24], strides = [1, 1, 1, 1]} : vector<2x6x6x24xf32> to vector<2x4x4x24xf32>
    %117 = vector.shape_cast %115 : vector<1x24xf32> to vector<1x1x1x24xf32>
    %118 = vector.broadcast %117 : vector<1x1x1x24xf32> to vector<2x4x4x24xf32>
    %119 = arith.mulf %118, %116 : vector<2x4x4x24xf32>
    %120 = arith.addf %114, %119 : vector<2x4x4x24xf32>
    %121 = vector.extract_strided_slice %1 {offsets = [9, 0], sizes = [1, 24], strides = [1, 1]} : vector<18x24xf32> to vector<1x24xf32>
    %122 = vector.extract_strided_slice %89 {offsets = [0, 1, 2, 0], sizes = [2, 4, 4, 24], strides = [1, 1, 1, 1]} : vector<2x6x6x24xf32> to vector<2x4x4x24xf32>
    %123 = vector.shape_cast %121 : vector<1x24xf32> to vector<1x1x1x24xf32>
    %124 = vector.broadcast %123 : vector<1x1x1x24xf32> to vector<2x4x4x24xf32>
    %125 = arith.mulf %124, %122 : vector<2x4x4x24xf32>
    %126 = arith.addf %120, %125 : vector<2x4x4x24xf32>
    %127 = vector.extract_strided_slice %1 {offsets = [10, 0], sizes = [1, 24], strides = [1, 1]} : vector<18x24xf32> to vector<1x24xf32>
    %128 = vector.extract_strided_slice %89 {offsets = [0, 2, 0, 0], sizes = [2, 4, 4, 24], strides = [1, 1, 1, 1]} : vector<2x6x6x24xf32> to vector<2x4x4x24xf32>
    %129 = vector.shape_cast %127 : vector<1x24xf32> to vector<1x1x1x24xf32>
    %130 = vector.broadcast %129 : vector<1x1x1x24xf32> to vector<2x4x4x24xf32>
    %131 = arith.mulf %130, %128 : vector<2x4x4x24xf32>
    %132 = arith.addf %126, %131 : vector<2x4x4x24xf32>
    %133 = vector.extract_strided_slice %1 {offsets = [11, 0], sizes = [1, 24], strides = [1, 1]} : vector<18x24xf32> to vector<1x24xf32>
    %134 = vector.extract_strided_slice %89 {offsets = [0, 2, 1, 0], sizes = [2, 4, 4, 24], strides = [1, 1, 1, 1]} : vector<2x6x6x24xf32> to vector<2x4x4x24xf32>
    %135 = vector.shape_cast %133 : vector<1x24xf32> to vector<1x1x1x24xf32>
    %136 = vector.broadcast %135 : vector<1x1x1x24xf32> to vector<2x4x4x24xf32>
    %137 = arith.mulf %136, %134 : vector<2x4x4x24xf32>
    %138 = arith.addf %132, %137 : vector<2x4x4x24xf32>
    %139 = vector.extract_strided_slice %1 {offsets = [12, 0], sizes = [1, 24], strides = [1, 1]} : vector<18x24xf32> to vector<1x24xf32>
    %140 = vector.extract_strided_slice %89 {offsets = [0, 2, 2, 0], sizes = [2, 4, 4, 24], strides = [1, 1, 1, 1]} : vector<2x6x6x24xf32> to vector<2x4x4x24xf32>
    %141 = vector.shape_cast %139 : vector<1x24xf32> to vector<1x1x1x24xf32>
    %142 = vector.broadcast %141 : vector<1x1x1x24xf32> to vector<2x4x4x24xf32>
    %143 = arith.mulf %142, %140 : vector<2x4x4x24xf32>
    %144 = arith.addf %138, %143 : vector<2x4x4x24xf32>
    %145 = vector.shape_cast %5 : vector<1x24xf32> to vector<1x1x1x24xf32>
    %146 = vector.broadcast %145 : vector<1x1x1x24xf32> to vector<2x4x4x24xf32>
    %147 = arith.mulf %144, %146 : vector<2x4x4x24xf32>
    %148 = vector.shape_cast %6 : vector<1x24xf32> to vector<1x1x1x24xf32>
    %149 = vector.broadcast %148 : vector<1x1x1x24xf32> to vector<2x4x4x24xf32>
    %150 = arith.addf %147, %149 : vector<2x4x4x24xf32>
    %cst_13 = arith.constant 0.000000e+00 : f32
    %cst_14 = arith.constant 6.000000e+00 : f32
    %151 = vector.broadcast %cst_13 : f32 to vector<2x4x4x24xf32>
    %152 = arith.maximumf %151, %150 : vector<2x4x4x24xf32>
    %153 = vector.broadcast %cst_14 : f32 to vector<2x4x4x24xf32>
    %154 = arith.minimumf %153, %152 : vector<2x4x4x24xf32>
    %155 = vector.shape_cast %5 : vector<1x24xf32> to vector<1x1x1x24xf32>
    %156 = vector.broadcast %155 : vector<1x1x1x24xf32> to vector<2x1x4x24xf32>
    %157 = arith.mulf %85, %156 : vector<2x1x4x24xf32>
    %158 = vector.shape_cast %7 : vector<1x24xf32> to vector<1x1x1x24xf32>
    %159 = vector.broadcast %158 : vector<1x1x1x24xf32> to vector<2x1x4x24xf32>
    %160 = arith.addf %157, %159 : vector<2x1x4x24xf32>
    %cst_15 = arith.constant 0.000000e+00 : f32
    %cst_16 = arith.constant 6.000000e+00 : f32
    %161 = vector.broadcast %cst_15 : f32 to vector<2x1x4x24xf32>
    %162 = arith.maximumf %161, %160 : vector<2x1x4x24xf32>
    %163 = vector.broadcast %cst_16 : f32 to vector<2x1x4x24xf32>
    %164 = arith.minimumf %163, %162 : vector<2x1x4x24xf32>
    %165 = vector.extract_strided_slice %154 {offsets = [0, 0, 0, 0], sizes = [2, 4, 4, 1], strides = [1, 1, 1, 1]} : vector<2x4x4x24xf32> to vector<2x4x4x1xf32>
    %166 = vector.extract_strided_slice %2 {offsets = [0, 0], sizes = [1, 4], strides = [1, 1]} : vector<26x4xf32> to vector<1x4xf32>
    %167 = vector.shape_cast %166 : vector<1x4xf32> to vector<1x1x1x4xf32>
    %168 = vector.broadcast %165 : vector<2x4x4x1xf32> to vector<2x4x4x4xf32>
    %169 = vector.broadcast %167 : vector<1x1x1x4xf32> to vector<2x4x4x4xf32>
    %170 = arith.mulf %168, %169 : vector<2x4x4x4xf32>
    %171 = vector.extract_strided_slice %154 {offsets = [0, 0, 0, 1], sizes = [2, 4, 4, 1], strides = [1, 1, 1, 1]} : vector<2x4x4x24xf32> to vector<2x4x4x1xf32>
    %172 = vector.extract_strided_slice %2 {offsets = [1, 0], sizes = [1, 4], strides = [1, 1]} : vector<26x4xf32> to vector<1x4xf32>
    %173 = vector.shape_cast %172 : vector<1x4xf32> to vector<1x1x1x4xf32>
    %174 = vector.broadcast %171 : vector<2x4x4x1xf32> to vector<2x4x4x4xf32>
    %175 = vector.broadcast %173 : vector<1x1x1x4xf32> to vector<2x4x4x4xf32>
    %176 = arith.mulf %174, %175 : vector<2x4x4x4xf32>
    %177 = arith.addf %170, %176 : vector<2x4x4x4xf32>
    %178 = vector.extract_strided_slice %154 {offsets = [0, 0, 0, 2], sizes = [2, 4, 4, 1], strides = [1, 1, 1, 1]} : vector<2x4x4x24xf32> to vector<2x4x4x1xf32>
    %179 = vector.extract_strided_slice %2 {offsets = [2, 0], sizes = [1, 4], strides = [1, 1]} : vector<26x4xf32> to vector<1x4xf32>
    %180 = vector.shape_cast %179 : vector<1x4xf32> to vector<1x1x1x4xf32>
    %181 = vector.broadcast %178 : vector<2x4x4x1xf32> to vector<2x4x4x4xf32>
    %182 = vector.broadcast %180 : vector<1x1x1x4xf32> to vector<2x4x4x4xf32>
    %183 = arith.mulf %181, %182 : vector<2x4x4x4xf32>
    %184 = arith.addf %177, %183 : vector<2x4x4x4xf32>
    %185 = vector.extract_strided_slice %154 {offsets = [0, 0, 0, 3], sizes = [2, 4, 4, 1], strides = [1, 1, 1, 1]} : vector<2x4x4x24xf32> to vector<2x4x4x1xf32>
    %186 = vector.extract_strided_slice %2 {offsets = [3, 0], sizes = [1, 4], strides = [1, 1]} : vector<26x4xf32> to vector<1x4xf32>
    %187 = vector.shape_cast %186 : vector<1x4xf32> to vector<1x1x1x4xf32>
    %188 = vector.broadcast %185 : vector<2x4x4x1xf32> to vector<2x4x4x4xf32>
    %189 = vector.broadcast %187 : vector<1x1x1x4xf32> to vector<2x4x4x4xf32>
    %190 = arith.mulf %188, %189 : vector<2x4x4x4xf32>
    %191 = arith.addf %184, %190 : vector<2x4x4x4xf32>
    %192 = vector.extract_strided_slice %154 {offsets = [0, 0, 0, 4], sizes = [2, 4, 4, 1], strides = [1, 1, 1, 1]} : vector<2x4x4x24xf32> to vector<2x4x4x1xf32>
    %193 = vector.extract_strided_slice %2 {offsets = [4, 0], sizes = [1, 4], strides = [1, 1]} : vector<26x4xf32> to vector<1x4xf32>
    %194 = vector.shape_cast %193 : vector<1x4xf32> to vector<1x1x1x4xf32>
    %195 = vector.broadcast %192 : vector<2x4x4x1xf32> to vector<2x4x4x4xf32>
    %196 = vector.broadcast %194 : vector<1x1x1x4xf32> to vector<2x4x4x4xf32>
    %197 = arith.mulf %195, %196 : vector<2x4x4x4xf32>
    %198 = arith.addf %191, %197 : vector<2x4x4x4xf32>
    %199 = vector.extract_strided_slice %154 {offsets = [0, 0, 0, 5], sizes = [2, 4, 4, 1], strides = [1, 1, 1, 1]} : vector<2x4x4x24xf32> to vector<2x4x4x1xf32>
    %200 = vector.extract_strided_slice %2 {offsets = [5, 0], sizes = [1, 4], strides = [1, 1]} : vector<26x4xf32> to vector<1x4xf32>
    %201 = vector.shape_cast %200 : vector<1x4xf32> to vector<1x1x1x4xf32>
    %202 = vector.broadcast %199 : vector<2x4x4x1xf32> to vector<2x4x4x4xf32>
    %203 = vector.broadcast %201 : vector<1x1x1x4xf32> to vector<2x4x4x4xf32>
    %204 = arith.mulf %202, %203 : vector<2x4x4x4xf32>
    %205 = arith.addf %198, %204 : vector<2x4x4x4xf32>
    %206 = vector.extract_strided_slice %154 {offsets = [0, 0, 0, 6], sizes = [2, 4, 4, 1], strides = [1, 1, 1, 1]} : vector<2x4x4x24xf32> to vector<2x4x4x1xf32>
    %207 = vector.extract_strided_slice %2 {offsets = [6, 0], sizes = [1, 4], strides = [1, 1]} : vector<26x4xf32> to vector<1x4xf32>
    %208 = vector.shape_cast %207 : vector<1x4xf32> to vector<1x1x1x4xf32>
    %209 = vector.broadcast %206 : vector<2x4x4x1xf32> to vector<2x4x4x4xf32>
    %210 = vector.broadcast %208 : vector<1x1x1x4xf32> to vector<2x4x4x4xf32>
    %211 = arith.mulf %209, %210 : vector<2x4x4x4xf32>
    %212 = arith.addf %205, %211 : vector<2x4x4x4xf32>
    %213 = vector.extract_strided_slice %154 {offsets = [0, 0, 0, 7], sizes = [2, 4, 4, 1], strides = [1, 1, 1, 1]} : vector<2x4x4x24xf32> to vector<2x4x4x1xf32>
    %214 = vector.extract_strided_slice %2 {offsets = [7, 0], sizes = [1, 4], strides = [1, 1]} : vector<26x4xf32> to vector<1x4xf32>
    %215 = vector.shape_cast %214 : vector<1x4xf32> to vector<1x1x1x4xf32>
    %216 = vector.broadcast %213 : vector<2x4x4x1xf32> to vector<2x4x4x4xf32>
    %217 = vector.broadcast %215 : vector<1x1x1x4xf32> to vector<2x4x4x4xf32>
    %218 = arith.mulf %216, %217 : vector<2x4x4x4xf32>
    %219 = arith.addf %212, %218 : vector<2x4x4x4xf32>
    %220 = vector.extract_strided_slice %154 {offsets = [0, 0, 0, 8], sizes = [2, 4, 4, 1], strides = [1, 1, 1, 1]} : vector<2x4x4x24xf32> to vector<2x4x4x1xf32>
    %221 = vector.extract_strided_slice %2 {offsets = [8, 0], sizes = [1, 4], strides = [1, 1]} : vector<26x4xf32> to vector<1x4xf32>
    %222 = vector.shape_cast %221 : vector<1x4xf32> to vector<1x1x1x4xf32>
    %223 = vector.broadcast %220 : vector<2x4x4x1xf32> to vector<2x4x4x4xf32>
    %224 = vector.broadcast %222 : vector<1x1x1x4xf32> to vector<2x4x4x4xf32>
    %225 = arith.mulf %223, %224 : vector<2x4x4x4xf32>
    %226 = arith.addf %219, %225 : vector<2x4x4x4xf32>
    %227 = vector.extract_strided_slice %154 {offsets = [0, 0, 0, 9], sizes = [2, 4, 4, 1], strides = [1, 1, 1, 1]} : vector<2x4x4x24xf32> to vector<2x4x4x1xf32>
    %228 = vector.extract_strided_slice %2 {offsets = [9, 0], sizes = [1, 4], strides = [1, 1]} : vector<26x4xf32> to vector<1x4xf32>
    %229 = vector.shape_cast %228 : vector<1x4xf32> to vector<1x1x1x4xf32>
    %230 = vector.broadcast %227 : vector<2x4x4x1xf32> to vector<2x4x4x4xf32>
    %231 = vector.broadcast %229 : vector<1x1x1x4xf32> to vector<2x4x4x4xf32>
    %232 = arith.mulf %230, %231 : vector<2x4x4x4xf32>
    %233 = arith.addf %226, %232 : vector<2x4x4x4xf32>
    %234 = vector.extract_strided_slice %154 {offsets = [0, 0, 0, 10], sizes = [2, 4, 4, 1], strides = [1, 1, 1, 1]} : vector<2x4x4x24xf32> to vector<2x4x4x1xf32>
    %235 = vector.extract_strided_slice %2 {offsets = [10, 0], sizes = [1, 4], strides = [1, 1]} : vector<26x4xf32> to vector<1x4xf32>
    %236 = vector.shape_cast %235 : vector<1x4xf32> to vector<1x1x1x4xf32>
    %237 = vector.broadcast %234 : vector<2x4x4x1xf32> to vector<2x4x4x4xf32>
    %238 = vector.broadcast %236 : vector<1x1x1x4xf32> to vector<2x4x4x4xf32>
    %239 = arith.mulf %237, %238 : vector<2x4x4x4xf32>
    %240 = arith.addf %233, %239 : vector<2x4x4x4xf32>
    %241 = vector.extract_strided_slice %154 {offsets = [0, 0, 0, 11], sizes = [2, 4, 4, 1], strides = [1, 1, 1, 1]} : vector<2x4x4x24xf32> to vector<2x4x4x1xf32>
    %242 = vector.extract_strided_slice %2 {offsets = [11, 0], sizes = [1, 4], strides = [1, 1]} : vector<26x4xf32> to vector<1x4xf32>
    %243 = vector.shape_cast %242 : vector<1x4xf32> to vector<1x1x1x4xf32>
    %244 = vector.broadcast %241 : vector<2x4x4x1xf32> to vector<2x4x4x4xf32>
    %245 = vector.broadcast %243 : vector<1x1x1x4xf32> to vector<2x4x4x4xf32>
    %246 = arith.mulf %244, %245 : vector<2x4x4x4xf32>
    %247 = arith.addf %240, %246 : vector<2x4x4x4xf32>
    %248 = vector.extract_strided_slice %154 {offsets = [0, 0, 0, 12], sizes = [2, 4, 4, 1], strides = [1, 1, 1, 1]} : vector<2x4x4x24xf32> to vector<2x4x4x1xf32>
    %249 = vector.extract_strided_slice %2 {offsets = [12, 0], sizes = [1, 4], strides = [1, 1]} : vector<26x4xf32> to vector<1x4xf32>
    %250 = vector.shape_cast %249 : vector<1x4xf32> to vector<1x1x1x4xf32>
    %251 = vector.broadcast %248 : vector<2x4x4x1xf32> to vector<2x4x4x4xf32>
    %252 = vector.broadcast %250 : vector<1x1x1x4xf32> to vector<2x4x4x4xf32>
    %253 = arith.mulf %251, %252 : vector<2x4x4x4xf32>
    %254 = arith.addf %247, %253 : vector<2x4x4x4xf32>
    %255 = vector.extract_strided_slice %154 {offsets = [0, 0, 0, 13], sizes = [2, 4, 4, 1], strides = [1, 1, 1, 1]} : vector<2x4x4x24xf32> to vector<2x4x4x1xf32>
    %256 = vector.extract_strided_slice %2 {offsets = [13, 0], sizes = [1, 4], strides = [1, 1]} : vector<26x4xf32> to vector<1x4xf32>
    %257 = vector.shape_cast %256 : vector<1x4xf32> to vector<1x1x1x4xf32>
    %258 = vector.broadcast %255 : vector<2x4x4x1xf32> to vector<2x4x4x4xf32>
    %259 = vector.broadcast %257 : vector<1x1x1x4xf32> to vector<2x4x4x4xf32>
    %260 = arith.mulf %258, %259 : vector<2x4x4x4xf32>
    %261 = arith.addf %254, %260 : vector<2x4x4x4xf32>
    %262 = vector.extract_strided_slice %154 {offsets = [0, 0, 0, 14], sizes = [2, 4, 4, 1], strides = [1, 1, 1, 1]} : vector<2x4x4x24xf32> to vector<2x4x4x1xf32>
    %263 = vector.extract_strided_slice %2 {offsets = [14, 0], sizes = [1, 4], strides = [1, 1]} : vector<26x4xf32> to vector<1x4xf32>
    %264 = vector.shape_cast %263 : vector<1x4xf32> to vector<1x1x1x4xf32>
    %265 = vector.broadcast %262 : vector<2x4x4x1xf32> to vector<2x4x4x4xf32>
    %266 = vector.broadcast %264 : vector<1x1x1x4xf32> to vector<2x4x4x4xf32>
    %267 = arith.mulf %265, %266 : vector<2x4x4x4xf32>
    %268 = arith.addf %261, %267 : vector<2x4x4x4xf32>
    %269 = vector.extract_strided_slice %154 {offsets = [0, 0, 0, 15], sizes = [2, 4, 4, 1], strides = [1, 1, 1, 1]} : vector<2x4x4x24xf32> to vector<2x4x4x1xf32>
    %270 = vector.extract_strided_slice %2 {offsets = [15, 0], sizes = [1, 4], strides = [1, 1]} : vector<26x4xf32> to vector<1x4xf32>
    %271 = vector.shape_cast %270 : vector<1x4xf32> to vector<1x1x1x4xf32>
    %272 = vector.broadcast %269 : vector<2x4x4x1xf32> to vector<2x4x4x4xf32>
    %273 = vector.broadcast %271 : vector<1x1x1x4xf32> to vector<2x4x4x4xf32>
    %274 = arith.mulf %272, %273 : vector<2x4x4x4xf32>
    %275 = arith.addf %268, %274 : vector<2x4x4x4xf32>
    %276 = vector.extract_strided_slice %154 {offsets = [0, 0, 0, 16], sizes = [2, 4, 4, 1], strides = [1, 1, 1, 1]} : vector<2x4x4x24xf32> to vector<2x4x4x1xf32>
    %277 = vector.extract_strided_slice %2 {offsets = [16, 0], sizes = [1, 4], strides = [1, 1]} : vector<26x4xf32> to vector<1x4xf32>
    %278 = vector.shape_cast %277 : vector<1x4xf32> to vector<1x1x1x4xf32>
    %279 = vector.broadcast %276 : vector<2x4x4x1xf32> to vector<2x4x4x4xf32>
    %280 = vector.broadcast %278 : vector<1x1x1x4xf32> to vector<2x4x4x4xf32>
    %281 = arith.mulf %279, %280 : vector<2x4x4x4xf32>
    %282 = arith.addf %275, %281 : vector<2x4x4x4xf32>
    %283 = vector.extract_strided_slice %154 {offsets = [0, 0, 0, 17], sizes = [2, 4, 4, 1], strides = [1, 1, 1, 1]} : vector<2x4x4x24xf32> to vector<2x4x4x1xf32>
    %284 = vector.extract_strided_slice %2 {offsets = [17, 0], sizes = [1, 4], strides = [1, 1]} : vector<26x4xf32> to vector<1x4xf32>
    %285 = vector.shape_cast %284 : vector<1x4xf32> to vector<1x1x1x4xf32>
    %286 = vector.broadcast %283 : vector<2x4x4x1xf32> to vector<2x4x4x4xf32>
    %287 = vector.broadcast %285 : vector<1x1x1x4xf32> to vector<2x4x4x4xf32>
    %288 = arith.mulf %286, %287 : vector<2x4x4x4xf32>
    %289 = arith.addf %282, %288 : vector<2x4x4x4xf32>
    %290 = vector.extract_strided_slice %154 {offsets = [0, 0, 0, 18], sizes = [2, 4, 4, 1], strides = [1, 1, 1, 1]} : vector<2x4x4x24xf32> to vector<2x4x4x1xf32>
    %291 = vector.extract_strided_slice %2 {offsets = [18, 0], sizes = [1, 4], strides = [1, 1]} : vector<26x4xf32> to vector<1x4xf32>
    %292 = vector.shape_cast %291 : vector<1x4xf32> to vector<1x1x1x4xf32>
    %293 = vector.broadcast %290 : vector<2x4x4x1xf32> to vector<2x4x4x4xf32>
    %294 = vector.broadcast %292 : vector<1x1x1x4xf32> to vector<2x4x4x4xf32>
    %295 = arith.mulf %293, %294 : vector<2x4x4x4xf32>
    %296 = arith.addf %289, %295 : vector<2x4x4x4xf32>
    %297 = vector.extract_strided_slice %154 {offsets = [0, 0, 0, 19], sizes = [2, 4, 4, 1], strides = [1, 1, 1, 1]} : vector<2x4x4x24xf32> to vector<2x4x4x1xf32>
    %298 = vector.extract_strided_slice %2 {offsets = [19, 0], sizes = [1, 4], strides = [1, 1]} : vector<26x4xf32> to vector<1x4xf32>
    %299 = vector.shape_cast %298 : vector<1x4xf32> to vector<1x1x1x4xf32>
    %300 = vector.broadcast %297 : vector<2x4x4x1xf32> to vector<2x4x4x4xf32>
    %301 = vector.broadcast %299 : vector<1x1x1x4xf32> to vector<2x4x4x4xf32>
    %302 = arith.mulf %300, %301 : vector<2x4x4x4xf32>
    %303 = arith.addf %296, %302 : vector<2x4x4x4xf32>
    %304 = vector.extract_strided_slice %154 {offsets = [0, 0, 0, 20], sizes = [2, 4, 4, 1], strides = [1, 1, 1, 1]} : vector<2x4x4x24xf32> to vector<2x4x4x1xf32>
    %305 = vector.extract_strided_slice %2 {offsets = [20, 0], sizes = [1, 4], strides = [1, 1]} : vector<26x4xf32> to vector<1x4xf32>
    %306 = vector.shape_cast %305 : vector<1x4xf32> to vector<1x1x1x4xf32>
    %307 = vector.broadcast %304 : vector<2x4x4x1xf32> to vector<2x4x4x4xf32>
    %308 = vector.broadcast %306 : vector<1x1x1x4xf32> to vector<2x4x4x4xf32>
    %309 = arith.mulf %307, %308 : vector<2x4x4x4xf32>
    %310 = arith.addf %303, %309 : vector<2x4x4x4xf32>
    %311 = vector.extract_strided_slice %154 {offsets = [0, 0, 0, 21], sizes = [2, 4, 4, 1], strides = [1, 1, 1, 1]} : vector<2x4x4x24xf32> to vector<2x4x4x1xf32>
    %312 = vector.extract_strided_slice %2 {offsets = [21, 0], sizes = [1, 4], strides = [1, 1]} : vector<26x4xf32> to vector<1x4xf32>
    %313 = vector.shape_cast %312 : vector<1x4xf32> to vector<1x1x1x4xf32>
    %314 = vector.broadcast %311 : vector<2x4x4x1xf32> to vector<2x4x4x4xf32>
    %315 = vector.broadcast %313 : vector<1x1x1x4xf32> to vector<2x4x4x4xf32>
    %316 = arith.mulf %314, %315 : vector<2x4x4x4xf32>
    %317 = arith.addf %310, %316 : vector<2x4x4x4xf32>
    %318 = vector.extract_strided_slice %154 {offsets = [0, 0, 0, 22], sizes = [2, 4, 4, 1], strides = [1, 1, 1, 1]} : vector<2x4x4x24xf32> to vector<2x4x4x1xf32>
    %319 = vector.extract_strided_slice %2 {offsets = [22, 0], sizes = [1, 4], strides = [1, 1]} : vector<26x4xf32> to vector<1x4xf32>
    %320 = vector.shape_cast %319 : vector<1x4xf32> to vector<1x1x1x4xf32>
    %321 = vector.broadcast %318 : vector<2x4x4x1xf32> to vector<2x4x4x4xf32>
    %322 = vector.broadcast %320 : vector<1x1x1x4xf32> to vector<2x4x4x4xf32>
    %323 = arith.mulf %321, %322 : vector<2x4x4x4xf32>
    %324 = arith.addf %317, %323 : vector<2x4x4x4xf32>
    %325 = vector.extract_strided_slice %154 {offsets = [0, 0, 0, 23], sizes = [2, 4, 4, 1], strides = [1, 1, 1, 1]} : vector<2x4x4x24xf32> to vector<2x4x4x1xf32>
    %326 = vector.extract_strided_slice %2 {offsets = [23, 0], sizes = [1, 4], strides = [1, 1]} : vector<26x4xf32> to vector<1x4xf32>
    %327 = vector.shape_cast %326 : vector<1x4xf32> to vector<1x1x1x4xf32>
    %328 = vector.broadcast %325 : vector<2x4x4x1xf32> to vector<2x4x4x4xf32>
    %329 = vector.broadcast %327 : vector<1x1x1x4xf32> to vector<2x4x4x4xf32>
    %330 = arith.mulf %328, %329 : vector<2x4x4x4xf32>
    %331 = arith.addf %324, %330 : vector<2x4x4x4xf32>
    %332 = vector.shape_cast %8 : vector<1x4xf32> to vector<1x1x1x4xf32>
    %333 = vector.broadcast %332 : vector<1x1x1x4xf32> to vector<2x4x4x4xf32>
    %334 = arith.mulf %331, %333 : vector<2x4x4x4xf32>
    %335 = vector.shape_cast %9 : vector<1x4xf32> to vector<1x1x1x4xf32>
    %336 = vector.broadcast %335 : vector<1x1x1x4xf32> to vector<2x4x4x4xf32>
    %337 = arith.addf %334, %336 : vector<2x4x4x4xf32>
    %338 = vector.extract_strided_slice %164 {offsets = [0, 0, 0, 0], sizes = [2, 1, 4, 1], strides = [1, 1, 1, 1]} : vector<2x1x4x24xf32> to vector<2x1x4x1xf32>
    %339 = vector.extract_strided_slice %2 {offsets = [0, 0], sizes = [1, 4], strides = [1, 1]} : vector<26x4xf32> to vector<1x4xf32>
    %340 = vector.shape_cast %339 : vector<1x4xf32> to vector<1x1x1x4xf32>
    %341 = vector.broadcast %338 : vector<2x1x4x1xf32> to vector<2x1x4x4xf32>
    %342 = vector.broadcast %340 : vector<1x1x1x4xf32> to vector<2x1x4x4xf32>
    %343 = arith.mulf %341, %342 : vector<2x1x4x4xf32>
    %344 = vector.extract_strided_slice %164 {offsets = [0, 0, 0, 1], sizes = [2, 1, 4, 1], strides = [1, 1, 1, 1]} : vector<2x1x4x24xf32> to vector<2x1x4x1xf32>
    %345 = vector.extract_strided_slice %2 {offsets = [1, 0], sizes = [1, 4], strides = [1, 1]} : vector<26x4xf32> to vector<1x4xf32>
    %346 = vector.shape_cast %345 : vector<1x4xf32> to vector<1x1x1x4xf32>
    %347 = vector.broadcast %344 : vector<2x1x4x1xf32> to vector<2x1x4x4xf32>
    %348 = vector.broadcast %346 : vector<1x1x1x4xf32> to vector<2x1x4x4xf32>
    %349 = arith.mulf %347, %348 : vector<2x1x4x4xf32>
    %350 = arith.addf %343, %349 : vector<2x1x4x4xf32>
    %351 = vector.extract_strided_slice %164 {offsets = [0, 0, 0, 2], sizes = [2, 1, 4, 1], strides = [1, 1, 1, 1]} : vector<2x1x4x24xf32> to vector<2x1x4x1xf32>
    %352 = vector.extract_strided_slice %2 {offsets = [2, 0], sizes = [1, 4], strides = [1, 1]} : vector<26x4xf32> to vector<1x4xf32>
    %353 = vector.shape_cast %352 : vector<1x4xf32> to vector<1x1x1x4xf32>
    %354 = vector.broadcast %351 : vector<2x1x4x1xf32> to vector<2x1x4x4xf32>
    %355 = vector.broadcast %353 : vector<1x1x1x4xf32> to vector<2x1x4x4xf32>
    %356 = arith.mulf %354, %355 : vector<2x1x4x4xf32>
    %357 = arith.addf %350, %356 : vector<2x1x4x4xf32>
    %358 = vector.extract_strided_slice %164 {offsets = [0, 0, 0, 3], sizes = [2, 1, 4, 1], strides = [1, 1, 1, 1]} : vector<2x1x4x24xf32> to vector<2x1x4x1xf32>
    %359 = vector.extract_strided_slice %2 {offsets = [3, 0], sizes = [1, 4], strides = [1, 1]} : vector<26x4xf32> to vector<1x4xf32>
    %360 = vector.shape_cast %359 : vector<1x4xf32> to vector<1x1x1x4xf32>
    %361 = vector.broadcast %358 : vector<2x1x4x1xf32> to vector<2x1x4x4xf32>
    %362 = vector.broadcast %360 : vector<1x1x1x4xf32> to vector<2x1x4x4xf32>
    %363 = arith.mulf %361, %362 : vector<2x1x4x4xf32>
    %364 = arith.addf %357, %363 : vector<2x1x4x4xf32>
    %365 = vector.extract_strided_slice %164 {offsets = [0, 0, 0, 4], sizes = [2, 1, 4, 1], strides = [1, 1, 1, 1]} : vector<2x1x4x24xf32> to vector<2x1x4x1xf32>
    %366 = vector.extract_strided_slice %2 {offsets = [4, 0], sizes = [1, 4], strides = [1, 1]} : vector<26x4xf32> to vector<1x4xf32>
    %367 = vector.shape_cast %366 : vector<1x4xf32> to vector<1x1x1x4xf32>
    %368 = vector.broadcast %365 : vector<2x1x4x1xf32> to vector<2x1x4x4xf32>
    %369 = vector.broadcast %367 : vector<1x1x1x4xf32> to vector<2x1x4x4xf32>
    %370 = arith.mulf %368, %369 : vector<2x1x4x4xf32>
    %371 = arith.addf %364, %370 : vector<2x1x4x4xf32>
    %372 = vector.extract_strided_slice %164 {offsets = [0, 0, 0, 5], sizes = [2, 1, 4, 1], strides = [1, 1, 1, 1]} : vector<2x1x4x24xf32> to vector<2x1x4x1xf32>
    %373 = vector.extract_strided_slice %2 {offsets = [5, 0], sizes = [1, 4], strides = [1, 1]} : vector<26x4xf32> to vector<1x4xf32>
    %374 = vector.shape_cast %373 : vector<1x4xf32> to vector<1x1x1x4xf32>
    %375 = vector.broadcast %372 : vector<2x1x4x1xf32> to vector<2x1x4x4xf32>
    %376 = vector.broadcast %374 : vector<1x1x1x4xf32> to vector<2x1x4x4xf32>
    %377 = arith.mulf %375, %376 : vector<2x1x4x4xf32>
    %378 = arith.addf %371, %377 : vector<2x1x4x4xf32>
    %379 = vector.extract_strided_slice %164 {offsets = [0, 0, 0, 6], sizes = [2, 1, 4, 1], strides = [1, 1, 1, 1]} : vector<2x1x4x24xf32> to vector<2x1x4x1xf32>
    %380 = vector.extract_strided_slice %2 {offsets = [6, 0], sizes = [1, 4], strides = [1, 1]} : vector<26x4xf32> to vector<1x4xf32>
    %381 = vector.shape_cast %380 : vector<1x4xf32> to vector<1x1x1x4xf32>
    %382 = vector.broadcast %379 : vector<2x1x4x1xf32> to vector<2x1x4x4xf32>
    %383 = vector.broadcast %381 : vector<1x1x1x4xf32> to vector<2x1x4x4xf32>
    %384 = arith.mulf %382, %383 : vector<2x1x4x4xf32>
    %385 = arith.addf %378, %384 : vector<2x1x4x4xf32>
    %386 = vector.extract_strided_slice %164 {offsets = [0, 0, 0, 7], sizes = [2, 1, 4, 1], strides = [1, 1, 1, 1]} : vector<2x1x4x24xf32> to vector<2x1x4x1xf32>
    %387 = vector.extract_strided_slice %2 {offsets = [7, 0], sizes = [1, 4], strides = [1, 1]} : vector<26x4xf32> to vector<1x4xf32>
    %388 = vector.shape_cast %387 : vector<1x4xf32> to vector<1x1x1x4xf32>
    %389 = vector.broadcast %386 : vector<2x1x4x1xf32> to vector<2x1x4x4xf32>
    %390 = vector.broadcast %388 : vector<1x1x1x4xf32> to vector<2x1x4x4xf32>
    %391 = arith.mulf %389, %390 : vector<2x1x4x4xf32>
    %392 = arith.addf %385, %391 : vector<2x1x4x4xf32>
    %393 = vector.extract_strided_slice %164 {offsets = [0, 0, 0, 8], sizes = [2, 1, 4, 1], strides = [1, 1, 1, 1]} : vector<2x1x4x24xf32> to vector<2x1x4x1xf32>
    %394 = vector.extract_strided_slice %2 {offsets = [8, 0], sizes = [1, 4], strides = [1, 1]} : vector<26x4xf32> to vector<1x4xf32>
    %395 = vector.shape_cast %394 : vector<1x4xf32> to vector<1x1x1x4xf32>
    %396 = vector.broadcast %393 : vector<2x1x4x1xf32> to vector<2x1x4x4xf32>
    %397 = vector.broadcast %395 : vector<1x1x1x4xf32> to vector<2x1x4x4xf32>
    %398 = arith.mulf %396, %397 : vector<2x1x4x4xf32>
    %399 = arith.addf %392, %398 : vector<2x1x4x4xf32>
    %400 = vector.extract_strided_slice %164 {offsets = [0, 0, 0, 9], sizes = [2, 1, 4, 1], strides = [1, 1, 1, 1]} : vector<2x1x4x24xf32> to vector<2x1x4x1xf32>
    %401 = vector.extract_strided_slice %2 {offsets = [9, 0], sizes = [1, 4], strides = [1, 1]} : vector<26x4xf32> to vector<1x4xf32>
    %402 = vector.shape_cast %401 : vector<1x4xf32> to vector<1x1x1x4xf32>
    %403 = vector.broadcast %400 : vector<2x1x4x1xf32> to vector<2x1x4x4xf32>
    %404 = vector.broadcast %402 : vector<1x1x1x4xf32> to vector<2x1x4x4xf32>
    %405 = arith.mulf %403, %404 : vector<2x1x4x4xf32>
    %406 = arith.addf %399, %405 : vector<2x1x4x4xf32>
    %407 = vector.extract_strided_slice %164 {offsets = [0, 0, 0, 10], sizes = [2, 1, 4, 1], strides = [1, 1, 1, 1]} : vector<2x1x4x24xf32> to vector<2x1x4x1xf32>
    %408 = vector.extract_strided_slice %2 {offsets = [10, 0], sizes = [1, 4], strides = [1, 1]} : vector<26x4xf32> to vector<1x4xf32>
    %409 = vector.shape_cast %408 : vector<1x4xf32> to vector<1x1x1x4xf32>
    %410 = vector.broadcast %407 : vector<2x1x4x1xf32> to vector<2x1x4x4xf32>
    %411 = vector.broadcast %409 : vector<1x1x1x4xf32> to vector<2x1x4x4xf32>
    %412 = arith.mulf %410, %411 : vector<2x1x4x4xf32>
    %413 = arith.addf %406, %412 : vector<2x1x4x4xf32>
    %414 = vector.extract_strided_slice %164 {offsets = [0, 0, 0, 11], sizes = [2, 1, 4, 1], strides = [1, 1, 1, 1]} : vector<2x1x4x24xf32> to vector<2x1x4x1xf32>
    %415 = vector.extract_strided_slice %2 {offsets = [11, 0], sizes = [1, 4], strides = [1, 1]} : vector<26x4xf32> to vector<1x4xf32>
    %416 = vector.shape_cast %415 : vector<1x4xf32> to vector<1x1x1x4xf32>
    %417 = vector.broadcast %414 : vector<2x1x4x1xf32> to vector<2x1x4x4xf32>
    %418 = vector.broadcast %416 : vector<1x1x1x4xf32> to vector<2x1x4x4xf32>
    %419 = arith.mulf %417, %418 : vector<2x1x4x4xf32>
    %420 = arith.addf %413, %419 : vector<2x1x4x4xf32>
    %421 = vector.extract_strided_slice %164 {offsets = [0, 0, 0, 12], sizes = [2, 1, 4, 1], strides = [1, 1, 1, 1]} : vector<2x1x4x24xf32> to vector<2x1x4x1xf32>
    %422 = vector.extract_strided_slice %2 {offsets = [12, 0], sizes = [1, 4], strides = [1, 1]} : vector<26x4xf32> to vector<1x4xf32>
    %423 = vector.shape_cast %422 : vector<1x4xf32> to vector<1x1x1x4xf32>
    %424 = vector.broadcast %421 : vector<2x1x4x1xf32> to vector<2x1x4x4xf32>
    %425 = vector.broadcast %423 : vector<1x1x1x4xf32> to vector<2x1x4x4xf32>
    %426 = arith.mulf %424, %425 : vector<2x1x4x4xf32>
    %427 = arith.addf %420, %426 : vector<2x1x4x4xf32>
    %428 = vector.extract_strided_slice %164 {offsets = [0, 0, 0, 13], sizes = [2, 1, 4, 1], strides = [1, 1, 1, 1]} : vector<2x1x4x24xf32> to vector<2x1x4x1xf32>
    %429 = vector.extract_strided_slice %2 {offsets = [13, 0], sizes = [1, 4], strides = [1, 1]} : vector<26x4xf32> to vector<1x4xf32>
    %430 = vector.shape_cast %429 : vector<1x4xf32> to vector<1x1x1x4xf32>
    %431 = vector.broadcast %428 : vector<2x1x4x1xf32> to vector<2x1x4x4xf32>
    %432 = vector.broadcast %430 : vector<1x1x1x4xf32> to vector<2x1x4x4xf32>
    %433 = arith.mulf %431, %432 : vector<2x1x4x4xf32>
    %434 = arith.addf %427, %433 : vector<2x1x4x4xf32>
    %435 = vector.extract_strided_slice %164 {offsets = [0, 0, 0, 14], sizes = [2, 1, 4, 1], strides = [1, 1, 1, 1]} : vector<2x1x4x24xf32> to vector<2x1x4x1xf32>
    %436 = vector.extract_strided_slice %2 {offsets = [14, 0], sizes = [1, 4], strides = [1, 1]} : vector<26x4xf32> to vector<1x4xf32>
    %437 = vector.shape_cast %436 : vector<1x4xf32> to vector<1x1x1x4xf32>
    %438 = vector.broadcast %435 : vector<2x1x4x1xf32> to vector<2x1x4x4xf32>
    %439 = vector.broadcast %437 : vector<1x1x1x4xf32> to vector<2x1x4x4xf32>
    %440 = arith.mulf %438, %439 : vector<2x1x4x4xf32>
    %441 = arith.addf %434, %440 : vector<2x1x4x4xf32>
    %442 = vector.extract_strided_slice %164 {offsets = [0, 0, 0, 15], sizes = [2, 1, 4, 1], strides = [1, 1, 1, 1]} : vector<2x1x4x24xf32> to vector<2x1x4x1xf32>
    %443 = vector.extract_strided_slice %2 {offsets = [15, 0], sizes = [1, 4], strides = [1, 1]} : vector<26x4xf32> to vector<1x4xf32>
    %444 = vector.shape_cast %443 : vector<1x4xf32> to vector<1x1x1x4xf32>
    %445 = vector.broadcast %442 : vector<2x1x4x1xf32> to vector<2x1x4x4xf32>
    %446 = vector.broadcast %444 : vector<1x1x1x4xf32> to vector<2x1x4x4xf32>
    %447 = arith.mulf %445, %446 : vector<2x1x4x4xf32>
    %448 = arith.addf %441, %447 : vector<2x1x4x4xf32>
    %449 = vector.extract_strided_slice %164 {offsets = [0, 0, 0, 16], sizes = [2, 1, 4, 1], strides = [1, 1, 1, 1]} : vector<2x1x4x24xf32> to vector<2x1x4x1xf32>
    %450 = vector.extract_strided_slice %2 {offsets = [16, 0], sizes = [1, 4], strides = [1, 1]} : vector<26x4xf32> to vector<1x4xf32>
    %451 = vector.shape_cast %450 : vector<1x4xf32> to vector<1x1x1x4xf32>
    %452 = vector.broadcast %449 : vector<2x1x4x1xf32> to vector<2x1x4x4xf32>
    %453 = vector.broadcast %451 : vector<1x1x1x4xf32> to vector<2x1x4x4xf32>
    %454 = arith.mulf %452, %453 : vector<2x1x4x4xf32>
    %455 = arith.addf %448, %454 : vector<2x1x4x4xf32>
    %456 = vector.extract_strided_slice %164 {offsets = [0, 0, 0, 17], sizes = [2, 1, 4, 1], strides = [1, 1, 1, 1]} : vector<2x1x4x24xf32> to vector<2x1x4x1xf32>
    %457 = vector.extract_strided_slice %2 {offsets = [17, 0], sizes = [1, 4], strides = [1, 1]} : vector<26x4xf32> to vector<1x4xf32>
    %458 = vector.shape_cast %457 : vector<1x4xf32> to vector<1x1x1x4xf32>
    %459 = vector.broadcast %456 : vector<2x1x4x1xf32> to vector<2x1x4x4xf32>
    %460 = vector.broadcast %458 : vector<1x1x1x4xf32> to vector<2x1x4x4xf32>
    %461 = arith.mulf %459, %460 : vector<2x1x4x4xf32>
    %462 = arith.addf %455, %461 : vector<2x1x4x4xf32>
    %463 = vector.extract_strided_slice %164 {offsets = [0, 0, 0, 18], sizes = [2, 1, 4, 1], strides = [1, 1, 1, 1]} : vector<2x1x4x24xf32> to vector<2x1x4x1xf32>
    %464 = vector.extract_strided_slice %2 {offsets = [18, 0], sizes = [1, 4], strides = [1, 1]} : vector<26x4xf32> to vector<1x4xf32>
    %465 = vector.shape_cast %464 : vector<1x4xf32> to vector<1x1x1x4xf32>
    %466 = vector.broadcast %463 : vector<2x1x4x1xf32> to vector<2x1x4x4xf32>
    %467 = vector.broadcast %465 : vector<1x1x1x4xf32> to vector<2x1x4x4xf32>
    %468 = arith.mulf %466, %467 : vector<2x1x4x4xf32>
    %469 = arith.addf %462, %468 : vector<2x1x4x4xf32>
    %470 = vector.extract_strided_slice %164 {offsets = [0, 0, 0, 19], sizes = [2, 1, 4, 1], strides = [1, 1, 1, 1]} : vector<2x1x4x24xf32> to vector<2x1x4x1xf32>
    %471 = vector.extract_strided_slice %2 {offsets = [19, 0], sizes = [1, 4], strides = [1, 1]} : vector<26x4xf32> to vector<1x4xf32>
    %472 = vector.shape_cast %471 : vector<1x4xf32> to vector<1x1x1x4xf32>
    %473 = vector.broadcast %470 : vector<2x1x4x1xf32> to vector<2x1x4x4xf32>
    %474 = vector.broadcast %472 : vector<1x1x1x4xf32> to vector<2x1x4x4xf32>
    %475 = arith.mulf %473, %474 : vector<2x1x4x4xf32>
    %476 = arith.addf %469, %475 : vector<2x1x4x4xf32>
    %477 = vector.extract_strided_slice %164 {offsets = [0, 0, 0, 20], sizes = [2, 1, 4, 1], strides = [1, 1, 1, 1]} : vector<2x1x4x24xf32> to vector<2x1x4x1xf32>
    %478 = vector.extract_strided_slice %2 {offsets = [20, 0], sizes = [1, 4], strides = [1, 1]} : vector<26x4xf32> to vector<1x4xf32>
    %479 = vector.shape_cast %478 : vector<1x4xf32> to vector<1x1x1x4xf32>
    %480 = vector.broadcast %477 : vector<2x1x4x1xf32> to vector<2x1x4x4xf32>
    %481 = vector.broadcast %479 : vector<1x1x1x4xf32> to vector<2x1x4x4xf32>
    %482 = arith.mulf %480, %481 : vector<2x1x4x4xf32>
    %483 = arith.addf %476, %482 : vector<2x1x4x4xf32>
    %484 = vector.extract_strided_slice %164 {offsets = [0, 0, 0, 21], sizes = [2, 1, 4, 1], strides = [1, 1, 1, 1]} : vector<2x1x4x24xf32> to vector<2x1x4x1xf32>
    %485 = vector.extract_strided_slice %2 {offsets = [21, 0], sizes = [1, 4], strides = [1, 1]} : vector<26x4xf32> to vector<1x4xf32>
    %486 = vector.shape_cast %485 : vector<1x4xf32> to vector<1x1x1x4xf32>
    %487 = vector.broadcast %484 : vector<2x1x4x1xf32> to vector<2x1x4x4xf32>
    %488 = vector.broadcast %486 : vector<1x1x1x4xf32> to vector<2x1x4x4xf32>
    %489 = arith.mulf %487, %488 : vector<2x1x4x4xf32>
    %490 = arith.addf %483, %489 : vector<2x1x4x4xf32>
    %491 = vector.extract_strided_slice %164 {offsets = [0, 0, 0, 22], sizes = [2, 1, 4, 1], strides = [1, 1, 1, 1]} : vector<2x1x4x24xf32> to vector<2x1x4x1xf32>
    %492 = vector.extract_strided_slice %2 {offsets = [22, 0], sizes = [1, 4], strides = [1, 1]} : vector<26x4xf32> to vector<1x4xf32>
    %493 = vector.shape_cast %492 : vector<1x4xf32> to vector<1x1x1x4xf32>
    %494 = vector.broadcast %491 : vector<2x1x4x1xf32> to vector<2x1x4x4xf32>
    %495 = vector.broadcast %493 : vector<1x1x1x4xf32> to vector<2x1x4x4xf32>
    %496 = arith.mulf %494, %495 : vector<2x1x4x4xf32>
    %497 = arith.addf %490, %496 : vector<2x1x4x4xf32>
    %498 = vector.extract_strided_slice %164 {offsets = [0, 0, 0, 23], sizes = [2, 1, 4, 1], strides = [1, 1, 1, 1]} : vector<2x1x4x24xf32> to vector<2x1x4x1xf32>
    %499 = vector.extract_strided_slice %2 {offsets = [23, 0], sizes = [1, 4], strides = [1, 1]} : vector<26x4xf32> to vector<1x4xf32>
    %500 = vector.shape_cast %499 : vector<1x4xf32> to vector<1x1x1x4xf32>
    %501 = vector.broadcast %498 : vector<2x1x4x1xf32> to vector<2x1x4x4xf32>
    %502 = vector.broadcast %500 : vector<1x1x1x4xf32> to vector<2x1x4x4xf32>
    %503 = arith.mulf %501, %502 : vector<2x1x4x4xf32>
    %504 = arith.addf %497, %503 : vector<2x1x4x4xf32>
    %505 = vector.shape_cast %8 : vector<1x4xf32> to vector<1x1x1x4xf32>
    %506 = vector.broadcast %505 : vector<1x1x1x4xf32> to vector<2x1x4x4xf32>
    %507 = arith.mulf %504, %506 : vector<2x1x4x4xf32>
    %508 = vector.shape_cast %9 : vector<1x4xf32> to vector<1x1x1x4xf32>
    %509 = vector.broadcast %508 : vector<1x1x1x4xf32> to vector<2x1x4x4xf32>
    %510 = arith.addf %507, %509 : vector<2x1x4x4xf32>
    %511 = vector.extract_strided_slice %0 {offsets = [0, 0, 0, 0], sizes = [2, 4, 4, 4], strides = [1, 1, 1, 1]} : vector<2x5x4x4xf32> to vector<2x4x4x4xf32>
    %512 = arith.addf %337, %511 : vector<2x4x4x4xf32>
    %513 = vector.extract_strided_slice %0 {offsets = [0, 4, 0, 0], sizes = [2, 1, 4, 4], strides = [1, 1, 1, 1]} : vector<2x5x4x4xf32> to vector<2x1x4x4xf32>
    %514 = arith.addf %510, %513 : vector<2x1x4x4xf32>
    %c0_17 = arith.constant 0 : index
    %c0_18 = arith.constant 0 : index
    %c0_19 = arith.constant 0 : index
    %c0_20 = arith.constant 0 : index
    %515 = vector.load %arg4[%c0_17, %c0_18, %c0_19, %c0_20] : memref<2x5x4x4xf32, #tpu.memory_space<vmem>>, vector<2x4x4x4xf32>
    tpu.vector_store %arg4[%c0_17, %c0_18, %c0_19, %c0_20], %512 {strides = array<i32>} : memref<2x5x4x4xf32, #tpu.memory_space<vmem>>, vector<2x4x4x4xf32>,
    %c0_21 = arith.constant 0 : index
    %c4 = arith.constant 4 : index
    %c0_22 = arith.constant 0 : index
    %c0_23 = arith.constant 0 : index
    %516 = vector.load %arg4[%c0_21, %c4, %c0_22, %c0_23] : memref<2x5x4x4xf32, #tpu.memory_space<vmem>>, vector<2x1x4x4xf32>
    tpu.vector_store %arg4[%c0_21, %c4, %c0_22, %c0_23], %514 {strides = array<i32>} : memref<2x5x4x4xf32, #tpu.memory_space<vmem>>, vector<2x1x4x4xf32>,
    return
  }
  func.func @transform_0(%arg0: i32) -> (i32, i32, i32, i32) {
    %c0_i32 = arith.constant 0 : i32
    %c0_i32_0 = arith.constant 0 : i32
    %c0_i32_1 = arith.constant 0 : i32
    %c0_i32_2 = arith.constant 0 : i32
    %c0_i32_3 = arith.constant 0 : i32
    return %c0_i32, %c0_i32_0, %c0_i32_1, %c0_i32_2 : i32, i32, i32, i32
  }
  func.func @transform_1(%arg0: i32) -> (i32, i32) {
    %c0_i32 = arith.constant 0 : i32
    %c0_i32_0 = arith.constant 0 : i32
    %c0_i32_1 = arith.constant 0 : i32
    return %c0_i32, %c0_i32_0 : i32, i32
  }
  func.func @transform_2(%arg0: i32) -> (i32, i32) {
    %c0_i32 = arith.constant 0 : i32
    %c0_i32_0 = arith.constant 0 : i32
    %c0_i32_1 = arith.constant 0 : i32
    return %c0_i32, %c0_i32_0 : i32, i32
  }
  func.func @transform_3(%arg0: i32) -> (i32, i32, i32, i32) {
    %c0_i32 = arith.constant 0 : i32
    %c0_i32_0 = arith.constant 0 : i32
    %c0_i32_1 = arith.constant 0 : i32
    %c0_i32_2 = arith.constant 0 : i32
    %c0_i32_3 = arith.constant 0 : i32
    return %c0_i32, %c0_i32_0, %c0_i32_1, %c0_i32_2 : i32, i32, i32, i32
  }
}

</mosaic_0001>

<bundles_post_ra>
// kernel: tpu_custom_call.1
= control target key start
LH: loop header
LB: loop body
LE: loop exit
PB: predicated region body
PF: predicated region fallthrough
CT: control target
= control target key end

     0   :  { %v4265_v0 = vmov 0   ;;  %v4271_v9 = vmov 1   ;;  %v4269_v10 = vmov 2   ;;  %v4267_v11 = vmov 3   ;;  %s4261_s0 = inlined_call_operand.vmem [shape: f32[2,5,4,4], index: 0, kind: input, shape index: {}]   ;;  %s4262_s1 = inlined_call_operand.vmem [shape: f32[18,24], index: 1, kind: input, shape index: {}]   ;;  %s4263_s2 = inlined_call_operand.vmem [shape: f32[26,4], index: 2, kind: input, shape index: {}]   ;;  %s4264_s3 = inlined_call_operand.vmem [shape: f32[2,5,4,4], index: 3, kind: output, shape index: {}]  }
   0x1   :  { %2349 = vset.pattern.permute.xlu1 %v4265_v0  ;;  %2348 = vset.pattern.permute.xlu0 %v4265_v0  ;;  %v17_v1 = vld [vmem:[%s4261_s0 + $0xc] sm:$0xf]  ;;  %v15_v2 = vld [vmem:[%s4261_s0 + $0x4] sm:$0xf]  ;;  %v18_v3 = vld [vmem:[%s4261_s0 + $0x10] sm:$0xf]  ;;  %v71_v22 = vlaneseq }
   0x2   :  { %43 = vperm.xlu1 %2349, %v17_v1   ;;  %33 = vperm.xlu0 %2348, %v15_v2   ;;  %v16_v4 = vld [vmem:[%s4261_s0 + $0x8] sm:$0xf]  ;;  %v21_v5 = vld [vmem:[%s4261_s0 + $0x1c] sm:$0xf]  ;;  %v20_v6 = vld [vmem:[%s4261_s0 + $0x18] sm:$0xf] }
   0x3   :  { %v23_v7 = vld [vmem:[%s4261_s0 + $0x24] sm:$0xf]  ;;  %v22_v8 = vld [vmem:[%s4261_s0 + $0x20] sm:$0xf]  ;;  %v19_v12 = vld [vmem:[%s4261_s0 + $0x14] sm:$0xf] }
   0x4   :  { %v14_v13 = vld [vmem:[%s4261_s0] sm:$0xf]  ;;  %v2545_v25 = vshrl.u32 %v71_v22, 7  ;;  %v2596_v45 = vld [vmem:[%s4262_s1 + $0x8] sm:$0xff]  ;;  %vm359_vm0 = vcmask 1040384   ;;  %vm368_vm1 = vcmask 1044480  }
   0x5   :  { %v2557_v31 = vld [vmem:[%s4262_s1] sm:$0xff]  ;;  %vm2306_vm2 = vcmask 27648  }
   0x6   :  { %48 = vperm.xlu1 %2349, %v18_v3   ;;  %38 = vperm.xlu0 %2348, %v16_v4   ;;  %v2550_v28 = vsub.s32 1, %v2545_v25  ;;  %v2560_v32 = vsub.s32 0, %v2545_v25  ;;  %v2567_v34 = vsub.s32 2, %v2545_v25  ;;  %v2570_v35 = vsub.s32 3, %v2545_v25 }
   0x7   :  { %v2591_v43 = vsub.s32 5, %v2545_v25  ;;  %v2600_v49 = vsub.s32 6, %v2545_v25  ;;  %v2614_v61 = vsub.s32 4, %v2545_v25 }
   0x8   :  { %v2564_v33 = vrot.slane %v2557_v31, %v2550_v28  ;;  %4333 = vst [vmem:[#allocation2_spill] sm:$0xff] %v2567_v34  ;;  %4334 = vst [vmem:[#allocation3_spill] sm:$0xff] %v2570_v35  ;;  %v2578_v38 = vrot.slane %v2557_v31, %v2560_v32  ;;  %v2583_v40 = vrot.slane %v2557_v31, %v2567_v34 }
   0x9   :  { %v2587_v41 = vrot.slane %v2557_v31, %v2570_v35  ;;  %4335 = vst [vmem:[#allocation4_spill] sm:$0xff] %v2591_v43  ;;  %4336 = vst [vmem:[#allocation5_spill] sm:$0xff] %v2600_v49  ;;  %v2605_v52 = vrot.slane %v2596_v45, %v2591_v43  ;;  %v2609_v55 = vrot.slane %v2596_v45, %v2600_v49 }
   0xa   :  { %58 = vperm.xlu1 %2349, %v21_v5   ;;  %53 = vperm.xlu0 %2348, %v20_v6   ;;  %4337 = vst [vmem:[#allocation6_spill] sm:$0xff] %v2614_v61  ;;  %v2619_v63 = vrot.slane %v2557_v31, %v2591_v43 }
   0xe   :  { %68 = vperm.xlu1 %2349, %v23_v7   ;;  %63 = vperm.xlu0 %2348, %v22_v8  }
  0x12   :  { %2351 = vset.pattern.permute.xlu1 %v4271_v9  ;;  %2350 = vset.pattern.permute.xlu0 %v4271_v9 }
  0x13   :  { %88 = vperm.xlu1 %2351, %v16_v4   ;;  %84 = vperm.xlu0 %2350, %v15_v2  }
  0x17   :  { %92 = vperm.xlu1 %2351, %v17_v1   ;;  %96 = vperm.xlu0 %2350, %v18_v3  }
  0x1b   :  { %100 = vperm.xlu1 %2351, %v20_v6   ;;  %104 = vperm.xlu0 %2350, %v21_v5  }
  0x1f   :  { %108 = vperm.xlu1 %2351, %v22_v8   ;;  %112 = vperm.xlu0 %2350, %v23_v7  }
  0x23   :  { %2352 = vset.pattern.permute.xlu1 %v4269_v10  ;;  %2353 = vset.pattern.permute.xlu0 %v4267_v11 }
  0x24   :  { %136 = vperm.xlu1 %2352, %v15_v2   ;;  %188 = vperm.xlu0 %2353, %v15_v2  }
  0x28   :  { %144 = vperm.xlu1 %2352, %v17_v1   ;;  %200 = vperm.xlu0 %2353, %v18_v3  }
  0x2c   :  { %148 = vperm.xlu1 %2352, %v18_v3   ;;  %208 = vperm.xlu0 %2353, %v21_v5  }
  0x30   :  { %156 = vperm.xlu1 %2352, %v21_v5   ;;  %216 = vperm.xlu0 %2353, %v23_v7  }
  0x34   :  { %164 = vperm.xlu1 %2352, %v23_v7   ;;  %320 = vperm.xlu0 %2353, %v19_v12  }
  0x38   :  { %2354 = vset.pattern.permute.xlu1 %v4267_v11  ;;  %2359 = vset.pattern.permute.xlu0 %v4269_v10 }
  0x39   :  { %192 = vperm.xlu1 %2354, %v16_v4   ;;  %140 = vperm.xlu0 %2359, %v16_v4  }
  0x3d   :  { %196 = vperm.xlu1 %2354, %v17_v1   ;;  %152 = vperm.xlu0 %2359, %v20_v6  }
  0x41   :  { %204 = vperm.xlu1 %2354, %v20_v6   ;;  %160 = vperm.xlu0 %2359, %v22_v8   ;;  %v2627_v6 = vrot.slane %v2557_v31, %v2614_v61 }
  0x45   :  { %212 = vperm.xlu1 %2354, %v22_v8   ;;  %304 = vperm.xlu0 %2359, %v14_v13   ;;  %v399_v8 = vmul.f32 0.0, %v2619_v63 }
  0x49   :  { %2355 = vset.pattern.permute.xlu1 %v4265_v0 }
  0x4a   :  { %281 = vperm.xlu1 %2355, %v14_v13  }
  0x4e   :  { %2356 = vset.pattern.permute.xlu1 %v4271_v9 }
  0x4f   :  { %292 = vperm.xlu1 %2356, %v14_v13  }
  0x53   :  { %296 = vperm.xlu1 %2356, %v19_v12  }
  0x57   :  { %2357 = vset.pattern.permute.xlu1 %v4269_v10 }
  0x58   :  { %308 = vperm.xlu1 %2357, %v19_v12   ;;  %v2632_v12 = vrot.slane %v2557_v31, %v2600_v49 }
  0x5c   :  { %2358 = vset.pattern.permute.xlu1 %v4267_v11 }
  0x5d   :  { %316 = vperm.xlu1 %2358, %v14_v13  }
  0x61   :  { %2360 = vset.pattern.permute.xlu1 %v4265_v0 }
  0x81   :  { %v2535_v14 = vpop.permute.xlu1 %43  ;;  %v34_v15 = vpop.permute.xlu0 %33 }
  0x82   :  { %v75_v42 = vmul.f32 %v2578_v38, %v34_v15 }
  0x85   :  { %v49_v16 = vpop.permute.xlu1 %48  ;;  %v2537_v17 = vpop.permute.xlu0 %38 }
  0x86   :  { %v78_v3 = vmul.f32 %v2578_v38, %v49_v16 }
  0x89   :  { %v59_v18 = vpop.permute.xlu1 %58  ;;  %v2539_v19 = vpop.permute.xlu0 %53 }
  0x8d   :  { %v2541_v20 = vpop.permute.xlu1 %68  ;;  %v2543_v21 = vpop.permute.xlu0 %63 }
  0x92   :  { %v89_v23 = vpop.permute.xlu1 %88  ;;  %v85_v24 = vpop.permute.xlu0 %84 }
  0x93   :  { %v119_v39 = vmul.f32 %v2564_v33, %v85_v24 }
  0x95   :  { %v127_v47 = vadd.f32 %v119_v39, %v75_v42  ;;  %v381_v39 = vmul.f32 0.0, %v2627_v6 }
  0x96   :  { %v2547_v26 = vpop.permute.xlu1 %92  ;;  %v97_v27 = vpop.permute.xlu0 %96 }
  0x97   :  { %v122_v62 = vmul.f32 %v2564_v33, %v97_v27  ;;  %v80_v27 = vmul.f32 %v2578_v38, %v59_v18 }
  0x99   :  { %v130_v7 = vadd.f32 %v122_v62, %v78_v3 }
  0x9a   :  { %v2552_v29 = vpop.permute.xlu1 %100  ;;  %v105_v30 = vpop.permute.xlu0 %104 }
  0x9b   :  { %v124_v13 = vmul.f32 %v2564_v33, %v105_v30  ;;  %v76_v30 = vmul.f32 %v2578_v38, %v2537_v17  ;;  %v77_v17 = vmul.f32 %v2578_v38, %v2535_v14 }
  0x9e   :  { %v2572_v36 = vpop.permute.xlu1 %108  ;;  %v2574_v37 = vpop.permute.xlu0 %112 }
  0xa3   :  { %v137_v44 = vpop.permute.xlu1 %136  ;;  %v189_v46 = vpop.permute.xlu0 %188 }
  0xa4   :  { %v171_v48 = vmul.f32 %v2583_v40, %v137_v44  ;;  %v223_v50 = vmul.f32 %v2587_v41, %v189_v46  ;;  %v120_v44 = vmul.f32 %v2564_v33, %v89_v23  ;;  %v413_v46 = vrot.slane %v399_v8, 1 }
  0xa5   :  { %v2648_v23 = vsub.s32 7, %v2545_v25 }
  0xa6   :  { %v179_v51 = vadd.f32 %v171_v48, %v127_v47  ;;  %v438_v47 = vmul.f32 0.0, %v2632_v12  ;;  %v128_v62 = vadd.f32 %v120_v44, %v76_v30 }
  0xa7   :  { %v145_v53 = vpop.permute.xlu1 %144  ;;  %v201_v54 = vpop.permute.xlu0 %200  ;;  %4338 = vst [vmem:[#allocation7_spill] sm:$0xff] %v2648_v23 }
  0xa8   :  { %v231_v56 = vadd.f32 %v223_v50, %v179_v51  ;;  %v226_v48 = vmul.f32 %v2587_v41, %v201_v54  ;;  %v132_v50 = vadd.f32 %v124_v13, %v80_v27  ;;  %v452_v54 = vrot.slane %v438_v47, 2 }
  0xa9   :  { %v2662_v27 = vrot.slane %v2596_v45, %v2560_v32 }
  0xaa   :  { %v243_v57 = vmul.f32 %v2605_v52, %v231_v56 }
  0xab   :  { %v149_v58 = vpop.permute.xlu1 %148  ;;  %v209_v59 = vpop.permute.xlu0 %208 }
  0xac   :  { %v255_v60 = vadd.f32 %v2609_v55, %v243_v57  ;;  %v174_v5 = vmul.f32 %v2583_v40, %v149_v58  ;;  %v121_v58 = vmul.f32 %v2564_v33, %v2547_v26  ;;  %v228_v26 = vmul.f32 %v2587_v41, %v209_v59 }
  0xad   :  { %v2669_v59 = vrot.slane %v2557_v31, %v2648_v23  ;;  %v79_v31 = vmul.f32 %v2578_v38, %v2539_v19 }
  0xae   :  { %v263_v4 = vmax.f32 %v255_v60, 0.0  ;;  %v182_v24 = vadd.f32 %v174_v5, %v130_v7  ;;  %v173_v5 = vmul.f32 %v2583_v40, %v145_v53  ;;  %v82_v53 = vmul.f32 %v2578_v38, %v2541_v20 }
  0xaf   :  { %v157_v1 = vpop.permute.xlu1 %156  ;;  %v2621_v2 = vpop.permute.xlu0 %216 }
  0xb0   :  { %v271_v16 = vmin.f32 %v263_v4, 6.0  ;;  %v176_v42 = vmul.f32 %v2583_v40, %v157_v1  ;;  %v234_v56 = vadd.f32 %v226_v48, %v182_v24  ;;  %v427_v1 = vadd.f32 %v413_v46, %v381_v39 }
  0xb1   :  { %v126_v4 = vmul.f32 %v2564_v33, %v2574_v37  ;;  %v129_v24 = vadd.f32 %v121_v58, %v77_v17  ;;  %v123_v48 = vmul.f32 %v2564_v33, %v2552_v29  ;;  %v230_v17 = vmul.f32 %v2587_v41, %v2621_v2 }
  0xb2   :  { %v343_v51 = vrot.slane %v271_v16, 7  ;;  %v184_v60 = vadd.f32 %v176_v42, %v132_v50  ;;  %v246_v25 = vmul.f32 %v2605_v52, %v234_v56  ;;  %v2677_v30 = vadd.f32 %v452_v54, %v427_v1 }
  0xb3   :  { %v165_v15 = vpop.permute.xlu1 %164  ;;  %v2635_v22 = vpop.permute.xlu0 %320  ;;  %v181_v46 = vadd.f32 %v173_v5, %v129_v24  ;;  %v134_v50 = vadd.f32 %v126_v4, %v82_v53  ;;  %v131_v19 = vadd.f32 %v123_v48, %v79_v31  ;;  %v2693_v54 = vrot.slane %v2596_v45, %v2550_v28 }
  0xb4   :  { %v360_v7 = vsel %vm359_vm0, 0.0, %v343_v51  ;;  %v236_v14 = vadd.f32 %v228_v26, %v184_v60  ;;  %v178_v39 = vmul.f32 %v2583_v40, %v165_v15  ;;  %v258_v20 = vadd.f32 %v2609_v55, %v246_v25 }
  0xb5   :  { %v2673_v44 = vsel %vm368_vm1, %v360_v7, 0.0  ;;  %v2714_v31 = vrot.slane %v2596_v45, %v2570_v35 }
  0xb6   :  { %v248_v51 = vmul.f32 %v2605_v52, %v236_v14  ;;  %v186_v29 = vadd.f32 %v178_v39, %v134_v50  ;;  %v2706_v50 = vrot.slane %v2596_v45, %v2648_v23 }
  0xb8   :  { %v193_v57 = vpop.permute.xlu1 %192  ;;  %v141_v18 = vpop.permute.xlu0 %140  ;;  %v260_v4 = vadd.f32 %v2609_v55, %v248_v51 }
  0xb9   :  { %v172_v3 = vmul.f32 %v2583_v40, %v141_v18  ;;  %v224_v8 = vmul.f32 %v2587_v41, %v193_v57  ;;  %v477_v57 = vmul.f32 %v2669_v59, %v2673_v44  ;;  %v497_v18 = vmul.f32 %v2662_v27, %v2673_v44 }
  0xba   :  { %v268_v2 = vmax.f32 %v260_v4, 0.0 }
  0xbb   :  { %v180_v13 = vadd.f32 %v172_v3, %v128_v62  ;;  %v266_v3 = vmax.f32 %v258_v20, 0.0  ;;  %v485_v25 = vadd.f32 %v477_v57, %v2677_v30  ;;  %v2710_v20 = vrot.slane %v2596_v45, %v2567_v34  ;;  %v2724_v57 = vld [vmem:[%s4262_s1 + $0x10] sm:$0x3] }
  0xbc   :  { %v197_v16 = vpop.permute.xlu1 %196  ;;  %v153_v47 = vpop.permute.xlu0 %152  ;;  %v2739_v4 = vrot.slane %v2724_v57, %v2560_v32 }
  0xbd   :  { %v225_v37 = vmul.f32 %v2587_v41, %v197_v16  ;;  %v232_v42 = vadd.f32 %v224_v8, %v180_v13  ;;  %v175_v58 = vmul.f32 %v2583_v40, %v153_v47  ;;  %v513_v8 = vrot.slane %v497_v18, 1 }
  0xbe   :  { %v238_v13 = vadd.f32 %v230_v17, %v186_v29  ;;  %v274_v39 = vmin.f32 %v266_v3, 6.0 }
  0xbf   :  { %v244_v15 = vmul.f32 %v2605_v52, %v232_v42  ;;  %v233_v56 = vadd.f32 %v225_v37, %v181_v46  ;;  %v183_v16 = vadd.f32 %v175_v58, %v131_v19  ;;  %v541_v37 = vmul.f32 %v2693_v54, %v2673_v44 }
  0xc0   :  { %v205_v60 = vpop.permute.xlu1 %204  ;;  %v529_v46 = vadd.f32 %v513_v8, %v485_v25  ;;  %v250_v47 = vmul.f32 %v2605_v52, %v238_v13  ;;  %v400_v58 = vmul.f32 %v2619_v63, %v2673_v44 }
  0xc1   :  { %v256_v62 = vadd.f32 %v2609_v55, %v244_v15  ;;  %v245_v1 = vmul.f32 %v2605_v52, %v233_v56  ;;  %v227_v7 = vmul.f32 %v2587_v41, %v205_v60  ;;  %v557_v15 = vrot.slane %v541_v37, 2 }
  0xc2   :  { %v2719_v56 = vrot.slane %v2596_v45, %v2614_v61  ;;  %v346_v60 = vrot.slane %v274_v39, 7  ;;  %v262_v45 = vadd.f32 %v2609_v55, %v250_v47  ;;  %v382_v47 = vmul.f32 %v2627_v6, %v2673_v44 }
  0xc3   :  { %v264_v5 = vmax.f32 %v256_v62, 0.0  ;;  %v257_v26 = vadd.f32 %v2609_v55, %v245_v1  ;;  %v235_v53 = vadd.f32 %v227_v7, %v183_v16  ;;  %v276_v62 = vmin.f32 %v268_v2, 6.0 }
  0xc4   :  { %v573_v19 = vadd.f32 %v557_v15, %v529_v46  ;;  %v2747_v7 = vmul.f32 0.0, %v2714_v31  ;;  %v2750_v13 = vmul.f32 0.0, %v2719_v56  ;;  %v270_v39 = vmax.f32 %v262_v45, 0.0 }
  0xc5   :  { %v272_v24 = vmin.f32 %v264_v5, 6.0  ;;  %v265_v14 = vmax.f32 %v257_v26, 0.0  ;;  %v247_v29 = vmul.f32 %v2605_v52, %v235_v53  ;;  %v2744_v26 = vmul.f32 0.0, %v2710_v20 }
  0xc6   :  { %v348_v37 = vrot.slane %v276_v62, 7  ;;  %v4339_v49 = vrot.slane %v2747_v7, 1 }
  0xc7   :  { %v344_v42 = vrot.slane %v272_v24, 7  ;;  %v273_v48 = vmin.f32 %v265_v14, 6.0  ;;  %v259_v16 = vadd.f32 %v2609_v55, %v247_v29  ;;  %v414_v24 = vrot.slane %v400_v58, 1 }
  0xc8   :  { %v363_v14 = vsel %vm359_vm0, 0.0, %v346_v60  ;;  %v439_v29 = vmul.f32 %v2632_v12, %v2673_v44 }
  0xc9   :  { %v361_v51 = vsel %vm359_vm0, 0.0, %v344_v42  ;;  %v345_v1 = vrot.slane %v273_v48, 7  ;;  %v2768_v58 = vsel %vm368_vm1, %v363_v14, 0.0  ;;  %v267_v62 = vmax.f32 %v259_v16, 0.0 }
  0xca   :  { %v2727_v18 = vsel %vm368_vm1, %v361_v51, 0.0  ;;  %v544_v16 = vmul.f32 %v2693_v54, %v2768_v58 }
  0xcb   :  { %v585_v3 = vmul.f32 %v2710_v20, %v2727_v18  ;;  %v604_v17 = vmul.f32 %v2714_v31, %v2727_v18  ;;  %v644_v5 = vmul.f32 %v2719_v56, %v2727_v18  ;;  %v362_v53 = vsel %vm359_vm0, 0.0, %v345_v1 }
  0xcc   :  { %v2756_v46 = vsel %vm368_vm1, %v362_v53, 0.0  ;;  %v125_v1 = vmul.f32 %v2564_v33, %v2572_v36 }
  0xcd   :  { %v592_v25 = vadd.f32 %v585_v3, %v573_v19  ;;  %v618_v8 = vrot.slane %v604_v17, 1  ;;  %v658_v42 = vrot.slane %v644_v5, 2  ;;  %v402_v51 = vmul.f32 %v2619_v63, %v2756_v46 }
  0xce   :  { %v441_v15 = vmul.f32 %v2632_v12, %v2756_v46  ;;  %v365_v19 = vsel %vm359_vm0, 0.0, %v348_v37  ;;  %v384_v45 = vmul.f32 %v2627_v6, %v2756_v46  ;;  %v81_v17 = vmul.f32 %v2578_v38, %v2543_v21 }
  0xcf   :  { %v632_v2 = vadd.f32 %v618_v8, %v592_v25  ;;  %v416_v3 = vrot.slane %v402_v51, 1  ;;  %v428_v5 = vadd.f32 %v414_v24, %v382_v47  ;;  %v278_v25 = vmin.f32 %v270_v39, 6.0 }
  0xd0   :  { %v500_v8 = vmul.f32 %v2662_v27, %v2768_v58  ;;  %v455_v14 = vrot.slane %v441_v15, 2  ;;  %v453_v37 = vrot.slane %v439_v29, 2  ;;  %v2783_v53 = vsel %vm368_vm1, %v365_v19, 0.0 }
  0xd1   :  { %v672_v60 = vadd.f32 %v658_v42, %v632_v2  ;;  %v430_v36 = vadd.f32 %v416_v3, %v384_v45  ;;  %v275_v42 = vmin.f32 %v267_v62, 6.0  ;;  %v133_v21 = vadd.f32 %v125_v1, %v81_v17  ;;  %v161_v3 = vpop.permute.xlu0 %160 }
  0xd2   :  { %v480_v24 = vmul.f32 %v2669_v59, %v2768_v58  ;;  %v467_v51 = vadd.f32 %v453_v37, %v428_v5  ;;  %v516_v45 = vrot.slane %v500_v8, 1  ;;  %v560_v15 = vrot.slane %v544_v16, 2 }
  0xd3   :  { %v684_v44 = vmul.f32 %v2706_v50, %v672_v60  ;;  %v469_v47 = vadd.f32 %v455_v14, %v430_v36  ;;  %v350_v60 = vrot.slane %v278_v25, 7  ;;  %v347_v11 = vrot.slane %v275_v42, 7 }
  0xd4   :  { %v2791_v29 = vmul.f32 %v2627_v6, %v2783_v53  ;;  %v2795_v62 = vmul.f32 %v2619_v63, %v2783_v53  ;;  %v2799_v1 = vmul.f32 %v2632_v12, %v2783_v53  ;;  %v401_v25 = vmul.f32 %v2619_v63, %v2727_v18 }
  0xd5   :  { %v696_v2 = vadd.f32 %v2739_v4, %v684_v44  ;;  %v488_v19 = vadd.f32 %v480_v24, %v469_v47  ;;  %v364_v5 = vsel %vm359_vm0, 0.0, %v347_v11  ;;  %v482_v16 = vmul.f32 %v2669_v59, %v2783_v53  ;;  %v213_v47 = vpop.permute.xlu1 %212 }
  0xd6   :  { %v373_v8 = vsel %vm368_vm1, %v364_v5, 0.0  ;;  %v367_v36 = vsel %vm359_vm0, 0.0, %v350_v60  ;;  %v478_v14 = vmul.f32 %v2669_v59, %v2727_v18  ;;  %v498_v60 = vmul.f32 %v2662_v27, %v2727_v18 }
  0xd7   :  { %v704_v0 = vmax.f32 %v696_v2, 0.0  ;;  %v532_v44 = vadd.f32 %v516_v45, %v488_v19  ;;  %v403_v37 = vmul.f32 %v2619_v63, %v373_v8  ;;  %v442_v2 = vmul.f32 %v2632_v12, %v373_v8 }
  0xd8   :  { %v481_v42 = vmul.f32 %v2669_v59, %v373_v8  ;;  %v501_v24 = vmul.f32 %v2662_v27, %v373_v8  ;;  %v385_v45 = vmul.f32 %v2627_v6, %v373_v8  ;;  %v415_v5 = vrot.slane %v401_v25, 1 }
  0xd9   :  { %v2801_v17 = vmin.f32 %v704_v0, 6.0  ;;  %v177_v0 = vmul.f32 %v2583_v40, %v161_v3  ;;  %v576_v11 = vadd.f32 %v560_v15, %v532_v44  ;;  %v417_v19 = vrot.slane %v403_v37, 1 }
  0xda   :  { %v545_v3 = vmul.f32 %v2693_v54, %v373_v8  ;;  %v489_v44 = vadd.f32 %v481_v42, %v2677_v30  ;;  %v517_v10 = vrot.slane %v501_v24, 1  ;;  %v608_v39 = vmul.f32 %v2714_v31, %v2783_v53 }
  0xdb   :  { %837 = vperm.xlu0 %2359, %v2801_v17   ;;  %734 = vperm.xlu1 %2360, %v2801_v17   ;;  %v595_v15 = vadd.f32 %v2744_v26, %v576_v11  ;;  %v431_v9 = vadd.f32 %v417_v19, %v385_v45  ;;  %v185_v48 = vadd.f32 %v177_v0, %v133_v21  ;;  %v456_v61 = vrot.slane %v442_v2, 2 }
  0xdc   :  { %v229_v23 = vmul.f32 %v2587_v41, %v213_v47  ;;  %v533_v37 = vadd.f32 %v517_v10, %v489_v44  ;;  %v561_v35 = vrot.slane %v545_v3, 2  ;;  %v486_v8 = vadd.f32 %v478_v14, %v467_v51 }
  0xdd   :  { %v635_v43 = vadd.f32 %v4339_v49, %v595_v15  ;;  %v514_v25 = vrot.slane %v498_v60, 1  ;;  %v589_v11 = vmul.f32 %v2710_v20, %v2783_v53  ;;  %v4340_v42 = vrot.slane %v2750_v13, 2 }
  0xde   :  { %v237_v30 = vadd.f32 %v229_v23, %v185_v48  ;;  %v470_v45 = vadd.f32 %v456_v61, %v431_v9  ;;  %v577_v19 = vadd.f32 %v561_v35, %v533_v37  ;;  %v648_v21 = vmul.f32 %v2719_v56, %v2783_v53 }
  0xdf   :  { %v675_v24 = vadd.f32 %v4340_v42, %v635_v43  ;;  %v383_v49 = vmul.f32 %v2627_v6, %v2727_v18  ;;  %v440_v10 = vmul.f32 %v2632_v12, %v2727_v18  ;;  %v542_v51 = vmul.f32 %v2693_v54, %v2727_v18 }
  0xe0   :  { %v249_v14 = vmul.f32 %v2605_v52, %v237_v30  ;;  %v502_v9 = vmul.f32 %v2662_v27, %v2783_v53  ;;  %v596_v35 = vadd.f32 %v589_v11, %v577_v19  ;;  %v622_v43 = vrot.slane %v608_v39, 1 }
  0xe1   :  { %v687_v23 = vmul.f32 %v2706_v50, %v675_v24  ;;  %v418_v61 = vrot.slane %v2795_v62, 1  ;;  %v429_v48 = vadd.f32 %v415_v5, %v383_v49  ;;  %v530_v0 = vadd.f32 %v514_v25, %v486_v8 }
  0xe2   :  { %v261_v2 = vadd.f32 %v2609_v55, %v249_v14  ;;  %v490_v60 = vadd.f32 %v482_v16, %v470_v45  ;;  %v636_v3 = vadd.f32 %v622_v43, %v596_v35  ;;  %v662_v18 = vrot.slane %v648_v21, 2 }
  0xe3   :  { %v699_v47 = vadd.f32 %v2739_v4, %v687_v23  ;;  %v2850_v15 = vsel %vm368_vm1, %v367_v36, 0.0  ;;  %v454_v44 = vrot.slane %v440_v10, 2  ;;  %v558_v37 = vrot.slane %v542_v51, 2 }
  0xe4   :  { %v269_v30 = vmax.f32 %v261_v2, 0.0  ;;  %v518_v11 = vrot.slane %v502_v9, 1  ;;  %v546_v39 = vmul.f32 %v2693_v54, %v2783_v53  ;;  %v676_v62 = vadd.f32 %v662_v18, %v636_v3 }
  0xe5   :  { %v707_v42 = vmax.f32 %v699_v47, 0.0  ;;  %v457_v5 = vrot.slane %v2799_v1, 2  ;;  %v468_v8 = vadd.f32 %v454_v44, %v429_v48  ;;  %v574_v25 = vadd.f32 %v558_v37, %v530_v0 }
  0xe6   :  { %v277_v24 = vmin.f32 %v269_v30, 6.0  ;;  %v432_v16 = vadd.f32 %v418_v61, %v2791_v29  ;;  %v534_v36 = vadd.f32 %v518_v11, %v490_v60  ;;  %v688_v19 = vmul.f32 %v2706_v50, %v676_v62 }
  0xe7   :  { %v2856_v45 = vmin.f32 %v707_v42, 6.0  ;;  %v484_v21 = vmul.f32 %v2669_v59, %v2850_v15  ;;  %v479_v49 = vmul.f32 %v2669_v59, %v2756_v46  ;;  %v586_v53 = vmul.f32 %v2710_v20, %v2756_v46 }
  0xe8   :  { %v349_v1 = vrot.slane %v277_v24, 7  ;;  %v504_v10 = vmul.f32 %v2662_v27, %v2850_v15  ;;  %v548_v29 = vmul.f32 %v2693_v54, %v2850_v15  ;;  %v562_v51 = vrot.slane %v546_v39, 2 }
  0xe9   :  { %v700_v14 = vadd.f32 %v2739_v4, %v688_v19  ;;  %849 = vperm.xlu0 %2359, %v2856_v45   ;;  %v487_v23 = vadd.f32 %v479_v49, %v468_v8  ;;  %v499_v9 = vmul.f32 %v2662_v27, %v2756_v46  ;;  %v593_v35 = vadd.f32 %v586_v53, %v574_v25 }
  0xea   :  { %v366_v43 = vsel %vm359_vm0, 0.0, %v349_v1  ;;  %v605_v61 = vmul.f32 %v2714_v31, %v2756_v46  ;;  %v578_v48 = vadd.f32 %v562_v51, %v534_v36  ;;  %v471_v3 = vadd.f32 %v457_v5, %v432_v16 }
  0xeb   :  { %v708_v0 = vmax.f32 %v700_v14, 0.0  ;;  %v375_v2 = vsel %vm368_vm1, %v366_v43, 0.0  ;;  %v515_v36 = vrot.slane %v499_v9, 1  ;;  %v591_v43 = vmul.f32 %v2710_v20, %v2850_v15 }
  0xec   :  { %v405_v47 = vmul.f32 %v2619_v63, %v375_v2  ;;  %v444_v60 = vmul.f32 %v2632_v12, %v375_v2  ;;  %v483_v18 = vmul.f32 %v2669_v59, %v375_v2  ;;  %v503_v37 = vmul.f32 %v2662_v27, %v375_v2 }
  0xed   :  { %v2880_v44 = vmin.f32 %v708_v0, 6.0  ;;  %v547_v30 = vmul.f32 %v2693_v54, %v375_v2  ;;  %v590_v42 = vmul.f32 %v2710_v20, %v375_v2  ;;  %v387_v11 = vmul.f32 %v2627_v6, %v375_v2 }
  0xee   :  { %v419_v39 = vrot.slane %v405_v47, 1  ;;  %v491_v62 = vadd.f32 %v483_v18, %v471_v3  ;;  %v609_v8 = vmul.f32 %v2714_v31, %v375_v2  ;;  %v645_v63 = vmul.f32 %v2719_v56, %v2756_v46 }
  0xef   :  { %v519_v12 = vrot.slane %v503_v37, 1  ;;  %v597_v5 = vadd.f32 %v590_v42, %v578_v48  ;;  %v649_v59 = vmul.f32 %v2719_v56, %v375_v2  ;;  %754 = vperm.xlu1 %2360, %v2880_v44   ;;  %v619_v27 = vrot.slane %v605_v61, 1 }
  0xf0   :  { %v433_v25 = vadd.f32 %v419_v39, %v387_v11  ;;  %v458_v24 = vrot.slane %v444_v60, 2  ;;  %v623_v16 = vrot.slane %v609_v8, 1  ;;  %v543_v6 = vmul.f32 %v2693_v54, %v2756_v46 }
  0xf1   :  { %v535_v19 = vadd.f32 %v519_v12, %v491_v62  ;;  %v563_v49 = vrot.slane %v547_v30, 2  ;;  %v633_v53 = vadd.f32 %v619_v27, %v593_v35  ;;  %v663_v14 = vrot.slane %v649_v59, 2 }
  0xf2   :  { %v472_v1 = vadd.f32 %v458_v24, %v433_v25  ;;  %v637_v51 = vadd.f32 %v623_v16, %v597_v5  ;;  %v610_v48 = vmul.f32 %v2714_v31, %v2850_v15  ;;  %v531_v61 = vadd.f32 %v515_v36, %v487_v23 }
  0xf3   :  { %v579_v0 = vadd.f32 %v563_v49, %v535_v19  ;;  %v4341_v2 = vmov 1   ;;  %v520_v9 = vrot.slane %v504_v10, 1  ;;  %v659_v47 = vrot.slane %v645_v63, 2 }
  0xf4   :  { %2361 = vset.pattern.permute.xlu1 %v4341_v2  ;;  %v492_v60 = vadd.f32 %v484_v21, %v472_v1  ;;  %v677_v54 = vadd.f32 %v663_v14, %v637_v51  ;;  %v564_v46 = vrot.slane %v548_v29, 2  ;;  %v559_v35 = vrot.slane %v543_v6, 2 }
  0xf5   :  { %785 = vperm.xlu1 %2361, %v2801_v17   ;;  %v673_v3 = vadd.f32 %v659_v47, %v633_v53  ;;  %v598_v37 = vadd.f32 %v591_v43, %v579_v0  ;;  %v624_v11 = vrot.slane %v610_v48, 1  ;;  %v650_v23 = vmul.f32 %v2719_v56, %v2850_v15 }
  0xf6   :  { %v536_v18 = vadd.f32 %v520_v9, %v492_v60  ;;  %v689_v30 = vmul.f32 %v2706_v50, %v677_v54  ;;  %v575_v42 = vadd.f32 %v559_v35, %v531_v61  ;;  %v4342_v62 = vmov 2  }
  0xf7   :  { %v587_v21 = vmul.f32 %v2710_v20, %v2768_v58  ;;  %v606_v29 = vmul.f32 %v2714_v31, %v2768_v58  ;;  %v685_v8 = vmul.f32 %v2706_v50, %v673_v3  ;;  %v638_v12 = vadd.f32 %v624_v11, %v598_v37 }
  0xf8   :  { %v580_v39 = vadd.f32 %v564_v46, %v536_v18  ;;  %v701_v10 = vadd.f32 %v2739_v4, %v689_v30  ;;  %v664_v59 = vrot.slane %v650_v23, 2  ;;  %v4343_v27 = vrot.slane %v2747_v7, 1  ;;  %v282_v30 = vpop.permute.xlu1 %281 }
  0xf9   :  { %2362 = vset.pattern.permute.xlu1 %v4342_v62  ;;  %v594_v15 = vadd.f32 %v587_v21, %v575_v42  ;;  %v620_v16 = vrot.slane %v606_v29, 1  ;;  %v646_v20 = vmul.f32 %v2719_v56, %v2768_v58  ;;  %v4344_v31 = vmov 3  }
  0xfa   :  { %853 = vperm.xlu1 %2362, %v2880_v44   ;;  %v599_v63 = vadd.f32 %v2744_v26, %v580_v39  ;;  %v709_v5 = vmax.f32 %v701_v10, 0.0  ;;  %v697_v36 = vadd.f32 %v2739_v4, %v685_v8  ;;  %v678_v6 = vadd.f32 %v664_v59, %v638_v12  ;;  %v305_v8 = vpop.permute.xlu0 %304 }
  0xfb   :  { %v4345_v26 = vrot.slane %v2750_v13, 2  ;;  %v634_v7 = vadd.f32 %v620_v16, %v594_v15  ;;  %v660_v53 = vrot.slane %v646_v20, 2  ;;  %v4297_v58 = vmov 4  }
  0xfc   :  { %v639_v25 = vadd.f32 %v4343_v27, %v599_v63  ;;  %v2913_v24 = vmin.f32 %v709_v5, 6.0  ;;  %v705_v1 = vmax.f32 %v697_v36, 0.0  ;;  %v690_v51 = vmul.f32 %v2706_v50, %v678_v6  ;;  %v293_v11 = vpop.permute.xlu1 %292 }
  0xfd   :  { %v674_v14 = vadd.f32 %v660_v53, %v634_v7  ;;  %v4346_v9 = vmov 0   ;;  %v4284_v54 = vmov 5   ;;  %v4303_v18 = vmov 11   ;;  %v2437_v53 = vld [vmem:[%s4261_s0 + $0x14] sm:$0xf] }
  0xfe   :  { %2363 = vset.pattern.permute.xlu1 %v4344_v31  ;;  %v679_v19 = vadd.f32 %v4345_v26, %v639_v25  ;;  %857 = vperm.xlu0 %2359, %v2913_v24   ;;  %v2928_v43 = vmin.f32 %v705_v1, 6.0  ;;  %v702_v48 = vadd.f32 %v2739_v4, %v690_v51  ;;  %v4299_v37 = vmov 14  }
  0xff   :  { %889 = vperm.xlu1 %2363, %v2801_v17   ;;  %v686_v0 = vmul.f32 %v2706_v50, %v674_v14  ;;  %v4295_v42 = vmov 17   ;;  %v4287_v10 = vmov 20   ;;  %v289_v21 = vmul.f32 %v282_v30, %v2578_v38 }
 0x100   :  { %v691_v49 = vmul.f32 %v2706_v50, %v679_v19  ;;  %v710_v47 = vmax.f32 %v702_v48, 0.0  ;;  %v2983_v23 = vpop.permute.xlu1 %296  ;;  %v299_v29 = vmul.f32 %v293_v11, %v2564_v33  ;;  %v311_v5 = vmul.f32 %v305_v8, %v2583_v40 }
 0x101   :  { %v698_v60 = vadd.f32 %v2739_v4, %v686_v0  ;;  %v4293_v25 = vmov 6   ;;  %v4285_v20 = vmov 23   ;;  %v3026_v1 = vrot.slane %v2724_v57, %v2550_v28 }
 0x102   :  { %v703_v56 = vadd.f32 %v2739_v4, %v691_v49  ;;  %v2941_v46 = vmin.f32 %v710_v47, 6.0  ;;  %v4283_v4 = vmov 8   ;;  %v301_v12 = vadd.f32 %v299_v29, %v289_v21 }
 0x103   :  { %2364 = vset.pattern.permute.xlu1 %v4297_v58  ;;  %v706_v35 = vmax.f32 %v698_v60, 0.0 }
 0x104   :  { %957 = vperm.xlu1 %2364, %v2880_v44   ;;  %v711_v13 = vmax.f32 %v703_v56, 0.0  ;;  %4347 = vst [vmem:[#allocation8_spill] sm:$0xff] %v2941_v46  ;;  %v2988_v39 = vpop.permute.xlu1 %308  ;;  %v313_v59 = vadd.f32 %v311_v5, %v301_v12  ;;  %v4291_v56 = vmov 7  }
 0x105   :  { %v2945_v3 = vmin.f32 %v706_v35, 6.0 }
 0x106   :  { %v2931_v61 = vmin.f32 %v711_v13, 6.0 }
 0x108   :  { %2365 = vset.pattern.permute.xlu1 %v4346_v9  ;;  %865 = vperm.xlu0 %2359, %v2931_v61   ;;  %v317_v63 = vpop.permute.xlu1 %316 }
 0x109   :  { %739 = vperm.xlu1 %2365, %v2928_v43   ;;  %v323_v15 = vmul.f32 %v317_v63, %v2587_v41 }
 0x10b   :  { %v325_v27 = vadd.f32 %v323_v15, %v313_v59 }
 0x10c   :  { %2371 = vset.pattern.permute.xlu0 %v4284_v54 }
 0x10d   :  { %749 = vperm.xlu1 %2365, %v2856_v45   ;;  %997 = vperm.xlu0 %2371, %v2928_v43   ;;  %v327_v16 = vmul.f32 %v325_v27, %v2605_v52 }
 0x10f   :  { %v329_v36 = vadd.f32 %v327_v16, %v2609_v55  ;;  %v4289_v16 = vmov 9  }
 0x111   :  { %764 = vperm.xlu1 %2365, %v2941_v46   ;;  %1009 = vperm.xlu0 %2371, %v2880_v44   ;;  %v331_v26 = vmax.f32 %v329_v36, 0.0 }
 0x113   :  { %v333_v7 = vmin.f32 %v331_v26, 6.0 }
 0x115   :  { %2366 = vset.pattern.permute.xlu1 %v4341_v2  ;;  %1017 = vperm.xlu0 %2371, %v2941_v46   ;;  %v720_v51 = vmul.f32 %v2706_v50, %v333_v7 }
 0x116   :  { %793 = vperm.xlu1 %2366, %v2945_v3  }
 0x117   :  { %v726_v48 = vadd.f32 %v3026_v1, %v720_v51 }
 0x119   :  { %2374 = vset.pattern.permute.xlu0 %v4283_v4  ;;  %v728_v47 = vmax.f32 %v726_v48, 0.0 }
 0x11a   :  { %797 = vperm.xlu1 %2366, %v2856_v45   ;;  %1149 = vperm.xlu0 %2374, %v2801_v17  }
 0x11b   :  { %v3047_v35 = vmin.f32 %v728_v47, 6.0 }
 0x11e   :  { %805 = vperm.xlu1 %2366, %v2913_v24   ;;  %1161 = vperm.xlu0 %2374, %v2856_v45  }
 0x122   :  { %813 = vperm.xlu1 %2366, %v2931_v61   ;;  %1169 = vperm.xlu0 %2374, %v2913_v24  }
 0x126   :  { %2367 = vset.pattern.permute.xlu1 %v4342_v62  ;;  %1177 = vperm.xlu0 %2374, %v2931_v61  }
 0x127   :  { %841 = vperm.xlu1 %2367, %v2928_v43  }
 0x12a   :  { %2379 = vset.pattern.permute.xlu0 %v4303_v18 }
 0x12b   :  { %845 = vperm.xlu1 %2367, %v2945_v3   ;;  %1309 = vperm.xlu0 %2379, %v2928_v43  }
 0x12f   :  { %861 = vperm.xlu1 %2367, %v2941_v46   ;;  %1321 = vperm.xlu0 %2379, %v2880_v44  }
 0x133   :  { %2368 = vset.pattern.permute.xlu1 %v4344_v31  ;;  %1329 = vperm.xlu0 %2379, %v2941_v46  }
 0x134   :  { %897 = vperm.xlu1 %2368, %v2945_v3  }
 0x137   :  { %2382 = vset.pattern.permute.xlu0 %v4299_v37 }
 0x138   :  { %901 = vperm.xlu1 %2368, %v2856_v45   ;;  %1461 = vperm.xlu0 %2382, %v2801_v17  }
 0x13c   :  { %909 = vperm.xlu1 %2368, %v2913_v24   ;;  %1473 = vperm.xlu0 %2382, %v2856_v45  }
 0x140   :  { %917 = vperm.xlu1 %2368, %v2931_v61   ;;  %1481 = vperm.xlu0 %2382, %v2913_v24  }
 0x144   :  { %2369 = vset.pattern.permute.xlu1 %v4297_v58  ;;  %1489 = vperm.xlu0 %2382, %v2931_v61  }
 0x145   :  { %945 = vperm.xlu1 %2369, %v2928_v43  }
 0x148   :  { %2387 = vset.pattern.permute.xlu0 %v4295_v42 }
 0x149   :  { %949 = vperm.xlu1 %2369, %v2945_v3   ;;  %1621 = vperm.xlu0 %2387, %v2928_v43  }
 0x14d   :  { %965 = vperm.xlu1 %2369, %v2941_v46   ;;  %1633 = vperm.xlu0 %2387, %v2880_v44  }
 0x151   :  { %2370 = vset.pattern.permute.xlu1 %v4284_v54  ;;  %1641 = vperm.xlu0 %2387, %v2941_v46  }
 0x152   :  { %993 = vperm.xlu1 %2370, %v2801_v17  }
 0x155   :  { %2390 = vset.pattern.permute.xlu0 %v4287_v10  ;;  %v4301_v10 = vmov 10  }
 0x156   :  { %1001 = vperm.xlu1 %2370, %v2945_v3   ;;  %1773 = vperm.xlu0 %2390, %v2801_v17  }
 0x15a   :  { %1005 = vperm.xlu1 %2370, %v2856_v45   ;;  %1785 = vperm.xlu0 %2390, %v2856_v45   ;;  %v3009_v6 = vpop.permute.xlu1 %734  ;;  %v3030_v14 = vpop.permute.xlu0 %837 }
 0x15e   :  { %1013 = vperm.xlu1 %2370, %v2913_v24   ;;  %1793 = vperm.xlu0 %2390, %v2913_v24  }
 0x162   :  { %1021 = vperm.xlu1 %2370, %v2931_v61   ;;  %1801 = vperm.xlu0 %2390, %v2931_v61  }
 0x166   :  { %2372 = vset.pattern.permute.xlu1 %v4293_v25  ;;  %2395 = vset.pattern.permute.xlu0 %v4285_v20 }
 0x167   :  { %1049 = vperm.xlu1 %2372, %v2928_v43   ;;  %1933 = vperm.xlu0 %2395, %v2928_v43  }
 0x168   :  { %v3037_v0 = vpop.permute.xlu0 %849 }
 0x16b   :  { %1053 = vperm.xlu1 %2372, %v2945_v3   ;;  %1945 = vperm.xlu0 %2395, %v2880_v44  }
 0x16e   :  { %v3014_v19 = vpop.permute.xlu1 %754 }
 0x16f   :  { %1061 = vperm.xlu1 %2372, %v2880_v44   ;;  %1953 = vperm.xlu0 %2395, %v2941_v46  }
 0x173   :  { %1069 = vperm.xlu1 %2372, %v2941_v46   ;;  %2396 = vset.pattern.permute.xlu0 %v4346_v9 }
 0x174   :  { %v3019_v49 = vpop.permute.xlu1 %785  ;;  %286 = vperm.xlu0 %2396, %v2437_v53  }
 0x177   :  { %2373 = vset.pattern.permute.xlu1 %v4291_v56 }
 0x178   :  { %1097 = vperm.xlu1 %2373, %v2801_v17   ;;  %744 = vperm.xlu0 %2396, %v2945_v3  }
 0x179   :  { %v3034_v13 = vpop.permute.xlu1 %853 }
 0x17c   :  { %1105 = vperm.xlu1 %2373, %v2945_v3   ;;  %759 = vperm.xlu0 %2396, %v2913_v24  }
 0x17d   :  { %v3045_v60 = vpop.permute.xlu0 %857 }
 0x17e   :  { %v3041_v57 = vpop.permute.xlu1 %889  ;;  %4348 = vst [vmem:[#allocation9_spill] sm:$0xff] %v3045_v60 }
 0x180   :  { %1109 = vperm.xlu1 %2373, %v2856_v45   ;;  %769 = vperm.xlu0 %2396, %v2931_v61  }
 0x183   :  { %v3049_v30 = vpop.permute.xlu1 %957 }
 0x184   :  { %1117 = vperm.xlu1 %2373, %v2913_v24   ;;  %2006 = vperm.xlu0 %2396, %v3047_v35  }
 0x187   :  { %v3053_v11 = vpop.permute.xlu0 %865 }
 0x188   :  { %4349 = vst [vmem:[#allocation10_spill] sm:$0xff] %v3053_v11  ;;  %1125 = vperm.xlu1 %2373, %v2931_v61   ;;  %v3056_v21 = vpop.permute.xlu1 %739  ;;  %2397 = vset.pattern.permute.xlu0 %v4341_v2 }
 0x189   :  { %789 = vperm.xlu0 %2397, %v2928_v43  }
 0x18c   :  { %2375 = vset.pattern.permute.xlu1 %v4283_v4  ;;  %v3061_v29 = vpop.permute.xlu1 %749  ;;  %v3063_v8 = vpop.permute.xlu0 %997 }
 0x18d   :  { %1153 = vperm.xlu1 %2375, %v2928_v43   ;;  %801 = vperm.xlu0 %2397, %v2880_v44  }
 0x190   :  { %v3067_v63 = vpop.permute.xlu1 %764  ;;  %v3069_v12 = vpop.permute.xlu0 %1009 }
 0x191   :  { %1157 = vperm.xlu1 %2375, %v2945_v3   ;;  %809 = vperm.xlu0 %2397, %v2941_v46  }
 0x194   :  { %v3073_v5 = vpop.permute.xlu0 %1017 }
 0x195   :  { %1165 = vperm.xlu1 %2375, %v2880_v44   ;;  %v3076_v15 = vpop.permute.xlu1 %793 }
 0x196   :  { %4350 = vst [vmem:[#allocation11_spill] sm:$0xff] %v3076_v15 }
 0x199   :  { %1173 = vperm.xlu1 %2375, %v2941_v46   ;;  %v3079_v59 = vpop.permute.xlu1 %797  ;;  %v3081_v27 = vpop.permute.xlu0 %1149 }
 0x19a   :  { %4351 = vst [vmem:[#allocation12_spill] sm:$0xff] %v3081_v27  ;;  %v4307_v27 = vmov 13  }
 0x19d   :  { %2376 = vset.pattern.permute.xlu1 %v4289_v16  ;;  %v3084_v36 = vpop.permute.xlu1 %805  ;;  %v3086_v26 = vpop.permute.xlu0 %1161 }
 0x19e   :  { %4352 = vst [vmem:[#allocation13_spill] sm:$0xff] %v3086_v26  ;;  %1201 = vperm.xlu1 %2376, %v2801_v17  }
 0x1a1   :  { %v3089_v7 = vpop.permute.xlu1 %813  ;;  %v3091_v53 = vpop.permute.xlu0 %1169 }
 0x1a2   :  { %4353 = vst [vmem:[#allocation14_spill] sm:$0xff] %v3089_v7  ;;  %4354 = vst [vmem:[#allocation15_spill] sm:$0xff] %v3091_v53  ;;  %1209 = vperm.xlu1 %2376, %v2945_v3  }
 0x1a5   :  { %v3094_v51 = vpop.permute.xlu0 %1177 }
 0x1a6   :  { %4355 = vst [vmem:[#allocation16_spill] sm:$0xff] %v3094_v51  ;;  %1213 = vperm.xlu1 %2376, %v2856_v45   ;;  %v3097_v48 = vpop.permute.xlu1 %841 }
 0x1aa   :  { %1221 = vperm.xlu1 %2376, %v2913_v24   ;;  %v3100_v47 = vpop.permute.xlu1 %845  ;;  %v3102_v4 = vpop.permute.xlu0 %1309 }
 0x1ab   :  { %4356 = vst [vmem:[#allocation17_spill] sm:$0xff] %v3100_v47  ;;  %4357 = vst [vmem:[#allocation18_spill] sm:$0xff] %v3102_v4 }
 0x1ae   :  { %1229 = vperm.xlu1 %2376, %v2931_v61   ;;  %v3105_v54 = vpop.permute.xlu1 %861  ;;  %v3107_v20 = vpop.permute.xlu0 %1321 }
 0x1af   :  { %4358 = vst [vmem:[#allocation19_spill] sm:$0xff] %v3107_v20 }
 0x1b2   :  { %2377 = vset.pattern.permute.xlu1 %v4301_v10  ;;  %v3110_v16 = vpop.permute.xlu0 %1329 }
 0x1b3   :  { %4359 = vst [vmem:[#allocation20_spill] sm:$0xff] %v3110_v16  ;;  %1257 = vperm.xlu1 %2377, %v2928_v43   ;;  %v3113_v56 = vpop.permute.xlu1 %897  ;;  %v4366_v16 = vmov 11  }
 0x1b4   :  { %4360 = vst [vmem:[#allocation21_spill] sm:$0xff] %v3113_v56 }
 0x1b7   :  { %1261 = vperm.xlu1 %2377, %v2945_v3   ;;  %v3116_v25 = vpop.permute.xlu1 %901  ;;  %v3118_v42 = vpop.permute.xlu0 %1461 }
 0x1b8   :  { %4361 = vst [vmem:[#allocation22_spill] sm:$0xff] %v3118_v42 }
 0x1bb   :  { %1269 = vperm.xlu1 %2377, %v2880_v44   ;;  %v3121_v58 = vpop.permute.xlu1 %909  ;;  %v3123_v37 = vpop.permute.xlu0 %1473 }
 0x1bc   :  { %4362 = vst [vmem:[#allocation23_spill] sm:$0xff] %v3121_v58  ;;  %4363 = vst [vmem:[#allocation24_spill] sm:$0xff] %v3123_v37 }
 0x1bf   :  { %1277 = vperm.xlu1 %2377, %v2941_v46   ;;  %v3126_v10 = vpop.permute.xlu1 %917  ;;  %v3128_v18 = vpop.permute.xlu0 %1481 }
 0x1c0   :  { %4364 = vst [vmem:[#allocation25_spill] sm:$0xff] %v3126_v10  ;;  %4365 = vst [vmem:[#allocation26_spill] sm:$0xff] %v3128_v18 }
 0x1c3   :  { %2378 = vset.pattern.permute.xlu1 %v4366_v16  ;;  %v3131_v20 = vpop.permute.xlu0 %1489 }
 0x1c4   :  { %4367 = vst [vmem:[#allocation27_spill] sm:$0xff] %v3131_v20  ;;  %1305 = vperm.xlu1 %2378, %v2801_v17   ;;  %v3134_v4 = vpop.permute.xlu1 %945 }
 0x1c8   :  { %1313 = vperm.xlu1 %2378, %v2945_v3   ;;  %v3137_v42 = vpop.permute.xlu1 %949  ;;  %v3139_v51 = vpop.permute.xlu0 %1621 }
 0x1c9   :  { %4368 = vst [vmem:[#allocation28_spill] sm:$0xff] %v3137_v42  ;;  %4369 = vst [vmem:[#allocation29_spill] sm:$0xff] %v3139_v51  ;;  %v4305_v42 = vmov 12  }
 0x1cc   :  { %1317 = vperm.xlu1 %2378, %v2856_v45   ;;  %v3142_v37 = vpop.permute.xlu1 %965  ;;  %v3144_v53 = vpop.permute.xlu0 %1633 }
 0x1cd   :  { %4370 = vst [vmem:[#allocation30_spill] sm:$0xff] %v3144_v53 }
 0x1d0   :  { %1325 = vperm.xlu1 %2378, %v2913_v24   ;;  %v3147_v18 = vpop.permute.xlu0 %1641 }
 0x1d1   :  { %4371 = vst [vmem:[#allocation31_spill] sm:$0xff] %v3147_v18  ;;  %v3149_v20 = vpop.permute.xlu1 %993 }
 0x1d2   :  { %4372 = vst [vmem:[#allocation32_spill] sm:$0xff] %v3149_v20  ;;  %v4442_v20 = vmov 15  }
 0x1d4   :  { %1333 = vperm.xlu1 %2378, %v2931_v61  }
 0x1d5   :  { %v3152_v16 = vpop.permute.xlu1 %1001  ;;  %v3154_v56 = vpop.permute.xlu0 %1773 }
 0x1d6   :  { %4373 = vst [vmem:[#allocation33_spill] sm:$0xff] %v3152_v16  ;;  %4374 = vst [vmem:[#allocation34_spill] sm:$0xff] %v3154_v56 }
 0x1d8   :  { %2380 = vset.pattern.permute.xlu1 %v4305_v42 }
 0x1d9   :  { %1361 = vperm.xlu1 %2380, %v2928_v43   ;;  %v3158_v51 = vpop.permute.xlu1 %1005  ;;  %v3160_v53 = vpop.permute.xlu0 %1785 }
 0x1da   :  { %4375 = vst [vmem:[#allocation35_spill] sm:$0xff] %v3158_v51  ;;  %4376 = vst [vmem:[#allocation36_spill] sm:$0xff] %v3160_v53 }
 0x1dd   :  { %1365 = vperm.xlu1 %2380, %v2945_v3   ;;  %v3163_v18 = vpop.permute.xlu1 %1013  ;;  %v3165_v26 = vpop.permute.xlu0 %1793 }
 0x1de   :  { %4377 = vst [vmem:[#allocation37_spill] sm:$0xff] %v3163_v18  ;;  %4378 = vst [vmem:[#allocation38_spill] sm:$0xff] %v3165_v26 }
 0x1e1   :  { %1373 = vperm.xlu1 %2380, %v2880_v44   ;;  %v3168_v16 = vpop.permute.xlu1 %1021  ;;  %v3170_v56 = vpop.permute.xlu0 %1801 }
 0x1e2   :  { %4379 = vst [vmem:[#allocation39_spill] sm:$0xff] %v3168_v16  ;;  %4380 = vst [vmem:[#allocation40_spill] sm:$0xff] %v3170_v56 }
 0x1e5   :  { %1381 = vperm.xlu1 %2380, %v2941_v46  }
 0x1e6   :  { %v3173_v42 = vpop.permute.xlu1 %1049  ;;  %v3175_v47 = vpop.permute.xlu0 %1933 }
 0x1e7   :  { %4381 = vst [vmem:[#allocation41_spill] sm:$0xff] %v3175_v47 }
 0x1e9   :  { %2381 = vset.pattern.permute.xlu1 %v4307_v27  ;;  %v300_v27 = vmul.f32 %v2983_v23, %v2564_v33 }
 0x1ea   :  { %1409 = vperm.xlu1 %2381, %v2801_v17   ;;  %v3179_v53 = vpop.permute.xlu1 %1053  ;;  %v3181_v26 = vpop.permute.xlu0 %1945 }
 0x1eb   :  { %4382 = vst [vmem:[#allocation42_spill] sm:$0xff] %v3179_v53  ;;  %4383 = vst [vmem:[#allocation43_spill] sm:$0xff] %v3181_v26  ;;  %v312_v26 = vmul.f32 %v2988_v39, %v2583_v40 }
 0x1ee   :  { %1417 = vperm.xlu1 %2381, %v2945_v3   ;;  %v3184_v16 = vpop.permute.xlu1 %1061  ;;  %v3186_v56 = vpop.permute.xlu0 %1953 }
 0x1ef   :  { %4384 = vst [vmem:[#allocation44_spill] sm:$0xff] %v3186_v56  ;;  %v324_v56 = vmul.f32 %v2635_v22, %v2587_v41 }
 0x1f2   :  { %1421 = vperm.xlu1 %2381, %v2856_v45   ;;  %v3189_v18 = vpop.permute.xlu1 %1069 }
 0x1f3   :  { %v287_v47 = vpop.permute.xlu0 %286 }
 0x1f4   :  { %v290_v15 = vmul.f32 %v287_v47, %v2578_v38  ;;  %v4387_v38 = vmov 14  }
 0x1f6   :  { %1429 = vperm.xlu1 %2381, %v2913_v24   ;;  %v302_v53 = vadd.f32 %v300_v27, %v290_v15 }
 0x1f7   :  { %v3197_v10 = vpop.permute.xlu1 %1097 }
 0x1f8   :  { %4385 = vst [vmem:[#allocation45_spill] sm:$0xff] %v3197_v10  ;;  %v314_v51 = vadd.f32 %v312_v26, %v302_v53  ;;  %v4311_v26 = vmov 15  }
 0x1fa   :  { %1437 = vperm.xlu1 %2381, %v2931_v61   ;;  %v326_v58 = vadd.f32 %v324_v56, %v314_v51 }
 0x1fb   :  { %v3202_v11 = vpop.permute.xlu1 %1105 }
 0x1fc   :  { %4386 = vst [vmem:[#allocation46_spill] sm:$0xff] %v3202_v11  ;;  %v328_v33 = vmul.f32 %v326_v58, %v2605_v52  ;;  %v4315_v11 = vmov 19  }
 0x1fe   :  { %2383 = vset.pattern.permute.xlu1 %v4387_v38  ;;  %v330_v23 = vadd.f32 %v328_v33, %v2609_v55  ;;  %v4394_v33 = vmov 4  }
 0x1ff   :  { %1465 = vperm.xlu1 %2383, %v2928_v43   ;;  %v3208_v40 = vpop.permute.xlu1 %1109 }
 0x200   :  { %4388 = vst [vmem:[#allocation47_spill] sm:$0xff] %v3208_v40  ;;  %v332_v39 = vmax.f32 %v330_v23, 0.0  ;;  %v4309_v23 = vmov 16  }
 0x202   :  { %v334_v15 = vmin.f32 %v332_v39, 6.0 }
 0x203   :  { %1469 = vperm.xlu1 %2383, %v2945_v3   ;;  %v3211_v41 = vpop.permute.xlu1 %1117 }
 0x204   :  { %4389 = vst [vmem:[#allocation48_spill] sm:$0xff] %v3211_v41  ;;  %v721_v22 = vmul.f32 %v2706_v50, %v334_v15 }
 0x206   :  { %v727_v56 = vadd.f32 %v3026_v1, %v721_v22 }
 0x207   :  { %1477 = vperm.xlu1 %2383, %v2880_v44   ;;  %v3216_v52 = vpop.permute.xlu1 %1125 }
 0x208   :  { %4390 = vst [vmem:[#allocation49_spill] sm:$0xff] %v3216_v52  ;;  %v729_v58 = vmax.f32 %v727_v56, 0.0 }
 0x20a   :  { %v3218_v55 = vmin.f32 %v729_v58, 6.0  ;;  %v4399_v58 = vmov 17  }
 0x20b   :  { %1485 = vperm.xlu1 %2383, %v2941_v46  }
 0x20c   :  { %v3221_v27 = vpop.permute.xlu1 %1153  ;;  %2021 = vperm.xlu0 %2397, %v3218_v55  }
 0x20f   :  { %2384 = vset.pattern.permute.xlu1 %v4311_v26  ;;  %v4401_v26 = vmov 6  }
 0x210   :  { %1513 = vperm.xlu1 %2384, %v2801_v17   ;;  %v3226_v50 = vpop.permute.xlu1 %1157  ;;  %2400 = vset.pattern.permute.xlu0 %v4344_v31 }
 0x211   :  { %4391 = vst [vmem:[#allocation50_spill] sm:$0xff] %v3226_v50  ;;  %893 = vperm.xlu0 %2400, %v2928_v43  }
 0x214   :  { %1521 = vperm.xlu1 %2384, %v2945_v3   ;;  %v3231_v1 = vpop.permute.xlu1 %1165 }
 0x215   :  { %905 = vperm.xlu0 %2400, %v2880_v44  }
 0x218   :  { %1525 = vperm.xlu1 %2384, %v2856_v45   ;;  %v3235_v53 = vpop.permute.xlu1 %1173 }
 0x219   :  { %913 = vperm.xlu0 %2400, %v2941_v46  }
 0x21c   :  { %1533 = vperm.xlu1 %2384, %v2913_v24  }
 0x21d   :  { %v3239_v51 = vpop.permute.xlu1 %1201  ;;  %2041 = vperm.xlu0 %2400, %v3047_v35  }
 0x21e   :  { %4392 = vst [vmem:[#allocation51_spill] sm:$0xff] %v3239_v51  ;;  %v4317_v51 = vmov 21  }
 0x220   :  { %1541 = vperm.xlu1 %2384, %v2931_v61  }
 0x221   :  { %v3243_v47 = vpop.permute.xlu1 %1209  ;;  %2402 = vset.pattern.permute.xlu0 %v4394_v33 }
 0x222   :  { %4393 = vst [vmem:[#allocation52_spill] sm:$0xff] %v3243_v47  ;;  %941 = vperm.xlu0 %2402, %v2801_v17   ;;  %v4407_v47 = vmov 7  }
 0x224   :  { %2385 = vset.pattern.permute.xlu1 %v4309_v23 }
 0x225   :  { %1569 = vperm.xlu1 %2385, %v2928_v43   ;;  %v3249_v39 = vpop.permute.xlu1 %1213 }
 0x226   :  { %4395 = vst [vmem:[#allocation53_spill] sm:$0xff] %v3249_v39  ;;  %953 = vperm.xlu0 %2402, %v2856_v45  }
 0x229   :  { %1573 = vperm.xlu1 %2385, %v2945_v3   ;;  %v3253_v15 = vpop.permute.xlu1 %1221 }
 0x22a   :  { %4396 = vst [vmem:[#allocation54_spill] sm:$0xff] %v3253_v15  ;;  %961 = vperm.xlu0 %2402, %v2913_v24   ;;  %v4418_v15 = vmov 10  }
 0x22d   :  { %1581 = vperm.xlu1 %2385, %v2880_v44   ;;  %v3257_v22 = vpop.permute.xlu1 %1229 }
 0x22e   :  { %4397 = vst [vmem:[#allocation55_spill] sm:$0xff] %v3257_v22  ;;  %969 = vperm.xlu0 %2402, %v2931_v61   ;;  %v4412_v22 = vmov 9  }
 0x231   :  { %1589 = vperm.xlu1 %2385, %v2941_v46  }
 0x232   :  { %v3261_v56 = vpop.permute.xlu1 %1257  ;;  %2057 = vperm.xlu0 %2402, %v3218_v55  }
 0x233   :  { %4398 = vst [vmem:[#allocation56_spill] sm:$0xff] %v3261_v56 }
 0x235   :  { %2386 = vset.pattern.permute.xlu1 %v4399_v58 }
 0x236   :  { %1617 = vperm.xlu1 %2386, %v2801_v17   ;;  %v3266_v23 = vpop.permute.xlu1 %1261  ;;  %2405 = vset.pattern.permute.xlu0 %v4401_v26 }
 0x237   :  { %4400 = vst [vmem:[#allocation57_spill] sm:$0xff] %v3266_v23  ;;  %1045 = vperm.xlu0 %2405, %v2801_v17  }
 0x23a   :  { %1625 = vperm.xlu1 %2386, %v2945_v3   ;;  %v3271_v38 = vpop.permute.xlu1 %1269 }
 0x23b   :  { %4402 = vst [vmem:[#allocation58_spill] sm:$0xff] %v3271_v38  ;;  %1057 = vperm.xlu0 %2405, %v2856_v45   ;;  %v4313_v38 = vmov 18  }
 0x23e   :  { %1629 = vperm.xlu1 %2386, %v2856_v45   ;;  %v3275_v56 = vpop.permute.xlu1 %1277 }
 0x23f   :  { %4403 = vst [vmem:[#allocation59_spill] sm:$0xff] %v3275_v56  ;;  %1065 = vperm.xlu0 %2405, %v2913_v24  }
 0x242   :  { %1637 = vperm.xlu1 %2386, %v2913_v24  }
 0x243   :  { %v3279_v58 = vpop.permute.xlu1 %1305  ;;  %1073 = vperm.xlu0 %2405, %v2931_v61  }
 0x244   :  { %4404 = vst [vmem:[#allocation60_spill] sm:$0xff] %v3279_v58 }
 0x246   :  { %1645 = vperm.xlu1 %2386, %v2931_v61  }
 0x247   :  { %v3283_v23 = vpop.permute.xlu1 %1313  ;;  %2077 = vperm.xlu0 %2405, %v3047_v35  }
 0x248   :  { %4405 = vst [vmem:[#allocation61_spill] sm:$0xff] %v3283_v23 }
 0x24a   :  { %2388 = vset.pattern.permute.xlu1 %v4313_v38 }
 0x24b   :  { %1673 = vperm.xlu1 %2388, %v2928_v43   ;;  %v3288_v56 = vpop.permute.xlu1 %1317  ;;  %2407 = vset.pattern.permute.xlu0 %v4407_v47 }
 0x24c   :  { %4406 = vst [vmem:[#allocation62_spill] sm:$0xff] %v3288_v56  ;;  %1101 = vperm.xlu0 %2407, %v2928_v43  }
 0x24f   :  { %1677 = vperm.xlu1 %2388, %v2945_v3   ;;  %v3293_v50 = vpop.permute.xlu1 %1325 }
 0x250   :  { %4408 = vst [vmem:[#allocation63_spill] sm:$0xff] %v3293_v50  ;;  %1113 = vperm.xlu0 %2407, %v2880_v44  }
 0x253   :  { %1685 = vperm.xlu1 %2388, %v2880_v44   ;;  %v3297_v23 = vpop.permute.xlu1 %1333 }
 0x254   :  { %4409 = vst [vmem:[#allocation64_spill] sm:$0xff] %v3297_v23  ;;  %1121 = vperm.xlu0 %2407, %v2941_v46  }
 0x257   :  { %1693 = vperm.xlu1 %2388, %v2941_v46  }
 0x258   :  { %v3301_v38 = vpop.permute.xlu1 %1361  ;;  %2093 = vperm.xlu0 %2407, %v3218_v55  }
 0x259   :  { %4410 = vst [vmem:[#allocation65_spill] sm:$0xff] %v3301_v38  ;;  %v3314_v38 = vpop.permute.xlu0 %744 }
 0x25a   :  { %4414 = vst [vmem:[#allocation68_spill] sm:$0xff] %v3314_v38 }
 0x25b   :  { %2389 = vset.pattern.permute.xlu1 %v4315_v11 }
 0x25c   :  { %1721 = vperm.xlu1 %2389, %v2801_v17   ;;  %v3306_v50 = vpop.permute.xlu1 %1365  ;;  %2410 = vset.pattern.permute.xlu0 %v4412_v22 }
 0x25d   :  { %4411 = vst [vmem:[#allocation66_spill] sm:$0xff] %v3306_v50  ;;  %1205 = vperm.xlu0 %2410, %v2928_v43   ;;  %v3323_v50 = vpop.permute.xlu0 %759 }
 0x260   :  { %1729 = vperm.xlu1 %2389, %v2945_v3   ;;  %v3311_v23 = vpop.permute.xlu1 %1373 }
 0x261   :  { %4413 = vst [vmem:[#allocation67_spill] sm:$0xff] %v3311_v23  ;;  %1217 = vperm.xlu0 %2410, %v2880_v44   ;;  %v3331_v58 = vpop.permute.xlu0 %769 }
 0x262   :  { %4419 = vst [vmem:[#allocation72_spill] sm:$0xff] %v3331_v58  ;;  %v4464_v58 = vmov 18  }
 0x264   :  { %1733 = vperm.xlu1 %2389, %v2856_v45   ;;  %v3317_v56 = vpop.permute.xlu1 %1381 }
 0x265   :  { %4415 = vst [vmem:[#allocation69_spill] sm:$0xff] %v3317_v56  ;;  %1225 = vperm.xlu0 %2410, %v2941_v46   ;;  %v4420_v56 = vmov 20   ;;  %v3341_v52 = vpop.permute.xlu0 %2006 }
 0x266   :  { %4423 = vst [vmem:[#allocation75_spill] sm:$0xff] %v3341_v52 }
 0x268   :  { %1741 = vperm.xlu1 %2389, %v2913_v24  }
 0x269   :  { %v3321_v11 = vpop.permute.xlu1 %1409  ;;  %2113 = vperm.xlu0 %2410, %v3047_v35  }
 0x26a   :  { %4416 = vst [vmem:[#allocation70_spill] sm:$0xff] %v3321_v11 }
 0x26c   :  { %1749 = vperm.xlu1 %2389, %v2931_v61  }
 0x26d   :  { %v3327_v23 = vpop.permute.xlu1 %1417  ;;  %2412 = vset.pattern.permute.xlu0 %v4418_v15 }
 0x26e   :  { %4417 = vst [vmem:[#allocation71_spill] sm:$0xff] %v3327_v23  ;;  %1253 = vperm.xlu0 %2412, %v2801_v17  }
 0x270   :  { %2391 = vset.pattern.permute.xlu1 %v4420_v56  ;;  %v3348_v56 = vpop.permute.xlu0 %789 }
 0x271   :  { %1777 = vperm.xlu1 %2391, %v2928_v43   ;;  %v3335_v39 = vpop.permute.xlu1 %1421 }
 0x272   :  { %4421 = vst [vmem:[#allocation73_spill] sm:$0xff] %v3335_v39  ;;  %1265 = vperm.xlu0 %2412, %v2856_v45  }
 0x275   :  { %1781 = vperm.xlu1 %2391, %v2945_v3   ;;  %v3339_v11 = vpop.permute.xlu1 %1429 }
 0x276   :  { %4422 = vst [vmem:[#allocation74_spill] sm:$0xff] %v3339_v11  ;;  %1273 = vperm.xlu0 %2412, %v2913_v24   ;;  %v3355_v11 = vpop.permute.xlu0 %801 }
 0x279   :  { %1789 = vperm.xlu1 %2391, %v2880_v44   ;;  %v3345_v23 = vpop.permute.xlu1 %1437 }
 0x27a   :  { %4424 = vst [vmem:[#allocation76_spill] sm:$0xff] %v3345_v23  ;;  %1281 = vperm.xlu0 %2412, %v2931_v61   ;;  %v4427_v23 = vmov 12  }
 0x27d   :  { %1797 = vperm.xlu1 %2391, %v2941_v46  }
 0x27e   :  { %v3351_v39 = vpop.permute.xlu1 %1465  ;;  %2129 = vperm.xlu0 %2412, %v3218_v55  }
 0x27f   :  { %4425 = vst [vmem:[#allocation77_spill] sm:$0xff] %v3351_v39  ;;  %v3365_v39 = vpop.permute.xlu0 %809 }
 0x281   :  { %2392 = vset.pattern.permute.xlu1 %v4317_v51 }
 0x282   :  { %1825 = vperm.xlu1 %2392, %v2801_v17   ;;  %v3358_v52 = vpop.permute.xlu1 %1469  ;;  %2415 = vset.pattern.permute.xlu0 %v4427_v23 }
 0x283   :  { %4426 = vst [vmem:[#allocation78_spill] sm:$0xff] %v3358_v52  ;;  %1357 = vperm.xlu0 %2415, %v2801_v17  }
 0x286   :  { %1833 = vperm.xlu1 %2392, %v2945_v3   ;;  %v3363_v41 = vpop.permute.xlu1 %1477 }
 0x287   :  { %4428 = vst [vmem:[#allocation79_spill] sm:$0xff] %v3363_v41  ;;  %1369 = vperm.xlu0 %2415, %v2856_v45  }
 0x28a   :  { %1837 = vperm.xlu1 %2392, %v2856_v45   ;;  %v3369_v51 = vpop.permute.xlu1 %1485 }
 0x28b   :  { %4429 = vst [vmem:[#allocation80_spill] sm:$0xff] %v3369_v51  ;;  %1377 = vperm.xlu0 %2415, %v2913_v24   ;;  %v3372_v15 = vpop.permute.xlu0 %2021  ;;  %v4319_v51 = vmov 22  }
 0x28c   :  { %4430 = vst [vmem:[#allocation81_spill] sm:$0xff] %v3372_v15 }
 0x28e   :  { %1845 = vperm.xlu1 %2392, %v2913_v24  }
 0x28f   :  { %v3375_v52 = vpop.permute.xlu1 %1513  ;;  %1385 = vperm.xlu0 %2415, %v2931_v61  }
 0x290   :  { %4431 = vst [vmem:[#allocation82_spill] sm:$0xff] %v3375_v52  ;;  %v3378_v23 = vpop.permute.xlu0 %893  ;;  %v4434_v52 = vmov 13  }
 0x292   :  { %1853 = vperm.xlu1 %2392, %v2931_v61  }
 0x293   :  { %v3381_v41 = vpop.permute.xlu1 %1521  ;;  %2149 = vperm.xlu0 %2415, %v3047_v35  }
 0x294   :  { %4432 = vst [vmem:[#allocation83_spill] sm:$0xff] %v3381_v41  ;;  %v3384_v40 = vpop.permute.xlu0 %905 }
 0x296   :  { %2393 = vset.pattern.permute.xlu1 %v4319_v51 }
 0x297   :  { %1881 = vperm.xlu1 %2393, %v2928_v43   ;;  %v3388_v15 = vpop.permute.xlu1 %1525  ;;  %2417 = vset.pattern.permute.xlu0 %v4434_v52 }
 0x298   :  { %4433 = vst [vmem:[#allocation84_spill] sm:$0xff] %v3388_v15  ;;  %1413 = vperm.xlu0 %2417, %v2928_v43   ;;  %v3392_v22 = vpop.permute.xlu0 %913 }
 0x29b   :  { %1885 = vperm.xlu1 %2393, %v2945_v3   ;;  %v3395_v41 = vpop.permute.xlu1 %1533 }
 0x29c   :  { %4435 = vst [vmem:[#allocation85_spill] sm:$0xff] %v3395_v41  ;;  %1425 = vperm.xlu0 %2417, %v2880_v44   ;;  %v3398_v10 = vpop.permute.xlu0 %2041  ;;  %v4440_v41 = vmov 23  }
 0x29d   :  { %4436 = vst [vmem:[#allocation86_spill] sm:$0xff] %v3398_v10 }
 0x29f   :  { %1893 = vperm.xlu1 %2393, %v2880_v44   ;;  %v3401_v51 = vpop.permute.xlu1 %1541 }
 0x2a0   :  { %4437 = vst [vmem:[#allocation87_spill] sm:$0xff] %v3401_v51  ;;  %1433 = vperm.xlu0 %2417, %v2941_v46  }
 0x2a1   :  { %v3404_v15 = vpop.permute.xlu0 %941 }
 0x2a3   :  { %1901 = vperm.xlu1 %2393, %v2941_v46  }
 0x2a4   :  { %v3407_v52 = vpop.permute.xlu1 %1569  ;;  %2165 = vperm.xlu0 %2417, %v3218_v55  }
 0x2a5   :  { %4438 = vst [vmem:[#allocation88_spill] sm:$0xff] %v3407_v52  ;;  %v3410_v38 = vpop.permute.xlu0 %953 }
 0x2a6   :  { %4439 = vst [vmem:[#allocation89_spill] sm:$0xff] %v3410_v38 }
 0x2a7   :  { %2394 = vset.pattern.permute.xlu1 %v4440_v41 }
 0x2a8   :  { %1929 = vperm.xlu1 %2394, %v2801_v17   ;;  %v3414_v10 = vpop.permute.xlu1 %1573  ;;  %2420 = vset.pattern.permute.xlu0 %v4442_v20 }
 0x2a9   :  { %4441 = vst [vmem:[#allocation90_spill] sm:$0xff] %v3414_v10  ;;  %1517 = vperm.xlu0 %2420, %v2928_v43   ;;  %v3418_v51 = vpop.permute.xlu0 %961 }
 0x2aa   :  { %4443 = vst [vmem:[#allocation91_spill] sm:$0xff] %v3418_v51 }
 0x2ac   :  { %1937 = vperm.xlu1 %2394, %v2945_v3   ;;  %v3421_v7 = vpop.permute.xlu1 %1581 }
 0x2ad   :  { %4444 = vst [vmem:[#allocation92_spill] sm:$0xff] %v3421_v7  ;;  %1529 = vperm.xlu0 %2420, %v2880_v44   ;;  %v3424_v52 = vpop.permute.xlu0 %969 }
 0x2ae   :  { %4445 = vst [vmem:[#allocation93_spill] sm:$0xff] %v3424_v52  ;;  %v4451_v52 = vmov 16  }
 0x2b0   :  { %1941 = vperm.xlu1 %2394, %v2856_v45   ;;  %v3427_v41 = vpop.permute.xlu1 %1589 }
 0x2b1   :  { %4446 = vst [vmem:[#allocation94_spill] sm:$0xff] %v3427_v41  ;;  %1537 = vperm.xlu0 %2420, %v2941_v46   ;;  %v3430_v10 = vpop.permute.xlu0 %2057 }
 0x2b2   :  { %4447 = vst [vmem:[#allocation95_spill] sm:$0xff] %v3430_v10 }
 0x2b4   :  { %1949 = vperm.xlu1 %2394, %v2913_v24  }
 0x2b5   :  { %v3433_v20 = vpop.permute.xlu1 %1617  ;;  %2185 = vperm.xlu0 %2420, %v3047_v35  }
 0x2b6   :  { %4448 = vst [vmem:[#allocation96_spill] sm:$0xff] %v3433_v20  ;;  %v3436_v3 = vpop.permute.xlu0 %1045  ;;  %v27_v20 = vld [vmem:[%s4263_s2] sm:$0xff] }
 0x2b7   :  { %4449 = vst [vmem:[#allocation97_spill] sm:$0xff] %v3436_v3 }
 0x2b8   :  { %1957 = vperm.xlu1 %2394, %v2931_v61  }
 0x2b9   :  { %v3439_v7 = vpop.permute.xlu1 %1625  ;;  %2422 = vset.pattern.permute.xlu0 %v4451_v52  ;;  %v3456_v52 = vrot.slane %v27_v20, %v2550_v28 }
 0x2ba   :  { %4450 = vst [vmem:[#allocation98_spill] sm:$0xff] %v3439_v7  ;;  %1565 = vperm.xlu0 %2422, %v2801_v17   ;;  %v3443_v41 = vpop.permute.xlu0 %1057 }
 0x2bb   :  { %4452 = vst [vmem:[#allocation99_spill] sm:$0xff] %v3443_v41 }
 0x2bc   :  { %2398 = vset.pattern.permute.xlu1 %v4346_v9  ;;  %v3462_v9 = vrot.slane %v27_v20, %v2560_v32 }
 0x2bd   :  { %2011 = vperm.xlu1 %2398, %v3218_v55   ;;  %v3447_v10 = vpop.permute.xlu1 %1629 }
 0x2be   :  { %4453 = vst [vmem:[#allocation100_spill] sm:$0xff] %v3447_v10  ;;  %1577 = vperm.xlu0 %2422, %v2856_v45   ;;  %v3453_v51 = vpop.permute.xlu0 %1065  ;;  %v821_v10 = vmul.f32 %v3456_v52, %v3348_v56  ;;  %v824_v56 = vmul.f32 %v3456_v52, %v3355_v11  ;;  %v826_v11 = vmul.f32 %v3456_v52, %v3365_v39 }
 0x2bf   :  { %4454 = vst [vmem:[#allocation101_spill] sm:$0xff] %v3453_v51  ;;  %v777_v51 = vmul.f32 %v3462_v9, %v3056_v21  ;;  %v780_v21 = vmul.f32 %v3462_v9, %v3014_v19 }
 0x2c1   :  { %2399 = vset.pattern.permute.xlu1 %v4341_v2  ;;  %v3459_v7 = vpop.permute.xlu1 %1637  ;;  %v3475_v2 = vrot.slane %v27_v20, %v2567_v34  ;;  %v829_v38 = vadd.f32 %v821_v10, %v777_v51  ;;  %v832_v51 = vadd.f32 %v824_v56, %v780_v21  ;;  %v4461_v34 = vld [vmem:[#allocation6_spill] sm:$0xff] }
 0x2c2   :  { %4455 = vst [vmem:[#allocation102_spill] sm:$0xff] %v3459_v7  ;;  %2017 = vperm.xlu1 %2399, %v3047_v35   ;;  %1585 = vperm.xlu0 %2422, %v2913_v24   ;;  %v3468_v41 = vpop.permute.xlu0 %1073  ;;  %v4458_v7 = vld [vmem:[#allocation3_spill] sm:$0xff] }
 0x2c3   :  { %4456 = vst [vmem:[#allocation103_spill] sm:$0xff] %v3468_v41  ;;  %v3478_v3 = vrot.slane %v27_v20, %v4458_v7  ;;  %v876_v19 = vmul.f32 %v3475_v2, %v3034_v13  ;;  %v878_v13 = vmul.f32 %v3475_v2, %v3105_v54 }
 0x2c5   :  { %v3472_v46 = vpop.permute.xlu1 %1645  ;;  %v925_v10 = vmul.f32 %v3478_v3, %v3378_v23  ;;  %v928_v39 = vmul.f32 %v3478_v3, %v3384_v40 }
 0x2c6   :  { %4457 = vst [vmem:[#allocation104_spill] sm:$0xff] %v3472_v46  ;;  %2401 = vset.pattern.permute.xlu1 %v4342_v62  ;;  %1593 = vperm.xlu0 %2422, %v2931_v61   ;;  %v3484_v41 = vpop.permute.xlu0 %2077  ;;  %v873_v46 = vmul.f32 %v3475_v2, %v3097_v48  ;;  %v782_v48 = vmul.f32 %v3462_v9, %v3067_v63 }
 0x2c7   :  { %4459 = vst [vmem:[#allocation105_spill] sm:$0xff] %v3484_v41  ;;  %2029 = vperm.xlu1 %2401, %v3047_v35   ;;  %v3498_v41 = vrot.slane %v27_v20, %v4461_v34  ;;  %v884_v34 = vadd.f32 %v876_v19, %v832_v51  ;;  %v4465_v51 = vld [vmem:[#allocation5_spill] sm:$0xff] }
 0x2c8   :  { %v881_v62 = vadd.f32 %v873_v46, %v829_v38  ;;  %v4463_v38 = vld [vmem:[#allocation4_spill] sm:$0xff] }
 0x2c9   :  { %4462 = vst [vmem:[#allocation107_spill] sm:$0xff] %v3498_v41  ;;  %v3509_v56 = vrot.slane %v27_v20, %v4463_v38  ;;  %v977_v21 = vmul.f32 %v3498_v41, %v3134_v4  ;;  %v936_v40 = vadd.f32 %v928_v39, %v884_v34  ;;  %v980_v54 = vmul.f32 %v3498_v41, %v3049_v30  ;;  %v4467_v34 = vld [vmem:[#allocation7_spill] sm:$0xff] }
 0x2ca   :  { %v3495_v7 = vpop.permute.xlu1 %1673  ;;  %2201 = vperm.xlu0 %2422, %v3218_v55   ;;  %v933_v23 = vadd.f32 %v925_v10, %v881_v62  ;;  %v930_v10 = vmul.f32 %v3478_v3, %v3392_v22 }
 0x2cb   :  { %4460 = vst [vmem:[#allocation106_spill] sm:$0xff] %v3495_v7  ;;  %2033 = vperm.xlu1 %2401, %v3218_v55   ;;  %v1102_v46 = vpop.permute.xlu0 %1101  ;;  %v834_v7 = vadd.f32 %v826_v11, %v782_v48  ;;  %v1029_v4 = vmul.f32 %v3509_v56, %v3063_v8  ;;  %v3528_v11 = vrot.slane %v27_v20, %v4465_v51  ;;  %v3543_v8 = vld [vmem:[%s4263_s2 + $0x8] sm:$0xff] }
 0x2cc   :  { %v985_v63 = vadd.f32 %v977_v21, %v933_v23  ;;  %v3533_v48 = vrot.slane %v27_v20, %v4467_v34  ;;  %v988_v22 = vadd.f32 %v980_v54, %v936_v40  ;;  %v1032_v30 = vmul.f32 %v3509_v56, %v3069_v12 }
 0x2cd   :  { %v982_v20 = vmul.f32 %v3498_v41, %v3142_v37  ;;  %v4470_v54 = vmov 5   ;;  %v1034_v37 = vmul.f32 %v3509_v56, %v3073_v5  ;;  %v1086_v5 = vmul.f32 %v3528_v11, %v3189_v18 }
 0x2ce   :  { %v3513_v60 = vpop.permute.xlu1 %1677  ;;  %2425 = vset.pattern.permute.xlu0 %v4464_v58  ;;  %v1037_v39 = vadd.f32 %v1029_v4, %v985_v63  ;;  %v3557_v4 = vrot.slane %v3543_v8, %v2560_v32  ;;  %v776_v18 = vmul.f32 %v3462_v9, %v3009_v6  ;;  %v4473_v6 = vmov 19  }
 0x2cf   :  { %2403 = vset.pattern.permute.xlu1 %v4344_v31  ;;  %1669 = vperm.xlu0 %2425, %v2801_v17   ;;  %v1114_v62 = vpop.permute.xlu0 %1113  ;;  %v886_v31 = vadd.f32 %v878_v13, %v834_v7  ;;  %v1081_v7 = vmul.f32 %v3528_v11, %v3173_v42  ;;  %v1133_v13 = vmul.f32 %v3533_v48, %v1102_v46 }
 0x2d0   :  { %2045 = vperm.xlu1 %2403, %v3218_v55   ;;  %v1084_v42 = vmul.f32 %v3528_v11, %v3184_v16 }
 0x2d1   :  { %v938_v23 = vadd.f32 %v930_v10, %v886_v31  ;;  %v1089_v40 = vadd.f32 %v1081_v7, %v1037_v39  ;;  %v1040_v10 = vadd.f32 %v1032_v30, %v988_v22  ;;  %v1136_v31 = vmul.f32 %v3533_v48, %v1114_v62 }
 0x2d2   :  { %v3530_v19 = vpop.permute.xlu1 %1685  ;;  %v3572_v39 = vrot.slane %v3543_v8, %v2550_v28 }
 0x2d3   :  { %4466 = vst [vmem:[#allocation4_spill] sm:$0xff] %v3530_v19  ;;  %1681 = vperm.xlu0 %2425, %v2856_v45   ;;  %v1122_v21 = vpop.permute.xlu0 %1121  ;;  %v1141_v46 = vadd.f32 %v1133_v13, %v1089_v40  ;;  %v1092_v30 = vadd.f32 %v1084_v42, %v1040_v10 }
 0x2d4   :  { %2404 = vset.pattern.permute.xlu1 %v4394_v33  ;;  %v990_v33 = vadd.f32 %v982_v20, %v938_v23  ;;  %v1185_v23 = vmul.f32 %v3557_v4, %v3221_v27  ;;  %4471 = vst [vmem:[#allocation108_spill] sm:$0xff] %v3572_v39  ;;  %v1138_v7 = vmul.f32 %v3533_v48, %v1122_v21 }
 0x2d5   :  { %2053 = vperm.xlu1 %2404, %v3047_v35   ;;  %v1144_v62 = vadd.f32 %v1136_v31, %v1092_v30  ;;  %v820_v27 = vmul.f32 %v3456_v52, %v3019_v49  ;;  %v1190_v30 = vmul.f32 %v3557_v4, %v3235_v53 }
 0x2d6   :  { %v3550_v63 = vpop.permute.xlu1 %1693  ;;  %v1042_v20 = vadd.f32 %v1034_v37, %v990_v33  ;;  %v1193_v13 = vadd.f32 %v1185_v23, %v1141_v46  ;;  %v1188_v33 = vmul.f32 %v3557_v4, %v3231_v1  ;;  %v823_v1 = vmul.f32 %v3456_v52, %v3079_v59 }
 0x2d7   :  { %4468 = vst [vmem:[#allocation5_spill] sm:$0xff] %v3550_v63  ;;  %1689 = vperm.xlu0 %2425, %v2913_v24   ;;  %v3553_v12 = vpop.permute.xlu0 %2093  ;;  %v828_v49 = vadd.f32 %v820_v27, %v776_v18  ;;  %v781_v59 = vmul.f32 %v3462_v9, %v3323_v50  ;;  %v825_v27 = vmul.f32 %v3456_v52, %v3084_v36  ;;  %v4476_v18 = vld [vmem:[#allocation72_spill] sm:$0xff] }
 0x2d8   :  { %4469 = vst [vmem:[#allocation7_spill] sm:$0xff] %v3553_v12  ;;  %v1094_v10 = vadd.f32 %v1086_v5, %v1042_v20  ;;  %v1196_v46 = vadd.f32 %v1188_v33, %v1144_v62  ;;  %v872_v5 = vmul.f32 %v3475_v2, %v3030_v14  ;;  %v779_v62 = vmul.f32 %v3462_v9, %v3061_v29 }
 0x2d9   :  { %2406 = vset.pattern.permute.xlu1 %v4470_v54 }
 0x2da   :  { %2065 = vperm.xlu1 %2406, %v3047_v35   ;;  %v1146_v42 = vadd.f32 %v1138_v7, %v1094_v10  ;;  %v833_v10 = vadd.f32 %v825_v27, %v781_v59 }
 0x2db   :  { %v3566_v22 = vpop.permute.xlu1 %1721  ;;  %1697 = vperm.xlu0 %2425, %v2931_v61  }
 0x2dc   :  { %v1206_v16 = vpop.permute.xlu0 %1205  ;;  %v1198_v53 = vadd.f32 %v1190_v30, %v1146_v42 }
 0x2dd   :  { %v1237_v40 = vmul.f32 %v3572_v39, %v1206_v16 }
 0x2de   :  { %2069 = vperm.xlu1 %2406, %v3218_v55  }
 0x2df   :  { %v3582_v54 = vpop.permute.xlu1 %1729  ;;  %v3586_v37 = vadd.f32 %v1237_v40, %v1193_v13  ;;  %2221 = vperm.xlu0 %2425, %v3047_v35   ;;  %v880_v13 = vadd.f32 %v872_v5, %v828_v49  ;;  %v976_v40 = vmul.f32 %v3498_v41, %v3404_v15  ;;  %v875_v15 = vmul.f32 %v3475_v2, %v3037_v0  ;;  %v4479_v49 = vld [vmem:[#allocation14_spill] sm:$0xff]  ;;  %v4480_v5 = vld [vmem:[#allocation89_spill] sm:$0xff] }
 0x2e0   :  { %v1218_v21 = vpop.permute.xlu0 %1217  ;;  %v979_v0 = vmul.f32 %v3498_v41, %v4480_v5  ;;  %v4487_v5 = vld [vmem:[#allocation91_spill] sm:$0xff] }
 0x2e1   :  { %v1240_v31 = vmul.f32 %v3572_v39, %v1218_v21  ;;  %v783_v21 = vmul.f32 %v3462_v9, %v4476_v18  ;;  %v4486_v18 = vld [vmem:[#allocation23_spill] sm:$0xff] }
 0x2e2   :  { %2408 = vset.pattern.permute.xlu1 %v4401_v26  ;;  %v924_v26 = vmul.f32 %v3478_v3, %v3041_v57  ;;  %v831_v57 = vadd.f32 %v823_v1, %v779_v62  ;;  %v827_v1 = vmul.f32 %v3456_v52, %v4479_v49  ;;  %v4483_v62 = vld [vmem:[#allocation97_spill] sm:$0xff] }
 0x2e3   :  { %2081 = vperm.xlu1 %2408, %v3218_v55   ;;  %v3594_v23 = vpop.permute.xlu1 %1733  ;;  %v3600_v20 = vadd.f32 %v1240_v31, %v1196_v46  ;;  %2427 = vset.pattern.permute.xlu0 %v4473_v6  ;;  %v4478_v46 = vld [vmem:[#allocation9_spill] sm:$0xff]  ;;  %v1080_v59 = vmul.f32 %v3528_v11, %v4483_v62 }
 0x2e4   :  { %4472 = vst [vmem:[#allocation109_spill] sm:$0xff] %v3594_v23  ;;  %1725 = vperm.xlu0 %2427, %v2928_v43   ;;  %v1226_v16 = vpop.permute.xlu0 %1225  ;;  %v932_v29 = vadd.f32 %v924_v26, %v880_v13  ;;  %v877_v31 = vmul.f32 %v3475_v2, %v4478_v46  ;;  %v883_v30 = vadd.f32 %v875_v15, %v831_v57  ;;  %v4481_v26 = vmov 8  }
 0x2e5   :  { %v1242_v7 = vmul.f32 %v3572_v39, %v1226_v16  ;;  %v929_v46 = vmul.f32 %v3478_v3, %v4486_v18 }
 0x2e6   :  { %v984_v36 = vadd.f32 %v976_v40, %v932_v29  ;;  %v885_v13 = vadd.f32 %v877_v31, %v833_v10  ;;  %v835_v40 = vadd.f32 %v827_v1, %v783_v21  ;;  %v4485_v29 = vld [vmem:[#allocation10_spill] sm:$0xff]  ;;  %v4490_v31 = vld [vmem:[#allocation99_spill] sm:$0xff] }
 0x2e7   :  { %2409 = vset.pattern.permute.xlu1 %v4407_v47  ;;  %v3616_v14 = vpop.permute.xlu1 %1741  ;;  %v3620_v33 = vadd.f32 %v1242_v7, %v1198_v53  ;;  %v927_v47 = vmul.f32 %v3478_v3, %v3116_v25  ;;  %v4482_v25 = vld [vmem:[#allocation32_spill] sm:$0xff]  ;;  %v879_v15 = vmul.f32 %v3475_v2, %v4485_v29  ;;  %v1083_v1 = vmul.f32 %v3528_v11, %v4490_v31 }
 0x2e8   :  { %4474 = vst [vmem:[#allocation110_spill] sm:$0xff] %v3616_v14  ;;  %2089 = vperm.xlu1 %2409, %v3047_v35   ;;  %1737 = vperm.xlu0 %2427, %v2880_v44   ;;  %v3624_v50 = vpop.permute.xlu0 %2113  ;;  %v1028_v16 = vmul.f32 %v3509_v56, %v4482_v25  ;;  %v4484_v53 = vld [vmem:[#allocation8_spill] sm:$0xff] }
 0x2e9   :  { %4475 = vst [vmem:[#allocation111_spill] sm:$0xff] %v3624_v50  ;;  %v935_v7 = vadd.f32 %v927_v47, %v883_v30  ;;  %v4489_v47 = vld [vmem:[#allocation35_spill] sm:$0xff]  ;;  %v887_v21 = vadd.f32 %v879_v15, %v835_v40  ;;  %v4497_v50 = vmov 21  }
 0x2ea   :  { %v1036_v57 = vadd.f32 %v1028_v16, %v984_v36  ;;  %v1031_v10 = vmul.f32 %v3509_v56, %v4489_v47  ;;  %v937_v36 = vadd.f32 %v929_v46, %v885_v13  ;;  %v4495_v13 = vld [vmem:[#allocation11_spill] sm:$0xff]  ;;  %v4496_v46 = vld [vmem:[#allocation37_spill] sm:$0xff] }
 0x2eb   :  { %v3632_v42 = vpop.permute.xlu1 %1749  ;;  %v987_v49 = vadd.f32 %v979_v0, %v935_v7  ;;  %v4491_v0 = vld [vmem:[#allocation68_spill] sm:$0xff]  ;;  %v4492_v7 = vld [vmem:[#allocation45_spill] sm:$0xff]  ;;  %v822_v15 = vmul.f32 %v3456_v52, %v4495_v13  ;;  %v1033_v31 = vmul.f32 %v3509_v56, %v4496_v46  ;;  %v4501_v46 = vld [vmem:[#allocation47_spill] sm:$0xff] }
 0x2ec   :  { %4477 = vst [vmem:[#allocation72_spill] sm:$0xff] %v3632_v42  ;;  %2411 = vset.pattern.permute.xlu1 %v4481_v26  ;;  %1745 = vperm.xlu0 %2427, %v4484_v53   ;;  %v981_v26 = vmul.f32 %v3498_v41, %v4487_v5  ;;  %v1088_v62 = vadd.f32 %v1080_v59, %v1036_v57  ;;  %v4493_v59 = vld [vmem:[#allocation25_spill] sm:$0xff] }
 0x2ed   :  { %2101 = vperm.xlu1 %2411, %v3047_v35   ;;  %v1254_v27 = vpop.permute.xlu0 %1253  ;;  %v778_v16 = vmul.f32 %v3462_v9, %v4491_v0  ;;  %v1132_v29 = vmul.f32 %v3533_v48, %v4492_v7  ;;  %v931_v57 = vmul.f32 %v3478_v3, %v4493_v59  ;;  %v4494_v5 = vld [vmem:[#allocation93_spill] sm:$0xff]  ;;  %v1039_v47 = vadd.f32 %v1031_v10, %v987_v49  ;;  %v4500_v10 = vld [vmem:[#allocation12_spill] sm:$0xff] }
 0x2ee   :  { %v989_v18 = vadd.f32 %v981_v26, %v937_v36  ;;  %v4498_v7 = vmov 9   ;;  %v4499_v26 = vld [vmem:[#allocation101_spill] sm:$0xff] }
 0x2ef   :  { %v1140_v0 = vadd.f32 %v1132_v29, %v1088_v62  ;;  %v939_v63 = vadd.f32 %v931_v57, %v887_v21  ;;  %v1091_v59 = vadd.f32 %v1083_v1, %v1039_v47  ;;  %v1085_v36 = vmul.f32 %v3528_v11, %v4499_v26  ;;  %v4503_v21 = vld [vmem:[#allocation17_spill] sm:$0xff]  ;;  %v4504_v57 = vld [vmem:[#allocation39_spill] sm:$0xff]  ;;  %v4505_v47 = vld [vmem:[#allocation2_spill] sm:$0xff] }
 0x2f0   :  { %v3653_v25 = vpop.permute.xlu1 %1777  ;;  %2237 = vperm.xlu0 %2427, %v3218_v55   ;;  %v830_v13 = vadd.f32 %v822_v15, %v778_v16  ;;  %v1135_v62 = vmul.f32 %v3533_v48, %v4501_v46  ;;  %v1041_v19 = vadd.f32 %v1033_v31, %v989_v18  ;;  %v874_v1 = vmul.f32 %v3475_v2, %v4503_v21  ;;  %v4507_v15 = vld [vmem:[#allocation103_spill] sm:$0xff]  ;;  %v4509_v18 = vld [vmem:[#allocation13_spill] sm:$0xff] }
 0x2f1   :  { %4488 = vst [vmem:[#allocation9_spill] sm:$0xff] %v3653_v25  ;;  %2105 = vperm.xlu1 %2411, %v3218_v55   ;;  %v1266_v30 = vpop.permute.xlu0 %1265  ;;  %v983_v25 = vmul.f32 %v3498_v41, %v4494_v5  ;;  %v1184_v5 = vmul.f32 %v3557_v4, %v4500_v10  ;;  %v3693_v26 = vrot.slane %v3543_v8, %v4505_v47 }
 0x2f2   :  { %v1143_v10 = vadd.f32 %v1135_v62, %v1091_v59  ;;  %v1093_v16 = vadd.f32 %v1085_v36, %v1041_v19  ;;  %v1087_v46 = vmul.f32 %v3528_v11, %v4507_v15  ;;  %v1187_v31 = vmul.f32 %v3557_v4, %v4509_v18 }
 0x2f3   :  { %v991_v29 = vadd.f32 %v983_v25, %v939_v63  ;;  %4506 = vst [vmem:[#allocation89_spill] sm:$0xff] %v3693_v26  ;;  %v1192_v12 = vadd.f32 %v1184_v5, %v1140_v0  ;;  %v4508_v25 = vmov 10   ;;  %v882_v21 = vadd.f32 %v874_v1, %v830_v13  ;;  %v4511_v0 = vld [vmem:[#allocation51_spill] sm:$0xff] }
 0x2f4   :  { %v3669_v40 = vpop.permute.xlu1 %1781  ;;  %2430 = vset.pattern.permute.xlu0 %v4497_v50  ;;  %v1236_v19 = vmul.f32 %v3572_v39, %v4511_v0  ;;  %v1288_v36 = vmul.f32 %v3693_v26, %v1254_v27  ;;  %v1195_v13 = vadd.f32 %v1187_v31, %v1143_v10  ;;  %v4516_v0 = vld [vmem:[#allocation3_spill] sm:$0xff] }
 0x2f5   :  { %2413 = vset.pattern.permute.xlu1 %v4498_v7  ;;  %1829 = vperm.xlu0 %2430, %v2928_v43   ;;  %v1274_v49 = vpop.permute.xlu0 %1273  ;;  %v1035_v43 = vmul.f32 %v3509_v56, %v4504_v57  ;;  %v4510_v57 = vld [vmem:[#allocation48_spill] sm:$0xff] }
 0x2f6   :  { %2117 = vperm.xlu1 %2413, %v3218_v55   ;;  %v1244_v18 = vadd.f32 %v1236_v19, %v1192_v12  ;;  %v4522_v19 = vld [vmem:[#allocation6_spill] sm:$0xff]  ;;  %v1293_v14 = vmul.f32 %v3693_v26, %v1274_v49 }
 0x2f7   :  { %v1043_v59 = vadd.f32 %v1035_v43, %v991_v29  ;;  %v3718_v29 = vrot.slane %v3543_v8, %v4516_v0  ;;  %v4518_v43 = vmov 11  }
 0x2f8   :  { %v3685_v7 = vpop.permute.xlu1 %1789  ;;  %v1296_v10 = vadd.f32 %v1288_v36, %v1244_v18 }
 0x2f9   :  { %4502 = vst [vmem:[#allocation14_spill] sm:$0xff] %v3685_v7  ;;  %1841 = vperm.xlu0 %2430, %v2880_v44   ;;  %v1282_v63 = vpop.permute.xlu0 %1281  ;;  %v1137_v7 = vmul.f32 %v3533_v48, %v4510_v57  ;;  %v4513_v44 = vld [vmem:[#allocation21_spill] sm:$0xff]  ;;  %v4515_v57 = vld [vmem:[#allocation15_spill] sm:$0xff]  ;;  %4517 = vst [vmem:[#allocation8_spill] sm:$0xff] %v3718_v29 }
 0x2fa   :  { %2414 = vset.pattern.permute.xlu1 %v4508_v25  ;;  %v926_v62 = vmul.f32 %v3478_v3, %v4513_v44  ;;  %v1095_v25 = vadd.f32 %v1087_v46, %v1043_v59  ;;  %v1189_v42 = vmul.f32 %v3557_v4, %v4515_v57  ;;  %v4521_v46 = vld [vmem:[#allocation28_spill] sm:$0xff]  ;;  %v3731_v59 = vrot.slane %v3543_v8, %v4522_v19 }
 0x2fb   :  { %2125 = vperm.xlu1 %2414, %v3047_v35   ;;  %v1145_v15 = vadd.f32 %v1137_v7, %v1093_v16  ;;  %v4520_v16 = vld [vmem:[#allocation53_spill] sm:$0xff]  ;;  %v978_v31 = vmul.f32 %v3498_v41, %v4521_v46  ;;  %v4524_v44 = vld [vmem:[#allocation60_spill] sm:$0xff] }
 0x2fc   :  { %v3707_v5 = vpop.permute.xlu1 %1797  ;;  %v934_v27 = vadd.f32 %v926_v62, %v882_v21  ;;  %v1239_v12 = vmul.f32 %v3572_v39, %v4520_v16  ;;  %v4526_v16 = vld [vmem:[#allocation54_spill] sm:$0xff] }
 0x2fd   :  { %4512 = vst [vmem:[#allocation32_spill] sm:$0xff] %v3707_v5  ;;  %1849 = vperm.xlu0 %2430, %v4484_v53   ;;  %v3712_v1 = vpop.permute.xlu0 %2129  ;;  %v4519_v5 = vld [vmem:[#allocation49_spill] sm:$0xff]  ;;  %v1291_v53 = vmul.f32 %v3693_v26, %v1266_v30  ;;  %v4525_v30 = vld [vmem:[#allocation16_spill] sm:$0xff]  ;;  %v1241_v46 = vmul.f32 %v3572_v39, %v4526_v16 }
 0x2fe   :  { %4514 = vst [vmem:[#allocation97_spill] sm:$0xff] %v3712_v1  ;;  %v1139_v7 = vmul.f32 %v3533_v48, %v4519_v5  ;;  %v1340_v5 = vmul.f32 %v3718_v29, %v4524_v44  ;;  %v1247_v57 = vadd.f32 %v1239_v12, %v1195_v13  ;;  %v1191_v36 = vmul.f32 %v3557_v4, %v4525_v30  ;;  %v4528_v13 = vld [vmem:[#allocation62_spill] sm:$0xff] }
 0x2ff   :  { %2416 = vset.pattern.permute.xlu1 %v4518_v43  ;;  %v1197_v43 = vadd.f32 %v1189_v42, %v1145_v15  ;;  %v986_v18 = vadd.f32 %v978_v31, %v934_v27  ;;  %v1343_v27 = vmul.f32 %v3718_v29, %v4528_v13 }
 0x300   :  { %2137 = vperm.xlu1 %2416, %v3047_v35   ;;  %v1147_v62 = vadd.f32 %v1139_v7, %v1095_v25  ;;  %v1299_v41 = vadd.f32 %v1291_v53, %v1247_v57  ;;  %v4527_v25 = vld [vmem:[#allocation33_spill] sm:$0xff]  ;;  %v4529_v53 = vmov 22   ;;  %v1295_v57 = vmul.f32 %v3693_v26, %v1282_v63 }
 0x301   :  { %v3733_v21 = vpop.permute.xlu1 %1825  ;;  %2257 = vperm.xlu0 %2430, %v3047_v35   ;;  %v1030_v42 = vmul.f32 %v3509_v56, %v4527_v25  ;;  %v1249_v7 = vadd.f32 %v1241_v46, %v1197_v43  ;;  %v4531_v25 = vmov 12   ;;  %v4533_v43 = vld [vmem:[#allocation46_spill] sm:$0xff] }
 0x302   :  { %4523 = vst [vmem:[#allocation10_spill] sm:$0xff] %v3733_v21  ;;  %v1358_v1 = vpop.permute.xlu0 %1357  ;;  %v1348_v21 = vadd.f32 %v1340_v5, %v1296_v10  ;;  %v1199_v12 = vadd.f32 %v1191_v36, %v1147_v62  ;;  %v4530_v10 = vld [vmem:[#allocation55_spill] sm:$0xff]  ;;  %v1351_v30 = vadd.f32 %v1343_v27, %v1299_v41  ;;  %v4532_v62 = vld [vmem:[#allocation42_spill] sm:$0xff]  ;;  %v1134_v36 = vmul.f32 %v3533_v48, %v4533_v43  ;;  %v4537_v43 = vld [vmem:[#allocation52_spill] sm:$0xff] }
 0x303   :  { %v1392_v23 = vmul.f32 %v3731_v59, %v1358_v1  ;;  %v1038_v49 = vadd.f32 %v1030_v42, %v986_v18  ;;  %v1243_v1 = vmul.f32 %v3572_v39, %v4530_v10  ;;  %v1301_v5 = vadd.f32 %v1293_v14, %v1249_v7  ;;  %v4535_v42 = vld [vmem:[#allocation50_spill] sm:$0xff] }
 0x304   :  { %2141 = vperm.xlu1 %2416, %v3218_v55   ;;  %v1186_v13 = vmul.f32 %v3557_v4, %v4535_v42  ;;  %v4541_v42 = vld [vmem:[#allocation61_spill] sm:$0xff] }
 0x305   :  { %v3747_v15 = vpop.permute.xlu1 %1833  ;;  %v3751_v31 = vadd.f32 %v1392_v23, %v1348_v21  ;;  %2432 = vset.pattern.permute.xlu0 %v4529_v53  ;;  %v1082_v23 = vmul.f32 %v3528_v11, %v4532_v62  ;;  %v1251_v18 = vadd.f32 %v1243_v1, %v1199_v12  ;;  %v1238_v12 = vmul.f32 %v3572_v39, %v4537_v43  ;;  %v4538_v1 = vld [vmem:[#allocation64_spill] sm:$0xff] }
 0x306   :  { %1877 = vperm.xlu0 %2432, %v2801_v17   ;;  %v1370_v44 = vpop.permute.xlu0 %1369  ;;  %v4534_v17 = vld [vmem:[#allocation63_spill] sm:$0xff] }
 0x307   :  { %v1395_v16 = vmul.f32 %v3731_v59, %v1370_v44  ;;  %v1345_v14 = vmul.f32 %v3718_v29, %v4534_v17  ;;  %v1090_v41 = vadd.f32 %v1082_v23, %v1038_v49  ;;  %v1303_v27 = vadd.f32 %v1295_v57, %v1251_v18  ;;  %v4540_v23 = vld [vmem:[#allocation57_spill] sm:$0xff] }
 0x308   :  { %2418 = vset.pattern.permute.xlu1 %v4531_v25  ;;  %v4536_v44 = vmov 13   ;;  %v1347_v49 = vmul.f32 %v3718_v29, %v4538_v1 }
 0x309   :  { %2153 = vperm.xlu1 %2418, %v3218_v55   ;;  %v3763_v21 = vpop.permute.xlu1 %1837  ;;  %v3769_v63 = vadd.f32 %v1395_v16, %v1351_v30  ;;  %v1353_v7 = vadd.f32 %v1345_v14, %v1301_v5  ;;  %v1142_v62 = vadd.f32 %v1134_v36, %v1090_v41  ;;  %v4539_v30 = vld [vmem:[#allocation56_spill] sm:$0xff]  ;;  %v1290_v36 = vmul.f32 %v3693_v26, %v4540_v23 }
 0x30a   :  { %1889 = vperm.xlu0 %2432, %v2856_v45   ;;  %v1378_v46 = vpop.permute.xlu0 %1377  ;;  %v1289_v5 = vmul.f32 %v3693_v26, %v4539_v30  ;;  %v1355_v17 = vadd.f32 %v1347_v49, %v1303_v27  ;;  %v3811_v49 = vrot.slane %v3543_v8, %v4463_v38 }
 0x30b   :  { %v1397_v10 = vmul.f32 %v3731_v59, %v1378_v46  ;;  %v1194_v16 = vadd.f32 %v1186_v13, %v1142_v62  ;;  %v4544_v62 = vld [vmem:[#allocation58_spill] sm:$0xff] }
 0x30c   :  { %v1297_v18 = vadd.f32 %v1289_v5, %v3586_v37  ;;  %v1292_v27 = vmul.f32 %v3693_v26, %v4544_v62 }
 0x30d   :  { %2419 = vset.pattern.permute.xlu1 %v4536_v44  ;;  %v3776_v25 = vpop.permute.xlu1 %1845  ;;  %v3782_v45 = vadd.f32 %v1397_v10, %v1353_v7  ;;  %v1246_v46 = vadd.f32 %v1238_v12, %v1194_v16  ;;  %v1342_v7 = vmul.f32 %v3718_v29, %v4541_v42  ;;  %v4542_v44 = vmov 14   ;;  %v4546_v12 = vld [vmem:[#allocation66_spill] sm:$0xff]  ;;  %v4547_v16 = vld [vmem:[#allocation71_spill] sm:$0xff] }
 0x30e   :  { %2161 = vperm.xlu1 %2419, %v3047_v35   ;;  %1897 = vperm.xlu0 %2432, %v2913_v24   ;;  %v1386_v57 = vpop.permute.xlu0 %1385  ;;  %v4543_v24 = vld [vmem:[#allocation18_spill] sm:$0xff]  ;;  %v1394_v1 = vmul.f32 %v3731_v59, %v4546_v12  ;;  %v1300_v30 = vadd.f32 %v1292_v27, %v3600_v20  ;;  %v1446_v23 = vmul.f32 %v3811_v49, %v4547_v16  ;;  %v29_v27 = vld [vmem:[%s4263_s2 + $0x10] sm:$0xff] }
 0x30f   :  { %v1399_v14 = vmul.f32 %v3731_v59, %v1386_v57  ;;  %v1341_v13 = vmul.f32 %v3718_v29, %v4543_v24  ;;  %v1298_v37 = vadd.f32 %v1290_v36, %v1246_v46  ;;  %v3816_v57 = vrot.slane %v3543_v8, %v4465_v51  ;;  %v4549_v36 = vld [vmem:[#allocation19_spill] sm:$0xff] }
 0x310   :  { %v4550_v46 = vld [vmem:[#allocation59_spill] sm:$0xff] }
 0x311   :  { %v3792_v41 = vpop.permute.xlu1 %1853  ;;  %v3796_v10 = vadd.f32 %v1399_v14, %v1355_v17  ;;  %v1349_v5 = vadd.f32 %v1341_v13, %v1297_v18  ;;  %v1344_v14 = vmul.f32 %v3718_v29, %v4549_v36  ;;  %v1294_v42 = vmul.f32 %v3693_v26, %v4550_v46 }
 0x312   :  { %2421 = vset.pattern.permute.xlu1 %v4542_v44  ;;  %1905 = vperm.xlu0 %2432, %v2931_v61   ;;  %v3804_v43 = vpop.permute.xlu0 %2149  ;;  %v1350_v61 = vadd.f32 %v1342_v7, %v1298_v37  ;;  %v4551_v44 = vld [vmem:[#allocation65_spill] sm:$0xff]  ;;  %v4552_v7 = vld [vmem:[#allocation78_spill] sm:$0xff]  ;;  %v3834_v13 = vrot.slane %v3543_v8, %v4467_v34 }
 0x313   :  { %4545 = vst [vmem:[#allocation23_spill] sm:$0xff] %v3804_v43  ;;  %2173 = vperm.xlu1 %2421, %v3047_v35   ;;  %v1393_v20 = vmul.f32 %v3731_v59, %v4551_v44  ;;  %v1498_v24 = vmul.f32 %v3816_v57, %v4552_v7  ;;  %v1302_v37 = vadd.f32 %v1294_v42, %v3620_v33  ;;  %v4554_v7 = vld [vmem:[#allocation20_spill] sm:$0xff]  ;;  %v4556_v33 = vmov 15  }
 0x314   :  { %v1402_v18 = vadd.f32 %v1394_v1, %v1350_v61  ;;  %v1352_v36 = vadd.f32 %v1344_v14, %v1300_v30  ;;  %v4553_v1 = vld [vmem:[#allocation83_spill] sm:$0xff]  ;;  %v3844_v44 = vrot.slane %v29_v27, %v2560_v32  ;;  %v1346_v43 = vmul.f32 %v3718_v29, %v4554_v7  ;;  %v4558_v14 = vld [vmem:[#allocation90_spill] sm:$0xff] }
 0x315   :  { %v1401_v12 = vadd.f32 %v1393_v20, %v1349_v5  ;;  %v1550_v61 = vmul.f32 %v3834_v13, %v4553_v1  ;;  %v4557_v5 = vmov 23   ;;  %v3855_v30 = vrot.slane %v29_v27, %v2550_v28 }
 0x316   :  { %v3820_v17 = vpop.permute.xlu1 %1881  ;;  %2273 = vperm.xlu0 %2432, %v3218_v55   ;;  %v1454_v46 = vadd.f32 %v1446_v23, %v1402_v18  ;;  %v1602_v42 = vmul.f32 %v3844_v44, %v4558_v14  ;;  %v3864_v7 = vrot.slane %v29_v27, %v4505_v47 }
 0x317   :  { %4548 = vst [vmem:[#allocation91_spill] sm:$0xff] %v3820_v17  ;;  %2177 = vperm.xlu1 %2421, %v3218_v55   ;;  %v1414_v62 = vpop.permute.xlu0 %1413  ;;  %v4555_v17 = vld [vmem:[#allocation67_spill] sm:$0xff] }
 0x318   :  { %v1445_v16 = vmul.f32 %v3811_v49, %v1414_v62  ;;  %v1396_v26 = vmul.f32 %v3731_v59, %v4555_v17  ;;  %v1506_v23 = vadd.f32 %v1498_v24, %v1454_v46  ;;  %v1354_v17 = vadd.f32 %v1346_v43, %v1302_v37  ;;  %v4560_v24 = vld [vmem:[#allocation69_spill] sm:$0xff] }
 0x319   :  { %v1398_v46 = vmul.f32 %v3731_v59, %v4560_v24  ;;  %v3875_v43 = vrot.slane %v29_v27, %v4516_v0 }
 0x31a   :  { %v1886_v8 = vpop.permute.xlu1 %1885  ;;  %v3850_v39 = vadd.f32 %v1445_v16, %v1401_v12  ;;  %2436 = vset.pattern.permute.xlu0 %v4557_v5  ;;  %v1404_v18 = vadd.f32 %v1396_v26, %v1352_v36  ;;  %v1558_v12 = vadd.f32 %v1550_v61, %v1506_v23  ;;  %v4559_v16 = vld [vmem:[#allocation98_spill] sm:$0xff]  ;;  %v1706_v26 = vmul.f32 %v3864_v7, %v3513_v60 }
 0x31b   :  { %2423 = vset.pattern.permute.xlu1 %v4556_v33  ;;  %v1426_v20 = vpop.permute.xlu0 %1425  ;;  %v1654_v1 = vmul.f32 %v3855_v30, %v4559_v16  ;;  %v4561_v36 = vmov 16   ;;  %v1406_v61 = vadd.f32 %v1398_v46, %v1354_v17  ;;  %v3881_v23 = vrot.slane %v29_v27, %v4522_v19  ;;  %v30_v46 = vld [vmem:[%s4263_s2 + $0x18] sm:$0x3] }
 0x31c   :  { %2189 = vperm.xlu1 %2423, %v3218_v55   ;;  %v1448_v62 = vmul.f32 %v3811_v49, %v1426_v20  ;;  %v1610_v29 = vadd.f32 %v1602_v42, %v1558_v12  ;;  %v1758_v42 = vmul.f32 %v3875_v43, %v3582_v54  ;;  %v3892_v17 = vrot.slane %v29_v27, %v4463_v38 }
 0x31d   :  { %v4563_v16 = vmov 17   ;;  %v3900_v54 = vrot.slane %v29_v27, %v4465_v51 }
 0x31e   :  { %v3866_v33 = vpop.permute.xlu1 %1893  ;;  %v3870_v14 = vadd.f32 %v1448_v62, %v1404_v18  ;;  %v1662_v20 = vadd.f32 %v1654_v1, %v1610_v29  ;;  %v1810_v62 = vmul.f32 %v3881_v23, %v3669_v40  ;;  %v1862_v29 = vmul.f32 %v3892_v17, %v3747_v15 }
 0x31f   :  { %v1434_v37 = vpop.permute.xlu0 %1433  ;;  %v1914_v40 = vmul.f32 %v3900_v54, %v1886_v8 }
 0x320   :  { %2424 = vset.pattern.permute.xlu1 %v4561_v36  ;;  %v1450_v47 = vmul.f32 %v3811_v49, %v1434_v37  ;;  %v1714_v0 = vadd.f32 %v1706_v26, %v1662_v20  ;;  %v3912_v26 = vrot.slane %v29_v27, %v4467_v34  ;;  %v3916_v36 = vrot.slane %v30_v46, %v2560_v32 }
 0x321   :  { %2197 = vperm.xlu1 %2424, %v3047_v35  }
 0x322   :  { %v3885_v18 = vpop.permute.xlu1 %1901  ;;  %v3887_v60 = vadd.f32 %v1450_v47, %v1406_v61  ;;  %v1766_v19 = vadd.f32 %v1758_v42, %v1714_v0  ;;  %v3922_v47 = vrot.slane %v30_v46, %v2550_v28  ;;  %v2438_v28 = vld [vmem:[%s4261_s0 + $0x8] sm:$0xf] }
 0x323   :  { %v3894_v12 = vpop.permute.xlu0 %2165 }
 0x324   :  { %4562 = vst [vmem:[#allocation35_spill] sm:$0xff] %v3894_v12  ;;  %v1818_v24 = vadd.f32 %v1810_v62, %v1766_v19  ;;  %v4568_v19 = vmov 20  }
 0x325   :  { %2426 = vset.pattern.permute.xlu1 %v4563_v16 }
 0x326   :  { %2209 = vperm.xlu1 %2426, %v3047_v35   ;;  %v1870_v15 = vadd.f32 %v1862_v29, %v1818_v24 }
 0x327   :  { %v3903_v1 = vpop.permute.xlu1 %1929 }
 0x328   :  { %v3906_v38 = vpop.permute.xlu0 %1517  ;;  %v1922_v37 = vadd.f32 %v1914_v40, %v1870_v15  ;;  %v4569_v40 = vld [vmem:[#allocation70_spill] sm:$0xff] }
 0x329   :  { %v1444_v46 = vmul.f32 %v3811_v49, %v4569_v40 }
 0x32a   :  { %2213 = vperm.xlu1 %2426, %v3218_v55  }
 0x32b   :  { %v1938_v51 = vpop.permute.xlu1 %1937 }
 0x32c   :  { %v1966_v61 = vmul.f32 %v3912_v26, %v1938_v51  ;;  %v3919_v8 = vpop.permute.xlu0 %1529  ;;  %v1452_v51 = vadd.f32 %v1444_v46, %v3751_v31  ;;  %v4573_v46 = vld [vmem:[#allocation74_spill] sm:$0xff] }
 0x32e   :  { %v1974_v20 = vadd.f32 %v1966_v61, %v1922_v37  ;;  %2428 = vset.pattern.permute.xlu1 %v4464_v58 }
 0x32f   :  { %2225 = vperm.xlu1 %2428, %v3218_v55   ;;  %v3926_v34 = vpop.permute.xlu1 %1941 }
 0x330   :  { %4564 = vst [vmem:[#allocation99_spill] sm:$0xff] %v3926_v34  ;;  %v1986_v27 = vmul.f32 %v3916_v36, %v1974_v20  ;;  %v3929_v42 = vpop.permute.xlu0 %1537  ;;  %v4570_v20 = vld [vmem:[#allocation22_spill] sm:$0xff] }
 0x331   :  { %v4575_v34 = vld [vmem:[#allocation82_spill] sm:$0xff] }
 0x332   :  { %v1998_v32 = vadd.f32 %v3922_v47, %v1986_v27  ;;  %v1496_v27 = vmul.f32 %v3816_v57, %v4570_v20 }
 0x333   :  { %2429 = vset.pattern.permute.xlu1 %v4473_v6  ;;  %v3933_v0 = vpop.permute.xlu1 %1949 }
 0x334   :  { %4565 = vst [vmem:[#allocation68_spill] sm:$0xff] %v3933_v0  ;;  %v2298_v58 = vadd.f32 %v2438_v28, %v1998_v32  ;;  %2233 = vperm.xlu1 %2429, %v3047_v35   ;;  %v3939_v62 = vpop.permute.xlu0 %2185  ;;  %v4571_v32 = vld [vmem:[#allocation73_spill] sm:$0xff] }
 0x335   :  { %4566 = vst [vmem:[#allocation45_spill] sm:$0xff] %v3939_v62  ;;  %v1447_v28 = vmul.f32 %v3811_v49, %v4571_v32  ;;  %v4574_v32 = vld [vmem:[#allocation24_spill] sm:$0xff] }
 0x336   :  { %2309 = vst.msk [vmem:[%s4264_s3 + $0x8] sm:$0xf] %vm2306_vm2, %v2298_v58  ;;  %v4572_v58 = vld [vmem:[#allocation75_spill] sm:$0xff] }
 0x337   :  { %v3945_v16 = vpop.permute.xlu1 %1957  ;;  %v1455_v40 = vadd.f32 %v1447_v28, %v3769_v63  ;;  %v1548_v63 = vmul.f32 %v3834_v13, %v4575_v34 }
 0x338   :  { %4567 = vst [vmem:[#allocation25_spill] sm:$0xff] %v3945_v16  ;;  %2431 = vset.pattern.permute.xlu1 %v4568_v19  ;;  %v2014_v19 = vmul.f32 %v4572_v58, %v3462_v9  ;;  %v1449_v16 = vmul.f32 %v3811_v49, %v4573_v46  ;;  %v1499_v58 = vmul.f32 %v3816_v57, %v4574_v32 }
 0x339   :  { %2245 = vperm.xlu1 %2431, %v3047_v35   ;;  %v1566_v6 = vpop.permute.xlu0 %1565 }
 0x33a   :  { %v1457_v28 = vadd.f32 %v1449_v16, %v3782_v45 }
 0x33c   :  { %v2012_v29 = vpop.permute.xlu1 %2011 }
 0x33d   :  { %2249 = vperm.xlu1 %2431, %v3218_v55   ;;  %v1578_v24 = vpop.permute.xlu0 %1577 }
 0x33e   :  { %v1603_v16 = vmul.f32 %v3844_v44, %v1578_v24 }
 0x341   :  { %2433 = vset.pattern.permute.xlu1 %v4497_v50  ;;  %v2018_v15 = vpop.permute.xlu1 %2017  ;;  %v1586_v37 = vpop.permute.xlu0 %1585  ;;  %v1504_v50 = vadd.f32 %v1496_v27, %v1452_v51  ;;  %v1600_v51 = vmul.f32 %v3844_v44, %v1566_v6  ;;  %v4578_v6 = vld [vmem:[#allocation76_spill] sm:$0xff] }
 0x342   :  { %2261 = vperm.xlu1 %2433, %v3218_v55   ;;  %v2024_v61 = vmul.f32 %v2018_v15, %v3456_v52  ;;  %v2015_v15 = vmul.f32 %v2012_v29, %v3462_v9  ;;  %v1507_v29 = vadd.f32 %v1499_v58, %v1455_v40 }
 0x343   :  { %v1556_v9 = vadd.f32 %v1548_v63, %v1504_v50 }
 0x344   :  { %v2026_v0 = vadd.f32 %v2024_v61, %v2014_v19 }
 0x345   :  { %v1594_v62 = vpop.permute.xlu0 %1593 }
 0x346   :  { %2434 = vset.pattern.permute.xlu1 %v4529_v53  ;;  %v2030_v31 = vpop.permute.xlu1 %2029  ;;  %v4576_v53 = vld [vmem:[#allocation81_spill] sm:$0xff] }
 0x347   :  { %v2036_v20 = vmul.f32 %v2030_v31, %v3475_v2  ;;  %2269 = vperm.xlu1 %2434, %v3047_v35   ;;  %v2025_v27 = vmul.f32 %v4576_v53, %v3456_v52  ;;  %v4577_v31 = vld [vmem:[#allocation26_spill] sm:$0xff]  ;;  %v1451_v52 = vmul.f32 %v3811_v49, %v4578_v6  ;;  %v4579_v53 = vld [vmem:[#allocation84_spill] sm:$0xff] }
 0x348   :  { %v1501_v32 = vmul.f32 %v3816_v57, %v4577_v31  ;;  %v1551_v45 = vmul.f32 %v3834_v13, %v4579_v53  ;;  %v4584_v53 = vld [vmem:[#allocation34_spill] sm:$0xff] }
 0x349   :  { %v3977_v46 = vadd.f32 %v2036_v20, %v2026_v0  ;;  %v3979_v61 = vpop.permute.xlu0 %2201  ;;  %v2027_v12 = vadd.f32 %v2025_v27, %v2015_v15  ;;  %v1608_v0 = vadd.f32 %v1600_v51, %v1556_v9  ;;  %v4580_v20 = vld [vmem:[#allocation96_spill] sm:$0xff]  ;;  %v4582_v27 = vld [vmem:[#allocation85_spill] sm:$0xff]  ;;  %v1605_v51 = vmul.f32 %v3844_v44, %v1586_v37 }
 0x34a   :  { %v2034_v19 = vpop.permute.xlu1 %2033  ;;  %v1509_v40 = vadd.f32 %v1501_v32, %v1457_v28  ;;  %v1652_v15 = vmul.f32 %v3855_v30, %v4580_v20  ;;  %v1559_v58 = vadd.f32 %v1551_v45, %v1507_v29  ;;  %v1808_v45 = vmul.f32 %v3881_v23, %v4584_v53 }
 0x34b   :  { %v2037_v34 = vmul.f32 %v2034_v19, %v3475_v2  ;;  %2435 = vset.pattern.permute.xlu1 %v4557_v5  ;;  %v1459_v2 = vadd.f32 %v1451_v52, %v3796_v10  ;;  %v4581_v5 = vld [vmem:[#allocation27_spill] sm:$0xff]  ;;  %v1553_v19 = vmul.f32 %v3834_v13, %v4582_v27  ;;  %v4583_v10 = vld [vmem:[#allocation100_spill] sm:$0xff] }
 0x34c   :  { %2281 = vperm.xlu1 %2435, %v3047_v35   ;;  %v1503_v63 = vmul.f32 %v3816_v57, %v4581_v5  ;;  %v1611_v31 = vadd.f32 %v1603_v16, %v1559_v58  ;;  %v1660_v35 = vadd.f32 %v1652_v15, %v1608_v0  ;;  %v1655_v29 = vmul.f32 %v3855_v30, %v4583_v10  ;;  %v4585_v0 = vld [vmem:[#allocation87_spill] sm:$0xff] }
 0x34d   :  { %v2039_v50 = vadd.f32 %v2037_v34, %v2027_v12  ;;  %v1561_v32 = vadd.f32 %v1553_v19, %v1509_v40  ;;  %v1756_v34 = vmul.f32 %v3875_v43, %v3566_v22  ;;  %v1555_v16 = vmul.f32 %v3834_v13, %v4585_v0  ;;  %v4586_v19 = vld [vmem:[#allocation102_spill] sm:$0xff]  ;;  %v4591_v0 = vld [vmem:[#allocation104_spill] sm:$0xff] }
 0x34e   :  { %v1670_v9 = vpop.permute.xlu0 %1669  ;;  %v1511_v6 = vadd.f32 %v1503_v63, %v1459_v2  ;;  %v1663_v5 = vadd.f32 %v1655_v29, %v1611_v31  ;;  %v1657_v22 = vmul.f32 %v3855_v30, %v4586_v19  ;;  %v4587_v2 = vld [vmem:[#allocation109_spill] sm:$0xff]  ;;  %v4588_v63 = vld [vmem:[#allocation10_spill] sm:$0xff] }
 0x34f   :  { %v2046_v24 = vpop.permute.xlu1 %2045  ;;  %v1704_v12 = vmul.f32 %v3864_v7, %v1670_v9  ;;  %v1613_v20 = vadd.f32 %v1605_v51, %v1561_v32  ;;  %v1860_v9 = vmul.f32 %v3892_v17, %v4588_v63 }
 0x350   :  { %v2049_v28 = vmul.f32 %v2046_v24, %v3478_v3  ;;  %2285 = vperm.xlu1 %2435, %v3218_v55   ;;  %v1607_v55 = vmul.f32 %v3844_v44, %v1594_v62  ;;  %v1563_v24 = vadd.f32 %v1555_v16, %v1511_v6  ;;  %v1552_v6 = vmul.f32 %v3834_v13, %v3919_v8  ;;  %v4592_v16 = vld [vmem:[#allocation110_spill] sm:$0xff] }
 0x351   :  { %v1712_v52 = vadd.f32 %v1704_v12, %v1660_v35  ;;  %v4589_v12 = vld [vmem:[#allocation36_spill] sm:$0xff]  ;;  %v1665_v31 = vadd.f32 %v1657_v22, %v1613_v20  ;;  %v1863_v20 = vmul.f32 %v3892_v17, %v3763_v21  ;;  %v1554_v8 = vmul.f32 %v3834_v13, %v3929_v42  ;;  %v4595_v21 = vld [vmem:[#allocation30_spill] sm:$0xff] }
 0x352   :  { %v2051_v37 = vadd.f32 %v2049_v28, %v2039_v50  ;;  %v1682_v15 = vpop.permute.xlu0 %1681  ;;  %v1759_v50 = vmul.f32 %v3875_v43, %v4587_v2  ;;  %v1811_v62 = vmul.f32 %v3881_v23, %v4589_v12  ;;  %v1615_v10 = vadd.f32 %v1607_v55, %v1563_v24  ;;  %v4594_v22 = vld [vmem:[#allocation80_spill] sm:$0xff] }
 0x353   :  { %v1764_v58 = vadd.f32 %v1756_v34, %v1712_v52  ;;  %v1707_v40 = vmul.f32 %v3864_v7, %v1682_v15  ;;  %v4590_v52 = vld [vmem:[#allocation79_spill] sm:$0xff]  ;;  %v1659_v15 = vmul.f32 %v3855_v30, %v4591_v0  ;;  %v1502_v2 = vmul.f32 %v3816_v57, %v4594_v22  ;;  %v4598_v0 = vld [vmem:[#allocation77_spill] sm:$0xff] }
 0x354   :  { %v2054_v27 = vpop.permute.xlu1 %2053  ;;  %v1500_v53 = vmul.f32 %v3816_v57, %v4590_v52  ;;  %v1656_v12 = vmul.f32 %v3855_v30, %v4595_v21  ;;  %v1865_v42 = vmul.f32 %v3892_v17, %v3776_v25  ;;  %v1549_v25 = vmul.f32 %v3834_v13, %v3906_v38 }
 0x355   :  { %v1715_v35 = vadd.f32 %v1707_v40, %v1663_v5  ;;  %v1816_v51 = vadd.f32 %v1808_v45, %v1764_v58  ;;  %v1761_v58 = vmul.f32 %v3875_v43, %v4592_v16  ;;  %v4593_v40 = vld [vmem:[#allocation38_spill] sm:$0xff]  ;;  %v1667_v24 = vadd.f32 %v1659_v15, %v1615_v10  ;;  %v4599_v16 = vld [vmem:[#allocation107_spill] sm:$0xff] }
 0x356   :  { %v1690_v28 = vpop.permute.xlu0 %1689  ;;  %v1813_v19 = vmul.f32 %v3881_v23, %v4593_v40  ;;  %v1510_v10 = vadd.f32 %v1502_v2, %v3887_v60  ;;  %v1497_v15 = vmul.f32 %v3816_v57, %v4598_v0 }
 0x357   :  { %v1767_v29 = vadd.f32 %v1759_v50, %v1715_v35  ;;  %v1709_v32 = vmul.f32 %v3864_v7, %v1690_v28  ;;  %v4021_v34 = vadd.f32 %v1860_v9, %v1816_v51  ;;  %v1508_v50 = vadd.f32 %v1500_v53, %v3870_v14 }
 0x358   :  { %v1562_v22 = vadd.f32 %v1554_v8, %v1510_v10 }
 0x359   :  { %v2066_v45 = vpop.permute.xlu1 %2065  ;;  %v1717_v55 = vadd.f32 %v1709_v32, %v1665_v31  ;;  %v1819_v5 = vadd.f32 %v1811_v62, %v1767_v29  ;;  %v4596_v62 = vld [vmem:[#allocation40_spill] sm:$0xff]  ;;  %v1560_v14 = vadd.f32 %v1552_v6, %v1508_v50 }
 0x35a   :  { %v1698_v63 = vpop.permute.xlu0 %1697  ;;  %v1815_v28 = vmul.f32 %v3881_v23, %v4596_v62  ;;  %v4597_v31 = vld [vmem:[#allocation72_spill] sm:$0xff]  ;;  %v1867_v62 = vmul.f32 %v3892_v17, %v3792_v41 }
 0x35b   :  { %v1769_v9 = vadd.f32 %v1761_v58, %v1717_v55  ;;  %v1711_v35 = vmul.f32 %v3864_v7, %v1698_v63  ;;  %v4041_v51 = vadd.f32 %v1863_v20, %v1819_v5  ;;  %v1763_v29 = vmul.f32 %v3875_v43, %v4597_v31  ;;  %v4600_v58 = vld [vmem:[#allocation95_spill] sm:$0xff]  ;;  %v4601_v55 = vld [vmem:[#allocation92_spill] sm:$0xff] }
 0x35c   :  { %v2061_v20 = vmul.f32 %v4600_v58, %v4599_v16  ;;  %v1604_v5 = vmul.f32 %v3844_v44, %v4601_v55  ;;  %v1505_v31 = vadd.f32 %v1497_v15, %v3850_v39  ;;  %v4605_v15 = vld [vmem:[#allocation31_spill] sm:$0xff] }
 0x35d   :  { %v2070_v32 = vpop.permute.xlu1 %2069  ;;  %v1719_v52 = vadd.f32 %v1711_v35, %v1667_v24  ;;  %v1821_v53 = vadd.f32 %v1813_v19, %v1769_v9  ;;  %v4602_v19 = vld [vmem:[#allocation86_spill] sm:$0xff]  ;;  %v2060_v9 = vmul.f32 %v2054_v27, %v4599_v16 }
 0x35e   :  { %v4058_v40 = vpop.permute.xlu0 %2221  ;;  %v2073_v6 = vmul.f32 %v2070_v32, %v3509_v56  ;;  %v2048_v50 = vmul.f32 %v4602_v19, %v3478_v3  ;;  %v1612_v63 = vadd.f32 %v1604_v5, %v1560_v14  ;;  %v2063_v24 = vadd.f32 %v2061_v20, %v2051_v37  ;;  %v4603_v35 = vld [vmem:[#allocation94_spill] sm:$0xff] }
 0x35f   :  { %v1771_v60 = vadd.f32 %v1763_v29, %v1719_v52  ;;  %v4063_v2 = vadd.f32 %v1865_v42, %v1821_v53  ;;  %v1606_v21 = vmul.f32 %v3844_v44, %v4603_v35  ;;  %v2072_v32 = vmul.f32 %v2066_v45, %v3509_v56  ;;  %v4604_v52 = vld [vmem:[#allocation7_spill] sm:$0xff]  ;;  %v4607_v45 = vld [vmem:[#allocation4_spill] sm:$0xff] }
 0x360   :  { %v2050_v29 = vadd.f32 %v2048_v50, %v3977_v46  ;;  %v2075_v42 = vadd.f32 %v2073_v6, %v2063_v24  ;;  %v1557_v14 = vadd.f32 %v1549_v25, %v1505_v31  ;;  %v2097_v53 = vmul.f32 %v4604_v52, %v3533_v48  ;;  %v4606_v46 = vld [vmem:[#allocation88_spill] sm:$0xff]  ;;  %v4610_v24 = vld [vmem:[#allocation5_spill] sm:$0xff] }
 0x361   :  { %v1823_v8 = vadd.f32 %v1815_v28, %v1771_v60  ;;  %v1614_v27 = vadd.f32 %v1606_v21, %v1562_v22  ;;  %v1664_v0 = vadd.f32 %v1656_v12, %v1612_v63  ;;  %v1658_v28 = vmul.f32 %v3855_v30, %v4605_v15  ;;  %v4608_v22 = vld [vmem:[#allocation105_spill] sm:$0xff]  ;;  %v4611_v21 = vld [vmem:[#allocation14_spill] sm:$0xff]  ;;  %v4615_v15 = vld [vmem:[#allocation32_spill] sm:$0xff] }
 0x362   :  { %v2082_v38 = vpop.permute.xlu1 %2081  ;;  %v2062_v41 = vadd.f32 %v2060_v9, %v2050_v29  ;;  %v1601_v56 = vmul.f32 %v3844_v44, %v4606_v46  ;;  %v1708_v16 = vmul.f32 %v3864_v7, %v4607_v45  ;;  %v2084_v60 = vmul.f32 %v4608_v22, %v3528_v11  ;;  %v4609_v63 = vld [vmem:[#allocation29_spill] sm:$0xff] }
 0x363   :  { %v2085_v3 = vmul.f32 %v2082_v38, %v3528_v11  ;;  %v1726_v37 = vpop.permute.xlu0 %1725  ;;  %v4076_v10 = vadd.f32 %v1867_v62, %v1823_v8  ;;  %v1666_v25 = vadd.f32 %v1658_v28, %v1614_v27  ;;  %v1653_v9 = vmul.f32 %v3855_v30, %v4609_v63  ;;  %v4612_v27 = vld [vmem:[#allocation106_spill] sm:$0xff]  ;;  %v4616_v22 = vld [vmem:[#allocation9_spill] sm:$0xff] }
 0x364   :  { %v2074_v58 = vadd.f32 %v2072_v32, %v2062_v41  ;;  %v1609_v5 = vadd.f32 %v1601_v56, %v1557_v14  ;;  %v1716_v12 = vadd.f32 %v1708_v16, %v1664_v0  ;;  %v1710_v35 = vmul.f32 %v3864_v7, %v4610_v24  ;;  %v4613_v41 = vld [vmem:[#allocation108_spill] sm:$0xff]  ;;  %v4614_v0 = vld [vmem:[#allocation111_spill] sm:$0xff]  ;;  %v4617_v24 = vld [vmem:[#allocation89_spill] sm:$0xff] }
 0x365   :  { %v2087_v39 = vadd.f32 %v2085_v3, %v2075_v42  ;;  %v1812_v62 = vmul.f32 %v3881_v23, %v4611_v21  ;;  %v1705_v52 = vmul.f32 %v3864_v7, %v4612_v27  ;;  %v1814_v28 = vmul.f32 %v3881_v23, %v4615_v15 }
 0x366   :  { %v2086_v38 = vadd.f32 %v2084_v60, %v2074_v58  ;;  %v1661_v8 = vadd.f32 %v1653_v9, %v1609_v5  ;;  %v1718_v32 = vadd.f32 %v1710_v35, %v1666_v25  ;;  %v4618_v35 = vld [vmem:[#allocation97_spill] sm:$0xff] }
 0x367   :  { %v2090_v20 = vpop.permute.xlu1 %2089  ;;  %v2099_v55 = vadd.f32 %v2097_v53, %v2087_v39  ;;  %v1738_v6 = vpop.permute.xlu0 %1737  ;;  %v1757_v53 = vmul.f32 %v3875_v43, %v1726_v37  ;;  %v2120_v39 = vmul.f32 %v4614_v0, %v4613_v41  ;;  %v1809_v37 = vmul.f32 %v3881_v23, %v4616_v22  ;;  %v4621_v0 = vld [vmem:[#allocation43_spill] sm:$0xff] }
 0x368   :  { %v1760_v19 = vmul.f32 %v3875_v43, %v1738_v6  ;;  %v2096_v50 = vmul.f32 %v2090_v20, %v3533_v48  ;;  %v1713_v45 = vadd.f32 %v1705_v52, %v1661_v8  ;;  %v2133_v21 = vmul.f32 %v4618_v35, %v4617_v24 }
 0x36a   :  { %v1768_v31 = vadd.f32 %v1760_v19, %v1716_v12  ;;  %v2098_v3 = vadd.f32 %v2096_v50, %v2086_v38  ;;  %v1765_v6 = vadd.f32 %v1757_v53, %v1713_v45 }
 0x36b   :  { %v1746_v29 = vpop.permute.xlu0 %1745 }
 0x36c   :  { %v2102_v11 = vpop.permute.xlu1 %2101  ;;  %v1762_v42 = vmul.f32 %v3875_v43, %v1746_v29  ;;  %v1820_v14 = vadd.f32 %v1812_v62, %v1768_v31  ;;  %v1817_v19 = vadd.f32 %v1809_v37, %v1765_v6  ;;  %v4619_v62 = vld [vmem:[#allocation91_spill] sm:$0xff]  ;;  %v4620_v29 = vld [vmem:[#allocation41_spill] sm:$0xff] }
 0x36d   :  { %v2108_v48 = vmul.f32 %v2102_v11, %v3557_v4  ;;  %v1913_v31 = vmul.f32 %v3900_v54, %v4619_v62 }
 0x36e   :  { %v1770_v46 = vadd.f32 %v1762_v42, %v1718_v32  ;;  %v1965_v32 = vmul.f32 %v3912_v26, %v4620_v29 }
 0x36f   :  { %v2110_v56 = vadd.f32 %v2108_v48, %v2098_v3  ;;  %v4105_v16 = vpop.permute.xlu0 %2237 }
 0x370   :  { %v2106_v58 = vpop.permute.xlu1 %2105  ;;  %v1822_v20 = vadd.f32 %v1814_v28, %v1770_v46 }
 0x371   :  { %v2122_v5 = vadd.f32 %v2120_v39, %v2110_v56  ;;  %v2109_v25 = vmul.f32 %v2106_v58, %v3557_v4  ;;  %v1968_v39 = vmul.f32 %v3912_v26, %v4621_v0  ;;  %v1918_v56 = vmul.f32 %v3900_v54, %v3885_v18 }
 0x373   :  { %v2111_v63 = vadd.f32 %v2109_v25, %v2099_v55  ;;  %v1916_v55 = vmul.f32 %v3900_v54, %v3866_v33 }
 0x374   :  { %v1830_v60 = vpop.permute.xlu0 %1829 }
 0x375   :  { %v2118_v12 = vpop.permute.xlu1 %2117  ;;  %v1861_v50 = vmul.f32 %v3892_v17, %v1830_v60  ;;  %v4623_v60 = vld [vmem:[#allocation44_spill] sm:$0xff] }
 0x376   :  { %v2121_v9 = vmul.f32 %v2118_v12, %v4613_v41  ;;  %v1970_v12 = vmul.f32 %v3912_v26, %v4623_v60  ;;  %v4627_v60 = vld [vmem:[#allocation68_spill] sm:$0xff] }
 0x377   :  { %v1869_v38 = vadd.f32 %v1861_v50, %v1817_v19  ;;  %v2439_v19 = vld [vmem:[%s4261_s0 + $0x4] sm:$0xf] }
 0x378   :  { %v2123_v8 = vadd.f32 %v2121_v9, %v2111_v63  ;;  %v1842_v4 = vpop.permute.xlu0 %1841  ;;  %v4624_v9 = vld [vmem:[#allocation23_spill] sm:$0xff] }
 0x379   :  { %v1921_v11 = vadd.f32 %v1913_v31, %v1869_v38  ;;  %v1864_v42 = vmul.f32 %v3892_v17, %v1842_v4  ;;  %v2440_v38 = vld [vmem:[%s4261_s0 + $0x14] sm:$0xf] }
 0x37a   :  { %v2126_v3 = vpop.permute.xlu1 %2125  ;;  %v2135_v48 = vadd.f32 %v2133_v21, %v2123_v8 }
 0x37b   :  { %v1973_v27 = vadd.f32 %v1965_v32, %v1921_v11  ;;  %v1872_v52 = vadd.f32 %v1864_v42, %v1820_v14  ;;  %v2132_v41 = vmul.f32 %v2126_v3, %v4617_v24  ;;  %v4622_v14 = vld [vmem:[#allocation8_spill] sm:$0xff]  ;;  %v2156_v24 = vmul.f32 %v4624_v9, %v3731_v59 }
 0x37c   :  { %v1850_v53 = vpop.permute.xlu0 %1849  ;;  %v1964_v3 = vmul.f32 %v3912_v26, %v3903_v1  ;;  %v4626_v1 = vld [vmem:[#allocation99_spill] sm:$0xff] }
 0x37d   :  { %v1985_v15 = vmul.f32 %v3916_v36, %v1973_v27  ;;  %v1924_v28 = vadd.f32 %v1916_v55, %v1872_v52  ;;  %v1866_v46 = vmul.f32 %v3892_v17, %v1850_v53  ;;  %v2134_v37 = vadd.f32 %v2132_v41, %v2122_v5  ;;  %v2441_v53 = vld [vmem:[%s4261_s0 + $0x1c] sm:$0xf] }
 0x37f   :  { %v2138_v45 = vpop.permute.xlu1 %2137  ;;  %v1997_v58 = vadd.f32 %v3922_v47, %v1985_v15  ;;  %v1976_v33 = vadd.f32 %v1968_v39, %v1924_v28  ;;  %v1874_v6 = vadd.f32 %v1866_v46, %v1822_v20  ;;  %v4625_v39 = vld [vmem:[#allocation35_spill] sm:$0xff] }
 0x380   :  { %v2144_v25 = vmul.f32 %v2138_v45, %v4622_v14  ;;  %v4130_v22 = vpop.permute.xlu0 %2257  ;;  %v2169_v15 = vmul.f32 %v4625_v39, %v3811_v49 }
 0x381   :  { %v2297_v50 = vadd.f32 %v2439_v19, %v1997_v58  ;;  %v1988_v18 = vmul.f32 %v3916_v36, %v1976_v33  ;;  %v1926_v63 = vadd.f32 %v1918_v56, %v1874_v6  ;;  %v2442_v19 = vld [vmem:[%s4261_s0] sm:$0xf] }
 0x382   :  { %v2146_v20 = vadd.f32 %v2144_v25, %v2134_v37 }
 0x383   :  { %v2142_v35 = vpop.permute.xlu1 %2141  ;;  %2308 = vst.msk [vmem:[%s4264_s3 + $0x4] sm:$0xf] %vm2306_vm2, %v2297_v50  ;;  %v2000_v5 = vadd.f32 %v3922_v47, %v1988_v18  ;;  %v1978_v21 = vadd.f32 %v1970_v12, %v1926_v63  ;;  %v1969_v12 = vmul.f32 %v3912_v26, %v4627_v60 }
 0x384   :  { %v2145_v62 = vmul.f32 %v2142_v35, %v4622_v14  ;;  %v2158_v31 = vadd.f32 %v2156_v24, %v2146_v20 }
 0x385   :  { %v2300_v8 = vadd.f32 %v2440_v38, %v2000_v5  ;;  %v1990_v4 = vmul.f32 %v3916_v36, %v1978_v21  ;;  %v1878_v29 = vpop.permute.xlu0 %1877  ;;  %v4628_v21 = vld [vmem:[#allocation25_spill] sm:$0xff] }
 0x386   :  { %v1912_v32 = vmul.f32 %v3900_v54, %v1878_v29  ;;  %v2147_v27 = vadd.f32 %v2145_v62, %v2135_v48  ;;  %v1971_v62 = vmul.f32 %v3912_v26, %v4628_v21  ;;  %v4629_v29 = vld [vmem:[#allocation45_spill] sm:$0xff] }
 0x387   :  { %2311 = vst.msk [vmem:[%s4264_s3 + $0x14] sm:$0xf] %vm2306_vm2, %v2300_v8  ;;  %v2002_v11 = vadd.f32 %v3922_v47, %v1990_v4 }
 0x388   :  { %v2154_v42 = vpop.permute.xlu1 %2153  ;;  %v1920_v55 = vadd.f32 %v1912_v32, %v4021_v34  ;;  %v2192_v32 = vmul.f32 %v4629_v29, %v3834_v13 }
 0x389   :  { %v2157_v52 = vmul.f32 %v2154_v42, %v3731_v59  ;;  %v2302_v41 = vadd.f32 %v2441_v53, %v2002_v11  ;;  %v1890_v0 = vpop.permute.xlu0 %1889  ;;  %v1967_v59 = vmul.f32 %v3912_v26, %v4626_v1 }
 0x38a   :  { %v1972_v28 = vadd.f32 %v1964_v3, %v1920_v55  ;;  %v1915_v46 = vmul.f32 %v3900_v54, %v1890_v0 }
 0x38b   :  { %v2159_v56 = vadd.f32 %v2157_v52, %v2147_v27  ;;  %2313 = vst.msk [vmem:[%s4264_s3 + $0x1c] sm:$0xf] %vm2306_vm2, %v2302_v41 }
 0x38c   :  { %v1984_v34 = vmul.f32 %v3916_v36, %v1972_v28  ;;  %v1923_v48 = vadd.f32 %v1915_v46, %v4041_v51  ;;  %v2205_v46 = vmul.f32 %v3979_v61, %v3844_v44 }
 0x38d   :  { %v2162_v45 = vpop.permute.xlu1 %2161  ;;  %v2171_v58 = vadd.f32 %v2169_v15, %v2159_v56  ;;  %v1898_v33 = vpop.permute.xlu0 %1897 }
 0x38e   :  { %v2168_v6 = vmul.f32 %v2162_v45, %v3811_v49  ;;  %v1996_v14 = vadd.f32 %v3922_v47, %v1984_v34  ;;  %v1975_v25 = vadd.f32 %v1967_v59, %v1923_v48  ;;  %v1917_v37 = vmul.f32 %v3900_v54, %v1898_v33 }
 0x390   :  { %v2296_v50 = vadd.f32 %v2442_v19, %v1996_v14  ;;  %v1987_v51 = vmul.f32 %v3916_v36, %v1975_v25  ;;  %v1925_v18 = vadd.f32 %v1917_v37, %v4063_v2  ;;  %v2170_v9 = vadd.f32 %v2168_v6, %v2158_v31  ;;  %v2443_v2 = vld [vmem:[%s4261_s0 + $0xc] sm:$0xf] }
 0x391   :  { %v1906_v63 = vpop.permute.xlu0 %1905 }
 0x392   :  { %v2174_v49 = vpop.permute.xlu1 %2173  ;;  %2307 = vst.msk [vmem:[%s4264_s3] sm:$0xf] %vm2306_vm2, %v2296_v50  ;;  %v1999_v24 = vadd.f32 %v3922_v47, %v1987_v51  ;;  %v1977_v20 = vadd.f32 %v1969_v12, %v1925_v18  ;;  %v1919_v35 = vmul.f32 %v3900_v54, %v1906_v63  ;;  %v2241_v12 = vmul.f32 %v4105_v16, %v3875_v43 }
 0x393   :  { %v2180_v5 = vmul.f32 %v2174_v49, %v3816_v57 }
 0x394   :  { %v2299_v31 = vadd.f32 %v2443_v2, %v1999_v24  ;;  %v1989_v38 = vmul.f32 %v3916_v36, %v1977_v20  ;;  %v1927_v8 = vadd.f32 %v1919_v35, %v4076_v10  ;;  %v2444_v10 = vld [vmem:[%s4261_s0 + $0x18] sm:$0xf] }
 0x395   :  { %v2182_v4 = vadd.f32 %v2180_v5, %v2170_v9  ;;  %v2264_v9 = vmul.f32 %v4130_v22, %v3892_v17 }
 0x396   :  { %v2178_v11 = vpop.permute.xlu1 %2177  ;;  %2310 = vst.msk [vmem:[%s4264_s3 + $0xc] sm:$0xf] %vm2306_vm2, %v2299_v31  ;;  %v2001_v42 = vadd.f32 %v3922_v47, %v1989_v38  ;;  %v1979_v3 = vadd.f32 %v1971_v62, %v1927_v8 }
 0x397   :  { %v2181_v55 = vmul.f32 %v2178_v11, %v3816_v57  ;;  %v2194_v27 = vadd.f32 %v2192_v32, %v2182_v4  ;;  %v2445_v57 = vld [vmem:[%s4261_s0 + $0x20] sm:$0xf] }
 0x398   :  { %v2301_v52 = vadd.f32 %v2444_v10, %v2001_v42  ;;  %v1991_v53 = vmul.f32 %v3916_v36, %v1979_v3  ;;  %v2446_v42 = vld [vmem:[%s4261_s0 + $0x10] sm:$0xf] }
 0x399   :  { %v2183_v39 = vadd.f32 %v2181_v55, %v2171_v58  ;;  %v2228_v58 = vmul.f32 %v4058_v40, %v3864_v7 }
 0x39a   :  { %2312 = vst.msk [vmem:[%s4264_s3 + $0x18] sm:$0xf] %vm2306_vm2, %v2301_v52  ;;  %v2003_v41 = vadd.f32 %v3922_v47, %v1991_v53 }
 0x39b   :  { %v2190_v0 = vpop.permute.xlu1 %2189 }
 0x39c   :  { %v2193_v15 = vmul.f32 %v2190_v0, %v3834_v13  ;;  %v2303_v28 = vadd.f32 %v2445_v57, %v2003_v41 }
 0x39e   :  { %v2195_v56 = vadd.f32 %v2193_v15, %v2183_v39  ;;  %2314 = vst.msk [vmem:[%s4264_s3 + $0x20] sm:$0xf] %vm2306_vm2, %v2303_v28 }
 0x3a0   :  { %v2198_v1 = vpop.permute.xlu1 %2197  ;;  %v2207_v59 = vadd.f32 %v2205_v46, %v2195_v56 }
 0x3a1   :  { %v2204_v34 = vmul.f32 %v2198_v1, %v3844_v44 }
 0x3a3   :  { %v2206_v13 = vadd.f32 %v2204_v34, %v2194_v27 }
 0x3a5   :  { %v2210_v48 = vpop.permute.xlu1 %2209 }
 0x3a6   :  { %v2216_v45 = vmul.f32 %v2210_v48, %v3855_v30 }
 0x3a8   :  { %v2218_v33 = vadd.f32 %v2216_v45, %v2206_v13 }
 0x3a9   :  { %v2214_v6 = vpop.permute.xlu1 %2213 }
 0x3aa   :  { %v2230_v61 = vadd.f32 %v2228_v58, %v2218_v33  ;;  %v2217_v14 = vmul.f32 %v2214_v6, %v3855_v30 }
 0x3ac   :  { %v2219_v37 = vadd.f32 %v2217_v14, %v2207_v59 }
 0x3ae   :  { %v2226_v25 = vpop.permute.xlu1 %2225 }
 0x3af   :  { %v2229_v60 = vmul.f32 %v2226_v25, %v3864_v7 }
 0x3b1   :  { %v2231_v44 = vadd.f32 %v2229_v60, %v2219_v37 }
 0x3b3   :  { %v2234_v19 = vpop.permute.xlu1 %2233  ;;  %v2243_v50 = vadd.f32 %v2241_v12, %v2231_v44 }
 0x3b4   :  { %v2240_v51 = vmul.f32 %v2234_v19, %v3875_v43  ;;  %v2274_v43 = vpop.permute.xlu0 %2273 }
 0x3b5   :  { %v2277_v22 = vmul.f32 %v2274_v43, %v3900_v54 }
 0x3b6   :  { %v2242_v63 = vadd.f32 %v2240_v51, %v2230_v61 }
 0x3b8   :  { %v2246_v18 = vpop.permute.xlu1 %2245 }
 0x3b9   :  { %v2252_v40 = vmul.f32 %v2246_v18, %v3881_v23 }
 0x3bb   :  { %v2254_v30 = vadd.f32 %v2252_v40, %v2242_v63 }
 0x3bc   :  { %v2250_v49 = vpop.permute.xlu1 %2249 }
 0x3bd   :  { %v2266_v24 = vadd.f32 %v2264_v9, %v2254_v30  ;;  %v2253_v7 = vmul.f32 %v2250_v49, %v3881_v23 }
 0x3bf   :  { %v2255_v21 = vadd.f32 %v2253_v7, %v2243_v50 }
 0x3c1   :  { %v2262_v20 = vpop.permute.xlu1 %2261 }
 0x3c2   :  { %v2265_v16 = vmul.f32 %v2262_v20, %v3892_v17 }
 0x3c4   :  { %v2267_v2 = vadd.f32 %v2265_v16, %v2255_v21 }
 0x3c6   :  { %v2270_v35 = vpop.permute.xlu1 %2269  ;;  %v2279_v32 = vadd.f32 %v2277_v22, %v2267_v2 }
 0x3c7   :  { %v2276_v5 = vmul.f32 %v2270_v35, %v3900_v54 }
 0x3c9   :  { %v2278_v31 = vadd.f32 %v2276_v5, %v2266_v24 }
 0x3cb   :  { %v2282_v62 = vpop.permute.xlu1 %2281 }
 0x3cc   :  { %v2288_v38 = vmul.f32 %v2282_v62, %v3912_v26 }
 0x3ce   :  { %v2290_v8 = vadd.f32 %v2288_v38, %v2278_v31 }
 0x3cf   :  { %v2286_v4 = vpop.permute.xlu1 %2285 }
 0x3d0   :  { %v2292_v29 = vmul.f32 %v2290_v8, %v3916_v36  ;;  %v2289_v23 = vmul.f32 %v2286_v4, %v3912_v26  ;;  %v2447_v26 = vld [vmem:[%s4261_s0 + $0x24] sm:$0xf] }
 0x3d2   :  { %v2294_v17 = vadd.f32 %v2292_v29, %v3922_v47  ;;  %v2291_v11 = vadd.f32 %v2289_v23, %v2279_v32 }
 0x3d4   :  { %v2304_v3 = vadd.f32 %v2446_v42, %v2294_v17  ;;  %v2293_v55 = vmul.f32 %v2291_v11, %v3916_v36 }
 0x3d6   :  { %2322 = vst.msk [vmem:[%s4264_s3 + $0x10] sm:$0xf] %vm2306_vm2, %v2304_v3  ;;  %v2295_v54 = vadd.f32 %v2293_v55, %v3922_v47 }
 0x3d8   :  { %v2305_v27 = vadd.f32 %v2447_v26, %v2295_v54 }
 0x3da   :  { %2323 = vst.msk [vmem:[%s4264_s3 + $0x24] sm:$0xf] %vm2306_vm2, %v2305_v27 }

</bundles_post_ra>
